<compile_context>
chip_gen: v6e
topology: v6e:2x2x1
jax: 0.10.0
libtpu: 0.0.40
codegen_flags: <defaults>
</compile_context>

<pallas_src>
import functools

import jax
import jax.numpy as jnp
from jax.experimental import pallas as pl
from jax.experimental.pallas import tpu as pltpu

_LANES = 128
_ROW_TILE = 8192                     # rows/block -> 8192 x 128 f32 = 4 MiB
_SMALL_N_THRESHOLD = 64 * 1024       # <= 256 KiB f32: launch overhead dominates
_NATIVE_SUBLANES = {4: 8, 2: 16, 1: 32}   # native sublane tile per itemsize
_VMEM_LIMIT_BYTES = 48 * 1024 * 1024      # 4 buffers x 4 MiB << 48 MiB, fits all gens


def _lower_bound_kernel(x_ref, o_ref, *, bound):
    # `bound` is a compile-time Python scalar (fixed at module construction in
    # the PyTorch reference): the VPU gets an immediate splat, no SMEM operand.
    o_ref[...] = jnp.maximum(x_ref[...], jnp.asarray(bound, x_ref.dtype))


def _lower_bound_2d(x2d: jax.Array, bound: float) -> jax.Array:
    rows, cols = x2d.shape
    row_tile = min(_ROW_TILE, rows)
    grid = (pl.cdiv(rows, row_tile),)  # partial last block handled by Pallas
    n = rows * cols
    itemsize = jnp.dtype(x2d.dtype).itemsize
    kernel = functools.partial(_lower_bound_kernel, bound=bound)
    # TODO(synk): on v7x, switch the row axis to pltpu.CORE_PARALLEL (with an
    # even grid) to actually shard the stream across both TensorCores; plain
    # "parallel" is a no-op on single-TC v5e/v6e and safe everywhere.
    return pl.pallas_call(
        kernel,
        out_shape=jax.ShapeDtypeStruct((rows, cols), x2d.dtype),
        grid_spec=pltpu.PrefetchScalarGridSpec(
            num_scalar_prefetch=0,
            grid=grid,
            in_specs=[pl.BlockSpec((row_tile, cols), lambda i: (i, 0))],
            out_specs=pl.BlockSpec((row_tile, cols), lambda i: (i, 0)),
        ),
        compiler_params=pltpu.CompilerParams(
            dimension_semantics=("parallel",),
            vmem_limit_bytes=_VMEM_LIMIT_BYTES,
        ),
        cost_estimate=pl.CostEstimate(
            flops=n, transcendentals=0, bytes_accessed=2 * n * itemsize),
    )(x2d)


def _lower_bound_impl(x: jax.Array, bound: float) -> jax.Array:
    """Forward: elementwise max(x, bound)."""
    # TODO(synk): for integer inputs a fractional bound is truncated by the
    # cast to x.dtype; the reference module is only used with float tensors.
    n = x.size
    if n == 0:
        return x
    itemsize = jnp.dtype(x.dtype).itemsize
    sublanes = _NATIVE_SUBLANES.get(itemsize, 8)
    group = sublanes * _LANES
    # Fast paths: (a) tiny tensors -> pallas_call setup dominates, XLA fuses the
    # clamp for free; (b) non-group-aligned sizes -> a pad+kernel+slice path
    # would cost ~3x the HBM traffic of a single fused jnp.maximum pass.
    if n < _SMALL_N_THRESHOLD or n % group != 0:
        return jnp.maximum(x, jnp.asarray(bound, x.dtype))
    x2d = x.reshape(n // _LANES, _LANES)   # free reshape of a contiguous array
    out2d = _lower_bound_2d(x2d, float(bound))
    return out2d.reshape(x.shape)


@functools.partial(jax.custom_vjp, nondiff_argnums=(1,))
def lower_bound(x: jax.Array, bound: float) -> jax.Array:
    """Equivalent of LowerBound(bound)(x): max(x, bound) with the module's
    custom gradient (identity when x is pushed up toward the bound)."""
    return _lower_bound_impl(x, bound)


def _lower_bound_fwd(x, bound):
    return _lower_bound_impl(x, bound), x


def _lower_bound_bwd(bound, x, g):
    # Matches _lowerBound.backward: pass gradient through iff x >= bound or the
    # gradient would move x upward (g < 0).
    pass_through = (x >= jnp.asarray(bound, x.dtype)) | (g < 0)
    return (pass_through.astype(g.dtype) * g,)


lower_bound.defvjp(_lower_bound_fwd, _lower_bound_bwd)


if __name__ == "__main__":
    bound = 0.11

    # 1) Small NCHW input matching typical LowerBound usage (entropy-model
    #    scales): hits the tiny-tensor fast path.
    x_small = jax.random.normal(jax.random.PRNGKey(0), (2, 4, 16, 16), jnp.float32)
    y_small = lower_bound(x_small, bound)
    jax.block_until_ready(y_small)
    assert y_small.shape == x_small.shape and y_small.dtype == x_small.dtype
    assert bool(jnp.all(y_small == jnp.maximum(x_small, jnp.float32(bound))))

    # 2) Larger aligned f32 input: exercises the Pallas kernel (grid of 2 blocks).
    x_big = jax.random.normal(jax.random.PRNGKey(1), (8, 64, 64, 64), jnp.float32)
    y_big = lower_bound(x_big, bound)
    jax.block_until_ready(y_big)
    assert bool(jnp.all(y_big == jnp.maximum(x_big, jnp.float32(bound))))

    # 3) Aligned bf16 input: exercises the Pallas kernel with a 16-sublane group.
    x_bf16 = jax.random.normal(jax.random.PRNGKey(2), (4, 64, 64, 64), jnp.bfloat16)
    y_bf16 = lower_bound(x_bf16, bound)
    jax.block_until_ready(y_bf16)
    assert bool(jnp.all(y_bf16 == jnp.maximum(x_bf16, jnp.bfloat16(bound))))

    # 4) Non-aligned size: exercises the fused fallback path (no pad/slice).
    x_odd = jax.random.normal(jax.random.PRNGKey(3), (3, 5, 7, 11), jnp.float32)
    y_odd = lower_bound(x_odd, bound)
    jax.block_until_ready(y_odd)
    assert bool(jnp.all(y_odd == jnp.maximum(x_odd, jnp.float32(bound))))

    # 5) Custom-gradient check (grad_output = 1 everywhere -> pass-through iff
    #    x >= bound), matching the PyTorch autograd function.
    g = jax.grad(lambda t: jnp.sum(lower_bound(t, bound)))(x_small)
    g_ref = (x_small >= jnp.float32(bound)).astype(jnp.float32)
    jax.block_until_ready(g)
    assert bool(jnp.all(g == g_ref))

    print("KERNEL_OK")
</pallas_src>

<mosaic_0001>
module attributes {stable_mosaic.version = 11 : i64} {
  func.func @_lower_bound_kernel(%arg0: i32, %arg1: memref<8192x128xf32, #tpu.memory_space<vmem>>, %arg2: memref<8192x128xf32, #tpu.memory_space<vmem>>) attributes {dimension_semantics = [#tpu.dimension_semantics<parallel>], iteration_bounds = array<i64: 2>, scalar_prefetch = 0 : i64, scratch_operands = 0 : i64, tpu.core_type = #tpu.core_type<tc>, window_params = [{transform_indices = @transform_0, window_bounds = array<i64: 8192, 128>}, {transform_indices = @transform_1, window_bounds = array<i64: 8192, 128>}]} {
    %c0 = arith.constant 0 : index
    %c0_0 = arith.constant 0 : index
    %0 = vector.load %arg1[%c0, %c0_0] : memref<8192x128xf32, #tpu.memory_space<vmem>>, vector<8192x128xf32>
    %cst = arith.constant 1.100000e-01 : f32
    %1 = vector.broadcast %cst : f32 to vector<8192x128xf32>
    %2 = arith.maximumf %0, %1 : vector<8192x128xf32>
    %c0_1 = arith.constant 0 : index
    %c0_2 = arith.constant 0 : index
    %3 = vector.load %arg2[%c0_1, %c0_2] : memref<8192x128xf32, #tpu.memory_space<vmem>>, vector<8192x128xf32>
    tpu.vector_store %arg2[%c0_1, %c0_2], %2 {strides = array<i32>} : memref<8192x128xf32, #tpu.memory_space<vmem>>, vector<8192x128xf32>,
    return
  }
  func.func @transform_0(%arg0: i32) -> (i32, i32) {
    %c0_i32 = arith.constant 0 : i32
    %c0_i32_0 = arith.constant 0 : i32
    return %arg0, %c0_i32 : i32, i32
  }
  func.func @transform_1(%arg0: i32) -> (i32, i32) {
    %c0_i32 = arith.constant 0 : i32
    %c0_i32_0 = arith.constant 0 : i32
    return %arg0, %c0_i32 : i32, i32
  }
}

</mosaic_0001>

<bundles_post_ra>
// kernel: tpu_custom_call.1
= control target key start
LH: loop header
LB: loop body
LE: loop exit
PB: predicated region body
PF: predicated region fallthrough
CT: control target
= control target key end

     0   :  { %6 = vsyncpa [#allocation3], 0  ;;  %s5679_s0 = inlined_call_operand.hbm [shape: f32[16384,128], index: 0, kind: input, shape index: {}]   ;;  %s5680_s1 = inlined_call_operand.hbm [shape: f32[16384,128], index: 1, kind: output, shape index: {}]  }
   0x1   :  { %8 = vsyncpa [#allocation3 + $0x1], 0 }
   0x2   :  { %9 = vsyncpa [#allocation4], 0 }
   0x3   :  { %11 = vsyncpa [#allocation4 + $0x1], 0  ;;  %s3472_s6 = smov 0   ;;  %s3474_s7 = smov 0  }
   0x4   :  { %s3476_s8 = smov 0   ;;  %s3478_s9 = smov 0  }
   0x5 LB: > { %s3493_s10 = sadd.s32 4294967295, %s3454_s9   ;;  %s3296_s11 = sadd.s32 4294967294, %s3454_s9   ;;  %s3454_s9 = sphi %s3478_s9, %s5695_s9   ;;  %s3450_s8 = sphi %s3476_s8, %s5694_s8   ;;  %s3446_s7 = sphi %s3474_s7, %s5693_s7   ;;  %s3442_s6 = sphi %s3472_s6, %s5692_s6  }
   0x6   : > { %s3497_s12 = sadd.s32 1, %s3454_s9   ;;  %s24_s13 = sadd.s32 1, %s3450_s8 }
   0x7   : > { %s21_s14 = ssub.s32 %s3454_s9, %s3497_s12  ;;  %p31_p0 = scmp.ne.s32.totalorder %s3450_s8, %s3446_s7 }
   0x8   : > { %p22_p1 = scmp.eq.s32.totalorder %s21_s14, 0  ;;  %p32_p2 = scmp.eq.s32.totalorder %s3454_s9, 0 }
   0x9   : > { %p37_p3 = scmp.ne.s32.totalorder %s3446_s7, %s3442_s6  ;;  %p38_p4 = scmp.eq.s32.totalorder %s3493_s10, 0 }
   0xa   : > { %s3509_s15 = scalar_select %p22_p1, %s3450_s8, %s24_s13  }
   0xb   : > { %p3511_p5 = por %p32_p2, %p31_p0  ;;  %p3515_p6 = por %p38_p4, %p37_p3 }
   0xc   : > { %p61_p7 = scmp.eq.s32.totalorder %s3493_s10, 1  ;;  %p67_p8 = scmp.eq.s32.totalorder %s3296_s11, 1 }
   0xd   : > { %s5684_s17 = scalar_select %p3515_p6, 1, 0 }
   0xe   : > { %p3324_p10 = scmp.lt.s32.totalorder %s3454_s9, 2  ;;  %p3522_p11 = por %p61_p7, %p31_p0 }
   0xf   : > { %p3526_p12 = por %p67_p8, %p37_p3  ;;  %s87_s20 = sand.u32 1, %s3450_s8  }
  0x10   : > { %s5685_s18 = scalar_select %p3522_p11, 1, 0 }
  0x11   : > { %s5686_s19 = scalar_select %p3526_p12, 1, 0 }
  0x12   : > { %s3310_s21 = sshll.u32 %s3454_s9, 17  ;;  %s3299_s22 = sshll.u32 %s87_s20, 13 }
  0x13   : > { %s3535_s25 = scalar_lea.hbm %s5679_s0, %s3310_s21  ;;  %s91_s26 = scalar_lea.vmem [#allocation2], %s3299_s22 }
  0x14   : > { %s98_s27 = sshll.u32 %s91_s26, 4  ;;  %p3539_p13 = pnand %p3324_p10, %p3511_p5  ;;  %s3543_s27 = int_to_ptr.vmem [resolvable:$true] %s98_s27 }
  0x15   : > { %s3545_s29 = scalar_lea.sflag [#allocation3], %s87_s20  ;;  %s3362_s30 = scalar_lea.hbm %s3535_s25, 131072 }
  0x16   : > { %p3363_p0 = scmp.ne.s32.totalorder %s3535_s25, %s3362_s30  ;;  %p3364_p1 = pneg %p3539_p13 }
  0x17   : > { %s3367_s4 = scalar_lea.hbm %s5679_s0, 262144  ;;  %p3368_p4 = scmp.lt.s32.totalorder %s3535_s25, %s5679_s0 }
  0x18   : > { %p3365_p2 = pnand %p3364_p1, %p3363_p0  ;;  %p3369_p5 = scmp.lt.s32.totalorder %s3367_s4, %s3362_s30 }
  0x1a   : > { %p3366_p3 = pneg %p3365_p2  ;;  %p3370_p7 = por %p3369_p5, %p3368_p4 }
  0x1c   : > { %p3371_p8 = pnand %p3370_p7, %p3366_p3 }
  0x1e   : > { %3374 = shalt.err (!%p3371_p8)
}
  0x1f   : > { %s3375_s13 = scalar_lea.vmem %s3543_s27, 131072  ;;  %s3456_s14 = smov [#allocation2]  }
  0x20   : > { %p3376_p10 = scmp.ne.s32.totalorder %s3543_s27, %s3375_s13  ;;  %s3380_s16 = sshll.u32 %s3456_s14, 4  ;;  %s3381_s16 = int_to_ptr.vmem [resolvable:$false] %s3380_s16 }
  0x21   : > { %s3382_s20 = scalar_lea.vmem %s3381_s16, 262144  ;;  %p3383_p2 = scmp.lt.s32.totalorder %s3543_s27, %s3381_s16 }
  0x22   : > { %p3378_p9 = pnand %p3376_p10, %p3364_p1  ;;  %p3384_p12 = scmp.lt.s32.totalorder %s3382_s20, %s3375_s13 }
  0x24   : > { %p3379_p0 = pneg %p3378_p9  ;;  %p3385_p11 = por %p3384_p12, %p3383_p2 }
  0x26   : > { %p3386_p6 = pnand %p3385_p11, %p3379_p0 }
  0x28   : > { %3389 = shalt.err (!%p3386_p6)
}
  0x29   : > { %s3457_s21 = smov 128   ;;  %s3458_s22 = smov 8  }
  0x2a   : > { %3319 = dma.hbm_to_vmem [thread:$0]  (!%p3539_p13), %s3535_s25, 131072, %s3543_s27, %s3545_s29, %s3457_s21, %s3457_s21, %s3458_s22  }
  0x2b   : > { %p3302_p9 = scmp.ge.s32.totalorder %s3454_s9, 1  ;;  %p106_p1 = scmp.lt.s32.totalorder %s3454_s9, 3 }
  0x2d   : > { %p107_p3 = pnand %p3302_p9, %p106_p1 }
  0x2e   : > { %s3569_s23 = sand.u32 (!%p107_p3), 1, %s3446_s7   ;;  %p5688_p6 = scmp.ne.s32.totalorder (!%p107_p3), %s5684_s17, 0 }
  0x2f   : > { %110 = sbr.rel (%p107_p3) target bundleno = 757 (0x2f5), region = 24  ;;  %s3303_s24 = sshll.u32 (!%p107_p3), %s3569_s23, 13 }
  0x30   : > { %s113_s26 = scalar_lea.sflag (!%p107_p3), [#allocation3], %s3569_s23  ;;  %s3573_s30 = scalar_lea.vmem (!%p107_p3), [#allocation2], %s3303_s24 }
  0x34   : > { %3433 = dma.done.wait (%p5688_p6), %s113_s26, 131072  }
  0x35   : > { %3435 = vsyncadd (%p5688_p6), %s113_s26, 4294836224  ;;  %v137_v0 = vld [vmem:[%s3573_s30] sm:$0xff]  ;;  %v138_v1 = vld [vmem:[%s3573_s30 + $0x8] sm:$0xff]  ;;  %s3585_s17 = scalar_lea.vmem [#allocation5], %s3303_s24  ;;  %s3311_s25 = sshll.u32 %s3493_s10, 17 }
  0x36   : > { %v139_v2 = vld [vmem:[%s3573_s30 + $0x10] sm:$0xff]  ;;  %v1161_v3 = vmax.f32 %v137_v0, 0.11  ;;  %v1162_v4 = vmax.f32 %v138_v1, 0.11  ;;  %v140_v6 = vld [vmem:[%s3573_s30 + $0x18] sm:$0xff]  ;;  %s5629_s29 = scalar_lea.hbm %s5680_s1, %s3311_s25 }
  0x37   : > { %v1163_v5 = vmax.f32 %v139_v2, 0.11  ;;  %v141_v7 = vld [vmem:[%s3573_s30 + $0x20] sm:$0xff]  ;;  %v142_v8 = vld [vmem:[%s3573_s30 + $0x28] sm:$0xff]  ;;  %v1164_v9 = vmax.f32 %v140_v6, 0.11 }
  0x38   : > { %2185 = vst [vmem:[%s3585_s17] sm:$0xff] %v1161_v3  ;;  %2186 = vst [vmem:[%s3585_s17 + $0x8] sm:$0xff] %v1162_v4  ;;  %v1165_v10 = vmax.f32 %v141_v7, 0.11  ;;  %v1166_v11 = vmax.f32 %v142_v8, 0.11  ;;  %v143_v12 = vld [vmem:[%s3573_s30 + $0x30] sm:$0xff] }
  0x39   : > { %2187 = vst [vmem:[%s3585_s17 + $0x10] sm:$0xff] %v1163_v5  ;;  %v144_v13 = vld [vmem:[%s3573_s30 + $0x38] sm:$0xff]  ;;  %v145_v14 = vld [vmem:[%s3573_s30 + $0x40] sm:$0xff]  ;;  %2188 = vst [vmem:[%s3585_s17 + $0x18] sm:$0xff] %v1164_v9  ;;  %v1167_v15 = vmax.f32 %v143_v12, 0.11 }
  0x3a   : > { %2189 = vst [vmem:[%s3585_s17 + $0x20] sm:$0xff] %v1165_v10  ;;  %2190 = vst [vmem:[%s3585_s17 + $0x28] sm:$0xff] %v1166_v11  ;;  %v1168_v16 = vmax.f32 %v144_v13, 0.11  ;;  %v1169_v17 = vmax.f32 %v145_v14, 0.11 }
  0x3b   : > { %v146_v18 = vld [vmem:[%s3573_s30 + $0x48] sm:$0xff]  ;;  %v147_v19 = vld [vmem:[%s3573_s30 + $0x50] sm:$0xff]  ;;  %v148_v20 = vld [vmem:[%s3573_s30 + $0x58] sm:$0xff]  ;;  %2191 = vst [vmem:[%s3585_s17 + $0x30] sm:$0xff] %v1167_v15  ;;  %s3223_s27 = sshll.u32 %s3585_s17, 4  ;;  %s3210_s2 = scalar_lea.sflag [#allocation4], %s3569_s23  ;;  %s5632_s27 = int_to_ptr.vmem [resolvable:$true] %s3223_s27 }
  0x3c   : > { %2192 = vst [vmem:[%s3585_s17 + $0x38] sm:$0xff] %v1168_v16  ;;  %2193 = vst [vmem:[%s3585_s17 + $0x40] sm:$0xff] %v1169_v17  ;;  %v1170_v21 = vmax.f32 %v146_v18, 0.11  ;;  %v1171_v22 = vmax.f32 %v147_v19, 0.11 }
  0x3d   : > { %v1172_v23 = vmax.f32 %v148_v20, 0.11  ;;  %v149_v24 = vld [vmem:[%s3573_s30 + $0x60] sm:$0xff]  ;;  %v150_v25 = vld [vmem:[%s3573_s30 + $0x68] sm:$0xff]  ;;  %v151_v26 = vld [vmem:[%s3573_s30 + $0x70] sm:$0xff]  ;;  %s3390_s3 = scalar_lea.vmem %s5632_s27, 131072 }
  0x3e   : > { %2194 = vst [vmem:[%s3585_s17 + $0x48] sm:$0xff] %v1170_v21  ;;  %2195 = vst [vmem:[%s3585_s17 + $0x50] sm:$0xff] %v1171_v22  ;;  %v1173_v27 = vmax.f32 %v149_v24, 0.11  ;;  %v1174_v28 = vmax.f32 %v150_v25, 0.11  ;;  %p3391_p11 = scmp.ne.s32.totalorder %s5632_s27, %s3390_s3 }
  0x3f   : > { %2196 = vst [vmem:[%s3585_s17 + $0x58] sm:$0xff] %v1172_v23  ;;  %v1175_v29 = vmax.f32 %v151_v26, 0.11  ;;  %v152_v30 = vld [vmem:[%s3573_s30 + $0x78] sm:$0xff]  ;;  %v153_v31 = vld [vmem:[%s3573_s30 + $0x80] sm:$0xff]  ;;  %v154_v32 = vld [vmem:[%s3573_s30 + $0x88] sm:$0xff] }
  0x40   : > { %2197 = vst [vmem:[%s3585_s17 + $0x60] sm:$0xff] %v1173_v27  ;;  %2198 = vst [vmem:[%s3585_s17 + $0x68] sm:$0xff] %v1174_v28  ;;  %v1176_v33 = vmax.f32 %v152_v30, 0.11  ;;  %v1177_v34 = vmax.f32 %v153_v31, 0.11 }
  0x41   : > { %2199 = vst [vmem:[%s3585_s17 + $0x70] sm:$0xff] %v1175_v29  ;;  %v1178_v35 = vmax.f32 %v154_v32, 0.11  ;;  %v155_v36 = vld [vmem:[%s3573_s30 + $0x90] sm:$0xff]  ;;  %v156_v37 = vld [vmem:[%s3573_s30 + $0x98] sm:$0xff]  ;;  %v157_v38 = vld [vmem:[%s3573_s30 + $0xa0] sm:$0xff] }
  0x42   : > { %2200 = vst [vmem:[%s3585_s17 + $0x78] sm:$0xff] %v1176_v33  ;;  %2201 = vst [vmem:[%s3585_s17 + $0x80] sm:$0xff] %v1177_v34  ;;  %v1179_v39 = vmax.f32 %v155_v36, 0.11  ;;  %v1180_v40 = vmax.f32 %v156_v37, 0.11 }
  0x43   : > { %2202 = vst [vmem:[%s3585_s17 + $0x88] sm:$0xff] %v1178_v35  ;;  %v1181_v41 = vmax.f32 %v157_v38, 0.11  ;;  %v158_v42 = vld [vmem:[%s3573_s30 + $0xa8] sm:$0xff]  ;;  %v159_v43 = vld [vmem:[%s3573_s30 + $0xb0] sm:$0xff]  ;;  %v160_v44 = vld [vmem:[%s3573_s30 + $0xb8] sm:$0xff] }
  0x44   : > { %2203 = vst [vmem:[%s3585_s17 + $0x90] sm:$0xff] %v1179_v39  ;;  %2204 = vst [vmem:[%s3585_s17 + $0x98] sm:$0xff] %v1180_v40  ;;  %v1182_v45 = vmax.f32 %v158_v42, 0.11  ;;  %v1183_v46 = vmax.f32 %v159_v43, 0.11 }
  0x45   : > { %2205 = vst [vmem:[%s3585_s17 + $0xa0] sm:$0xff] %v1181_v41  ;;  %v1184_v47 = vmax.f32 %v160_v44, 0.11  ;;  %v161_v48 = vld [vmem:[%s3573_s30 + $0xc0] sm:$0xff]  ;;  %v162_v49 = vld [vmem:[%s3573_s30 + $0xc8] sm:$0xff]  ;;  %v163_v50 = vld [vmem:[%s3573_s30 + $0xd0] sm:$0xff] }
  0x46   : > { %2206 = vst [vmem:[%s3585_s17 + $0xa8] sm:$0xff] %v1182_v45  ;;  %2207 = vst [vmem:[%s3585_s17 + $0xb0] sm:$0xff] %v1183_v46  ;;  %v1185_v51 = vmax.f32 %v161_v48, 0.11  ;;  %v1186_v52 = vmax.f32 %v162_v49, 0.11 }
  0x47   : > { %2208 = vst [vmem:[%s3585_s17 + $0xb8] sm:$0xff] %v1184_v47  ;;  %v1187_v53 = vmax.f32 %v163_v50, 0.11  ;;  %v164_v54 = vld [vmem:[%s3573_s30 + $0xd8] sm:$0xff]  ;;  %v165_v55 = vld [vmem:[%s3573_s30 + $0xe0] sm:$0xff]  ;;  %v166_v56 = vld [vmem:[%s3573_s30 + $0xe8] sm:$0xff] }
  0x48   : > { %2209 = vst [vmem:[%s3585_s17 + $0xc0] sm:$0xff] %v1185_v51  ;;  %2210 = vst [vmem:[%s3585_s17 + $0xc8] sm:$0xff] %v1186_v52  ;;  %v1188_v57 = vmax.f32 %v164_v54, 0.11  ;;  %v1189_v58 = vmax.f32 %v165_v55, 0.11 }
  0x49   : > { %2211 = vst [vmem:[%s3585_s17 + $0xd0] sm:$0xff] %v1187_v53  ;;  %v1190_v59 = vmax.f32 %v166_v56, 0.11  ;;  %v167_v60 = vld [vmem:[%s3573_s30 + $0xf0] sm:$0xff]  ;;  %v168_v61 = vld [vmem:[%s3573_s30 + $0xf8] sm:$0xff]  ;;  %v169_v62 = vld [vmem:[%s3573_s30 + $0x100] sm:$0xff] }
  0x4a   : > { %2212 = vst [vmem:[%s3585_s17 + $0xd8] sm:$0xff] %v1188_v57  ;;  %2213 = vst [vmem:[%s3585_s17 + $0xe0] sm:$0xff] %v1189_v58  ;;  %v1191_v63 = vmax.f32 %v167_v60, 0.11  ;;  %v1192_v0 = vmax.f32 %v168_v61, 0.11 }
  0x4b   : > { %2214 = vst [vmem:[%s3585_s17 + $0xe8] sm:$0xff] %v1190_v59  ;;  %v1193_v1 = vmax.f32 %v169_v62, 0.11  ;;  %v170_v2 = vld [vmem:[%s3573_s30 + $0x108] sm:$0xff]  ;;  %v171_v3 = vld [vmem:[%s3573_s30 + $0x110] sm:$0xff]  ;;  %v172_v4 = vld [vmem:[%s3573_s30 + $0x118] sm:$0xff] }
  0x4c   : > { %2215 = vst [vmem:[%s3585_s17 + $0xf0] sm:$0xff] %v1191_v63  ;;  %2216 = vst [vmem:[%s3585_s17 + $0xf8] sm:$0xff] %v1192_v0  ;;  %v1194_v5 = vmax.f32 %v170_v2, 0.11  ;;  %v1195_v6 = vmax.f32 %v171_v3, 0.11 }
  0x4d   : > { %2217 = vst [vmem:[%s3585_s17 + $0x100] sm:$0xff] %v1193_v1  ;;  %v1196_v7 = vmax.f32 %v172_v4, 0.11  ;;  %v173_v8 = vld [vmem:[%s3573_s30 + $0x120] sm:$0xff]  ;;  %v174_v9 = vld [vmem:[%s3573_s30 + $0x128] sm:$0xff]  ;;  %v175_v10 = vld [vmem:[%s3573_s30 + $0x130] sm:$0xff] }
  0x4e   : > { %2218 = vst [vmem:[%s3585_s17 + $0x108] sm:$0xff] %v1194_v5  ;;  %2219 = vst [vmem:[%s3585_s17 + $0x110] sm:$0xff] %v1195_v6  ;;  %v1197_v11 = vmax.f32 %v173_v8, 0.11  ;;  %v1198_v12 = vmax.f32 %v174_v9, 0.11 }
  0x4f   : > { %2220 = vst [vmem:[%s3585_s17 + $0x118] sm:$0xff] %v1196_v7  ;;  %v1199_v13 = vmax.f32 %v175_v10, 0.11  ;;  %v176_v14 = vld [vmem:[%s3573_s30 + $0x138] sm:$0xff]  ;;  %v177_v15 = vld [vmem:[%s3573_s30 + $0x140] sm:$0xff]  ;;  %v178_v16 = vld [vmem:[%s3573_s30 + $0x148] sm:$0xff] }
  0x50   : > { %2221 = vst [vmem:[%s3585_s17 + $0x120] sm:$0xff] %v1197_v11  ;;  %2222 = vst [vmem:[%s3585_s17 + $0x128] sm:$0xff] %v1198_v12  ;;  %v1200_v17 = vmax.f32 %v176_v14, 0.11  ;;  %v1201_v18 = vmax.f32 %v177_v15, 0.11 }
  0x51   : > { %2223 = vst [vmem:[%s3585_s17 + $0x130] sm:$0xff] %v1199_v13  ;;  %v1202_v19 = vmax.f32 %v178_v16, 0.11  ;;  %v179_v20 = vld [vmem:[%s3573_s30 + $0x150] sm:$0xff]  ;;  %v180_v21 = vld [vmem:[%s3573_s30 + $0x158] sm:$0xff]  ;;  %v181_v22 = vld [vmem:[%s3573_s30 + $0x160] sm:$0xff] }
  0x52   : > { %2224 = vst [vmem:[%s3585_s17 + $0x138] sm:$0xff] %v1200_v17  ;;  %2225 = vst [vmem:[%s3585_s17 + $0x140] sm:$0xff] %v1201_v18  ;;  %v1203_v23 = vmax.f32 %v179_v20, 0.11  ;;  %v1204_v24 = vmax.f32 %v180_v21, 0.11 }
  0x53   : > { %2226 = vst [vmem:[%s3585_s17 + $0x148] sm:$0xff] %v1202_v19  ;;  %v1205_v25 = vmax.f32 %v181_v22, 0.11  ;;  %v182_v26 = vld [vmem:[%s3573_s30 + $0x168] sm:$0xff]  ;;  %v183_v27 = vld [vmem:[%s3573_s30 + $0x170] sm:$0xff]  ;;  %v184_v28 = vld [vmem:[%s3573_s30 + $0x178] sm:$0xff] }
  0x54   : > { %2227 = vst [vmem:[%s3585_s17 + $0x150] sm:$0xff] %v1203_v23  ;;  %2228 = vst [vmem:[%s3585_s17 + $0x158] sm:$0xff] %v1204_v24  ;;  %v1206_v29 = vmax.f32 %v182_v26, 0.11  ;;  %v1207_v30 = vmax.f32 %v183_v27, 0.11 }
  0x55   : > { %2229 = vst [vmem:[%s3585_s17 + $0x160] sm:$0xff] %v1205_v25  ;;  %v1208_v31 = vmax.f32 %v184_v28, 0.11  ;;  %v185_v32 = vld [vmem:[%s3573_s30 + $0x180] sm:$0xff]  ;;  %v186_v33 = vld [vmem:[%s3573_s30 + $0x188] sm:$0xff]  ;;  %v187_v34 = vld [vmem:[%s3573_s30 + $0x190] sm:$0xff] }
  0x56   : > { %2230 = vst [vmem:[%s3585_s17 + $0x168] sm:$0xff] %v1206_v29  ;;  %2231 = vst [vmem:[%s3585_s17 + $0x170] sm:$0xff] %v1207_v30  ;;  %v1209_v35 = vmax.f32 %v185_v32, 0.11  ;;  %v1210_v36 = vmax.f32 %v186_v33, 0.11 }
  0x57   : > { %2232 = vst [vmem:[%s3585_s17 + $0x178] sm:$0xff] %v1208_v31  ;;  %v1211_v37 = vmax.f32 %v187_v34, 0.11  ;;  %v188_v38 = vld [vmem:[%s3573_s30 + $0x198] sm:$0xff]  ;;  %v189_v39 = vld [vmem:[%s3573_s30 + $0x1a0] sm:$0xff]  ;;  %v190_v40 = vld [vmem:[%s3573_s30 + $0x1a8] sm:$0xff] }
  0x58   : > { %2233 = vst [vmem:[%s3585_s17 + $0x180] sm:$0xff] %v1209_v35  ;;  %2234 = vst [vmem:[%s3585_s17 + $0x188] sm:$0xff] %v1210_v36  ;;  %v1212_v41 = vmax.f32 %v188_v38, 0.11  ;;  %v1213_v42 = vmax.f32 %v189_v39, 0.11 }
  0x59   : > { %2235 = vst [vmem:[%s3585_s17 + $0x190] sm:$0xff] %v1211_v37  ;;  %v1214_v43 = vmax.f32 %v190_v40, 0.11  ;;  %v191_v44 = vld [vmem:[%s3573_s30 + $0x1b0] sm:$0xff]  ;;  %v192_v45 = vld [vmem:[%s3573_s30 + $0x1b8] sm:$0xff]  ;;  %v193_v46 = vld [vmem:[%s3573_s30 + $0x1c0] sm:$0xff] }
  0x5a   : > { %2236 = vst [vmem:[%s3585_s17 + $0x198] sm:$0xff] %v1212_v41  ;;  %2237 = vst [vmem:[%s3585_s17 + $0x1a0] sm:$0xff] %v1213_v42  ;;  %v1215_v47 = vmax.f32 %v191_v44, 0.11  ;;  %v1216_v48 = vmax.f32 %v192_v45, 0.11 }
  0x5b   : > { %2238 = vst [vmem:[%s3585_s17 + $0x1a8] sm:$0xff] %v1214_v43  ;;  %v1217_v49 = vmax.f32 %v193_v46, 0.11  ;;  %v194_v50 = vld [vmem:[%s3573_s30 + $0x1c8] sm:$0xff]  ;;  %v195_v51 = vld [vmem:[%s3573_s30 + $0x1d0] sm:$0xff]  ;;  %v196_v52 = vld [vmem:[%s3573_s30 + $0x1d8] sm:$0xff] }
  0x5c   : > { %2239 = vst [vmem:[%s3585_s17 + $0x1b0] sm:$0xff] %v1215_v47  ;;  %2240 = vst [vmem:[%s3585_s17 + $0x1b8] sm:$0xff] %v1216_v48  ;;  %v1218_v53 = vmax.f32 %v194_v50, 0.11  ;;  %v1219_v54 = vmax.f32 %v195_v51, 0.11 }
  0x5d   : > { %2241 = vst [vmem:[%s3585_s17 + $0x1c0] sm:$0xff] %v1217_v49  ;;  %v1220_v55 = vmax.f32 %v196_v52, 0.11  ;;  %v197_v56 = vld [vmem:[%s3573_s30 + $0x1e0] sm:$0xff]  ;;  %v198_v57 = vld [vmem:[%s3573_s30 + $0x1e8] sm:$0xff]  ;;  %v199_v58 = vld [vmem:[%s3573_s30 + $0x1f0] sm:$0xff] }
  0x5e   : > { %2242 = vst [vmem:[%s3585_s17 + $0x1c8] sm:$0xff] %v1218_v53  ;;  %2243 = vst [vmem:[%s3585_s17 + $0x1d0] sm:$0xff] %v1219_v54  ;;  %v1221_v59 = vmax.f32 %v197_v56, 0.11  ;;  %v1222_v60 = vmax.f32 %v198_v57, 0.11 }
  0x5f   : > { %2244 = vst [vmem:[%s3585_s17 + $0x1d8] sm:$0xff] %v1220_v55  ;;  %v1223_v61 = vmax.f32 %v199_v58, 0.11  ;;  %v200_v62 = vld [vmem:[%s3573_s30 + $0x1f8] sm:$0xff]  ;;  %v201_v63 = vld [vmem:[%s3573_s30 + $0x200] sm:$0xff]  ;;  %v202_v0 = vld [vmem:[%s3573_s30 + $0x208] sm:$0xff] }
  0x60   : > { %2245 = vst [vmem:[%s3585_s17 + $0x1e0] sm:$0xff] %v1221_v59  ;;  %2246 = vst [vmem:[%s3585_s17 + $0x1e8] sm:$0xff] %v1222_v60  ;;  %v1224_v1 = vmax.f32 %v200_v62, 0.11  ;;  %v1225_v2 = vmax.f32 %v201_v63, 0.11 }
  0x61   : > { %2247 = vst [vmem:[%s3585_s17 + $0x1f0] sm:$0xff] %v1223_v61  ;;  %v1226_v3 = vmax.f32 %v202_v0, 0.11  ;;  %v203_v4 = vld [vmem:[%s3573_s30 + $0x210] sm:$0xff]  ;;  %v204_v5 = vld [vmem:[%s3573_s30 + $0x218] sm:$0xff]  ;;  %v205_v6 = vld [vmem:[%s3573_s30 + $0x220] sm:$0xff] }
  0x62   : > { %2248 = vst [vmem:[%s3585_s17 + $0x1f8] sm:$0xff] %v1224_v1  ;;  %2249 = vst [vmem:[%s3585_s17 + $0x200] sm:$0xff] %v1225_v2  ;;  %v1227_v7 = vmax.f32 %v203_v4, 0.11  ;;  %v1228_v8 = vmax.f32 %v204_v5, 0.11 }
  0x63   : > { %2250 = vst [vmem:[%s3585_s17 + $0x208] sm:$0xff] %v1226_v3  ;;  %v1229_v9 = vmax.f32 %v205_v6, 0.11  ;;  %v206_v10 = vld [vmem:[%s3573_s30 + $0x228] sm:$0xff]  ;;  %v207_v11 = vld [vmem:[%s3573_s30 + $0x230] sm:$0xff]  ;;  %v208_v12 = vld [vmem:[%s3573_s30 + $0x238] sm:$0xff] }
  0x64   : > { %2251 = vst [vmem:[%s3585_s17 + $0x210] sm:$0xff] %v1227_v7  ;;  %2252 = vst [vmem:[%s3585_s17 + $0x218] sm:$0xff] %v1228_v8  ;;  %v1230_v13 = vmax.f32 %v206_v10, 0.11  ;;  %v1231_v14 = vmax.f32 %v207_v11, 0.11 }
  0x65   : > { %2253 = vst [vmem:[%s3585_s17 + $0x220] sm:$0xff] %v1229_v9  ;;  %v1232_v15 = vmax.f32 %v208_v12, 0.11  ;;  %v209_v16 = vld [vmem:[%s3573_s30 + $0x240] sm:$0xff]  ;;  %v210_v17 = vld [vmem:[%s3573_s30 + $0x248] sm:$0xff]  ;;  %v211_v18 = vld [vmem:[%s3573_s30 + $0x250] sm:$0xff] }
  0x66   : > { %2254 = vst [vmem:[%s3585_s17 + $0x228] sm:$0xff] %v1230_v13  ;;  %2255 = vst [vmem:[%s3585_s17 + $0x230] sm:$0xff] %v1231_v14  ;;  %v1233_v19 = vmax.f32 %v209_v16, 0.11  ;;  %v1234_v20 = vmax.f32 %v210_v17, 0.11 }
  0x67   : > { %2256 = vst [vmem:[%s3585_s17 + $0x238] sm:$0xff] %v1232_v15  ;;  %v1235_v21 = vmax.f32 %v211_v18, 0.11  ;;  %v212_v22 = vld [vmem:[%s3573_s30 + $0x258] sm:$0xff]  ;;  %v213_v23 = vld [vmem:[%s3573_s30 + $0x260] sm:$0xff]  ;;  %v214_v24 = vld [vmem:[%s3573_s30 + $0x268] sm:$0xff] }
  0x68   : > { %2257 = vst [vmem:[%s3585_s17 + $0x240] sm:$0xff] %v1233_v19  ;;  %2258 = vst [vmem:[%s3585_s17 + $0x248] sm:$0xff] %v1234_v20  ;;  %v1236_v25 = vmax.f32 %v212_v22, 0.11  ;;  %v1237_v26 = vmax.f32 %v213_v23, 0.11 }
  0x69   : > { %2259 = vst [vmem:[%s3585_s17 + $0x250] sm:$0xff] %v1235_v21  ;;  %v1238_v27 = vmax.f32 %v214_v24, 0.11  ;;  %v215_v28 = vld [vmem:[%s3573_s30 + $0x270] sm:$0xff]  ;;  %v216_v29 = vld [vmem:[%s3573_s30 + $0x278] sm:$0xff]  ;;  %v217_v30 = vld [vmem:[%s3573_s30 + $0x280] sm:$0xff] }
  0x6a   : > { %2260 = vst [vmem:[%s3585_s17 + $0x258] sm:$0xff] %v1236_v25  ;;  %2261 = vst [vmem:[%s3585_s17 + $0x260] sm:$0xff] %v1237_v26  ;;  %v1239_v31 = vmax.f32 %v215_v28, 0.11  ;;  %v1240_v32 = vmax.f32 %v216_v29, 0.11 }
  0x6b   : > { %2262 = vst [vmem:[%s3585_s17 + $0x268] sm:$0xff] %v1238_v27  ;;  %v1241_v33 = vmax.f32 %v217_v30, 0.11  ;;  %v218_v34 = vld [vmem:[%s3573_s30 + $0x288] sm:$0xff]  ;;  %v219_v35 = vld [vmem:[%s3573_s30 + $0x290] sm:$0xff]  ;;  %v220_v36 = vld [vmem:[%s3573_s30 + $0x298] sm:$0xff] }
  0x6c   : > { %2263 = vst [vmem:[%s3585_s17 + $0x270] sm:$0xff] %v1239_v31  ;;  %2264 = vst [vmem:[%s3585_s17 + $0x278] sm:$0xff] %v1240_v32  ;;  %v1242_v37 = vmax.f32 %v218_v34, 0.11  ;;  %v1243_v38 = vmax.f32 %v219_v35, 0.11 }
  0x6d   : > { %2265 = vst [vmem:[%s3585_s17 + $0x280] sm:$0xff] %v1241_v33  ;;  %v1244_v39 = vmax.f32 %v220_v36, 0.11  ;;  %v221_v40 = vld [vmem:[%s3573_s30 + $0x2a0] sm:$0xff]  ;;  %v222_v41 = vld [vmem:[%s3573_s30 + $0x2a8] sm:$0xff]  ;;  %v223_v42 = vld [vmem:[%s3573_s30 + $0x2b0] sm:$0xff] }
  0x6e   : > { %2266 = vst [vmem:[%s3585_s17 + $0x288] sm:$0xff] %v1242_v37  ;;  %2267 = vst [vmem:[%s3585_s17 + $0x290] sm:$0xff] %v1243_v38  ;;  %v1245_v43 = vmax.f32 %v221_v40, 0.11  ;;  %v1246_v44 = vmax.f32 %v222_v41, 0.11 }
  0x6f   : > { %2268 = vst [vmem:[%s3585_s17 + $0x298] sm:$0xff] %v1244_v39  ;;  %v1247_v45 = vmax.f32 %v223_v42, 0.11  ;;  %v224_v46 = vld [vmem:[%s3573_s30 + $0x2b8] sm:$0xff]  ;;  %v225_v47 = vld [vmem:[%s3573_s30 + $0x2c0] sm:$0xff]  ;;  %v226_v48 = vld [vmem:[%s3573_s30 + $0x2c8] sm:$0xff] }
  0x70   : > { %2269 = vst [vmem:[%s3585_s17 + $0x2a0] sm:$0xff] %v1245_v43  ;;  %2270 = vst [vmem:[%s3585_s17 + $0x2a8] sm:$0xff] %v1246_v44  ;;  %v1248_v49 = vmax.f32 %v224_v46, 0.11  ;;  %v1249_v50 = vmax.f32 %v225_v47, 0.11 }
  0x71   : > { %2271 = vst [vmem:[%s3585_s17 + $0x2b0] sm:$0xff] %v1247_v45  ;;  %v1250_v51 = vmax.f32 %v226_v48, 0.11  ;;  %v227_v52 = vld [vmem:[%s3573_s30 + $0x2d0] sm:$0xff]  ;;  %v228_v53 = vld [vmem:[%s3573_s30 + $0x2d8] sm:$0xff]  ;;  %v229_v54 = vld [vmem:[%s3573_s30 + $0x2e0] sm:$0xff] }
  0x72   : > { %2272 = vst [vmem:[%s3585_s17 + $0x2b8] sm:$0xff] %v1248_v49  ;;  %2273 = vst [vmem:[%s3585_s17 + $0x2c0] sm:$0xff] %v1249_v50  ;;  %v1251_v55 = vmax.f32 %v227_v52, 0.11  ;;  %v1252_v56 = vmax.f32 %v228_v53, 0.11 }
  0x73   : > { %2274 = vst [vmem:[%s3585_s17 + $0x2c8] sm:$0xff] %v1250_v51  ;;  %v1253_v57 = vmax.f32 %v229_v54, 0.11  ;;  %v230_v58 = vld [vmem:[%s3573_s30 + $0x2e8] sm:$0xff]  ;;  %v231_v59 = vld [vmem:[%s3573_s30 + $0x2f0] sm:$0xff]  ;;  %v232_v60 = vld [vmem:[%s3573_s30 + $0x2f8] sm:$0xff] }
  0x74   : > { %2275 = vst [vmem:[%s3585_s17 + $0x2d0] sm:$0xff] %v1251_v55  ;;  %2276 = vst [vmem:[%s3585_s17 + $0x2d8] sm:$0xff] %v1252_v56  ;;  %v1254_v61 = vmax.f32 %v230_v58, 0.11  ;;  %v1255_v62 = vmax.f32 %v231_v59, 0.11 }
  0x75   : > { %2277 = vst [vmem:[%s3585_s17 + $0x2e0] sm:$0xff] %v1253_v57  ;;  %v1256_v63 = vmax.f32 %v232_v60, 0.11  ;;  %v233_v0 = vld [vmem:[%s3573_s30 + $0x300] sm:$0xff]  ;;  %v234_v1 = vld [vmem:[%s3573_s30 + $0x308] sm:$0xff]  ;;  %v235_v2 = vld [vmem:[%s3573_s30 + $0x310] sm:$0xff] }
  0x76   : > { %2278 = vst [vmem:[%s3585_s17 + $0x2e8] sm:$0xff] %v1254_v61  ;;  %2279 = vst [vmem:[%s3585_s17 + $0x2f0] sm:$0xff] %v1255_v62  ;;  %v1257_v3 = vmax.f32 %v233_v0, 0.11  ;;  %v1258_v4 = vmax.f32 %v234_v1, 0.11 }
  0x77   : > { %2280 = vst [vmem:[%s3585_s17 + $0x2f8] sm:$0xff] %v1256_v63  ;;  %v1259_v5 = vmax.f32 %v235_v2, 0.11  ;;  %v236_v6 = vld [vmem:[%s3573_s30 + $0x318] sm:$0xff]  ;;  %v237_v7 = vld [vmem:[%s3573_s30 + $0x320] sm:$0xff]  ;;  %v238_v8 = vld [vmem:[%s3573_s30 + $0x328] sm:$0xff] }
  0x78   : > { %2281 = vst [vmem:[%s3585_s17 + $0x300] sm:$0xff] %v1257_v3  ;;  %2282 = vst [vmem:[%s3585_s17 + $0x308] sm:$0xff] %v1258_v4  ;;  %v1260_v9 = vmax.f32 %v236_v6, 0.11  ;;  %v1261_v10 = vmax.f32 %v237_v7, 0.11 }
  0x79   : > { %2283 = vst [vmem:[%s3585_s17 + $0x310] sm:$0xff] %v1259_v5  ;;  %v1262_v11 = vmax.f32 %v238_v8, 0.11  ;;  %v239_v12 = vld [vmem:[%s3573_s30 + $0x330] sm:$0xff]  ;;  %v240_v13 = vld [vmem:[%s3573_s30 + $0x338] sm:$0xff]  ;;  %v241_v14 = vld [vmem:[%s3573_s30 + $0x340] sm:$0xff] }
  0x7a   : > { %2284 = vst [vmem:[%s3585_s17 + $0x318] sm:$0xff] %v1260_v9  ;;  %2285 = vst [vmem:[%s3585_s17 + $0x320] sm:$0xff] %v1261_v10  ;;  %v1263_v15 = vmax.f32 %v239_v12, 0.11  ;;  %v1264_v16 = vmax.f32 %v240_v13, 0.11 }
  0x7b   : > { %2286 = vst [vmem:[%s3585_s17 + $0x328] sm:$0xff] %v1262_v11  ;;  %v1265_v17 = vmax.f32 %v241_v14, 0.11  ;;  %v242_v18 = vld [vmem:[%s3573_s30 + $0x348] sm:$0xff]  ;;  %v243_v19 = vld [vmem:[%s3573_s30 + $0x350] sm:$0xff]  ;;  %v244_v20 = vld [vmem:[%s3573_s30 + $0x358] sm:$0xff] }
  0x7c   : > { %2287 = vst [vmem:[%s3585_s17 + $0x330] sm:$0xff] %v1263_v15  ;;  %2288 = vst [vmem:[%s3585_s17 + $0x338] sm:$0xff] %v1264_v16  ;;  %v1266_v21 = vmax.f32 %v242_v18, 0.11  ;;  %v1267_v22 = vmax.f32 %v243_v19, 0.11 }
  0x7d   : > { %2289 = vst [vmem:[%s3585_s17 + $0x340] sm:$0xff] %v1265_v17  ;;  %v1268_v23 = vmax.f32 %v244_v20, 0.11  ;;  %v245_v24 = vld [vmem:[%s3573_s30 + $0x360] sm:$0xff]  ;;  %v246_v25 = vld [vmem:[%s3573_s30 + $0x368] sm:$0xff]  ;;  %v247_v26 = vld [vmem:[%s3573_s30 + $0x370] sm:$0xff] }
  0x7e   : > { %2290 = vst [vmem:[%s3585_s17 + $0x348] sm:$0xff] %v1266_v21  ;;  %2291 = vst [vmem:[%s3585_s17 + $0x350] sm:$0xff] %v1267_v22  ;;  %v1269_v27 = vmax.f32 %v245_v24, 0.11  ;;  %v1270_v28 = vmax.f32 %v246_v25, 0.11 }
  0x7f   : > { %2292 = vst [vmem:[%s3585_s17 + $0x358] sm:$0xff] %v1268_v23  ;;  %v1271_v29 = vmax.f32 %v247_v26, 0.11  ;;  %v248_v30 = vld [vmem:[%s3573_s30 + $0x378] sm:$0xff]  ;;  %v249_v31 = vld [vmem:[%s3573_s30 + $0x380] sm:$0xff]  ;;  %v250_v32 = vld [vmem:[%s3573_s30 + $0x388] sm:$0xff] }
  0x80   : > { %2293 = vst [vmem:[%s3585_s17 + $0x360] sm:$0xff] %v1269_v27  ;;  %2294 = vst [vmem:[%s3585_s17 + $0x368] sm:$0xff] %v1270_v28  ;;  %v1272_v33 = vmax.f32 %v248_v30, 0.11  ;;  %v1273_v34 = vmax.f32 %v249_v31, 0.11 }
  0x81   : > { %2295 = vst [vmem:[%s3585_s17 + $0x370] sm:$0xff] %v1271_v29  ;;  %v1274_v35 = vmax.f32 %v250_v32, 0.11  ;;  %v251_v36 = vld [vmem:[%s3573_s30 + $0x390] sm:$0xff]  ;;  %v252_v37 = vld [vmem:[%s3573_s30 + $0x398] sm:$0xff]  ;;  %v253_v38 = vld [vmem:[%s3573_s30 + $0x3a0] sm:$0xff] }
  0x82   : > { %2296 = vst [vmem:[%s3585_s17 + $0x378] sm:$0xff] %v1272_v33  ;;  %2297 = vst [vmem:[%s3585_s17 + $0x380] sm:$0xff] %v1273_v34  ;;  %v1275_v39 = vmax.f32 %v251_v36, 0.11  ;;  %v1276_v40 = vmax.f32 %v252_v37, 0.11 }
  0x83   : > { %2298 = vst [vmem:[%s3585_s17 + $0x388] sm:$0xff] %v1274_v35  ;;  %v1277_v41 = vmax.f32 %v253_v38, 0.11  ;;  %v254_v42 = vld [vmem:[%s3573_s30 + $0x3a8] sm:$0xff]  ;;  %v255_v43 = vld [vmem:[%s3573_s30 + $0x3b0] sm:$0xff]  ;;  %v256_v44 = vld [vmem:[%s3573_s30 + $0x3b8] sm:$0xff] }
  0x84   : > { %2299 = vst [vmem:[%s3585_s17 + $0x390] sm:$0xff] %v1275_v39  ;;  %2300 = vst [vmem:[%s3585_s17 + $0x398] sm:$0xff] %v1276_v40  ;;  %v1278_v45 = vmax.f32 %v254_v42, 0.11  ;;  %v1279_v46 = vmax.f32 %v255_v43, 0.11 }
  0x85   : > { %2301 = vst [vmem:[%s3585_s17 + $0x3a0] sm:$0xff] %v1277_v41  ;;  %v1280_v47 = vmax.f32 %v256_v44, 0.11  ;;  %v257_v48 = vld [vmem:[%s3573_s30 + $0x3c0] sm:$0xff]  ;;  %v258_v49 = vld [vmem:[%s3573_s30 + $0x3c8] sm:$0xff]  ;;  %v259_v50 = vld [vmem:[%s3573_s30 + $0x3d0] sm:$0xff] }
  0x86   : > { %2302 = vst [vmem:[%s3585_s17 + $0x3a8] sm:$0xff] %v1278_v45  ;;  %2303 = vst [vmem:[%s3585_s17 + $0x3b0] sm:$0xff] %v1279_v46  ;;  %v1281_v51 = vmax.f32 %v257_v48, 0.11  ;;  %v1282_v52 = vmax.f32 %v258_v49, 0.11 }
  0x87   : > { %2304 = vst [vmem:[%s3585_s17 + $0x3b8] sm:$0xff] %v1280_v47  ;;  %v1283_v53 = vmax.f32 %v259_v50, 0.11  ;;  %v260_v54 = vld [vmem:[%s3573_s30 + $0x3d8] sm:$0xff]  ;;  %v261_v55 = vld [vmem:[%s3573_s30 + $0x3e0] sm:$0xff]  ;;  %v262_v56 = vld [vmem:[%s3573_s30 + $0x3e8] sm:$0xff] }
  0x88   : > { %2305 = vst [vmem:[%s3585_s17 + $0x3c0] sm:$0xff] %v1281_v51  ;;  %2306 = vst [vmem:[%s3585_s17 + $0x3c8] sm:$0xff] %v1282_v52  ;;  %v1284_v57 = vmax.f32 %v260_v54, 0.11  ;;  %v1285_v58 = vmax.f32 %v261_v55, 0.11 }
  0x89   : > { %2307 = vst [vmem:[%s3585_s17 + $0x3d0] sm:$0xff] %v1283_v53  ;;  %v1286_v59 = vmax.f32 %v262_v56, 0.11  ;;  %v263_v60 = vld [vmem:[%s3573_s30 + $0x3f0] sm:$0xff]  ;;  %v264_v61 = vld [vmem:[%s3573_s30 + $0x3f8] sm:$0xff]  ;;  %v265_v62 = vld [vmem:[%s3573_s30 + $0x400] sm:$0xff] }
  0x8a   : > { %2308 = vst [vmem:[%s3585_s17 + $0x3d8] sm:$0xff] %v1284_v57  ;;  %2309 = vst [vmem:[%s3585_s17 + $0x3e0] sm:$0xff] %v1285_v58  ;;  %v1287_v63 = vmax.f32 %v263_v60, 0.11  ;;  %v1288_v0 = vmax.f32 %v264_v61, 0.11 }
  0x8b   : > { %2310 = vst [vmem:[%s3585_s17 + $0x3e8] sm:$0xff] %v1286_v59  ;;  %v1289_v1 = vmax.f32 %v265_v62, 0.11  ;;  %v266_v2 = vld [vmem:[%s3573_s30 + $0x408] sm:$0xff]  ;;  %v267_v3 = vld [vmem:[%s3573_s30 + $0x410] sm:$0xff]  ;;  %v268_v4 = vld [vmem:[%s3573_s30 + $0x418] sm:$0xff] }
  0x8c   : > { %2311 = vst [vmem:[%s3585_s17 + $0x3f0] sm:$0xff] %v1287_v63  ;;  %2312 = vst [vmem:[%s3585_s17 + $0x3f8] sm:$0xff] %v1288_v0  ;;  %v1290_v5 = vmax.f32 %v266_v2, 0.11  ;;  %v1291_v6 = vmax.f32 %v267_v3, 0.11 }
  0x8d   : > { %2313 = vst [vmem:[%s3585_s17 + $0x400] sm:$0xff] %v1289_v1  ;;  %v1292_v7 = vmax.f32 %v268_v4, 0.11  ;;  %v269_v8 = vld [vmem:[%s3573_s30 + $0x420] sm:$0xff]  ;;  %v270_v9 = vld [vmem:[%s3573_s30 + $0x428] sm:$0xff]  ;;  %v271_v10 = vld [vmem:[%s3573_s30 + $0x430] sm:$0xff] }
  0x8e   : > { %2314 = vst [vmem:[%s3585_s17 + $0x408] sm:$0xff] %v1290_v5  ;;  %2315 = vst [vmem:[%s3585_s17 + $0x410] sm:$0xff] %v1291_v6  ;;  %v1293_v11 = vmax.f32 %v269_v8, 0.11  ;;  %v1294_v12 = vmax.f32 %v270_v9, 0.11 }
  0x8f   : > { %2316 = vst [vmem:[%s3585_s17 + $0x418] sm:$0xff] %v1292_v7  ;;  %v1295_v13 = vmax.f32 %v271_v10, 0.11  ;;  %v272_v14 = vld [vmem:[%s3573_s30 + $0x438] sm:$0xff]  ;;  %v273_v15 = vld [vmem:[%s3573_s30 + $0x440] sm:$0xff]  ;;  %v274_v16 = vld [vmem:[%s3573_s30 + $0x448] sm:$0xff] }
  0x90   : > { %2317 = vst [vmem:[%s3585_s17 + $0x420] sm:$0xff] %v1293_v11  ;;  %2318 = vst [vmem:[%s3585_s17 + $0x428] sm:$0xff] %v1294_v12  ;;  %v1296_v17 = vmax.f32 %v272_v14, 0.11  ;;  %v1297_v18 = vmax.f32 %v273_v15, 0.11 }
  0x91   : > { %2319 = vst [vmem:[%s3585_s17 + $0x430] sm:$0xff] %v1295_v13  ;;  %v1298_v19 = vmax.f32 %v274_v16, 0.11  ;;  %v275_v20 = vld [vmem:[%s3573_s30 + $0x450] sm:$0xff]  ;;  %v276_v21 = vld [vmem:[%s3573_s30 + $0x458] sm:$0xff]  ;;  %v277_v22 = vld [vmem:[%s3573_s30 + $0x460] sm:$0xff] }
  0x92   : > { %2320 = vst [vmem:[%s3585_s17 + $0x438] sm:$0xff] %v1296_v17  ;;  %2321 = vst [vmem:[%s3585_s17 + $0x440] sm:$0xff] %v1297_v18  ;;  %v1299_v23 = vmax.f32 %v275_v20, 0.11  ;;  %v1300_v24 = vmax.f32 %v276_v21, 0.11 }
  0x93   : > { %2322 = vst [vmem:[%s3585_s17 + $0x448] sm:$0xff] %v1298_v19  ;;  %v1301_v25 = vmax.f32 %v277_v22, 0.11  ;;  %v278_v26 = vld [vmem:[%s3573_s30 + $0x468] sm:$0xff]  ;;  %v279_v27 = vld [vmem:[%s3573_s30 + $0x470] sm:$0xff]  ;;  %v280_v28 = vld [vmem:[%s3573_s30 + $0x478] sm:$0xff] }
  0x94   : > { %2323 = vst [vmem:[%s3585_s17 + $0x450] sm:$0xff] %v1299_v23  ;;  %2324 = vst [vmem:[%s3585_s17 + $0x458] sm:$0xff] %v1300_v24  ;;  %v1302_v29 = vmax.f32 %v278_v26, 0.11  ;;  %v1303_v30 = vmax.f32 %v279_v27, 0.11 }
  0x95   : > { %2325 = vst [vmem:[%s3585_s17 + $0x460] sm:$0xff] %v1301_v25  ;;  %v1304_v31 = vmax.f32 %v280_v28, 0.11  ;;  %v281_v32 = vld [vmem:[%s3573_s30 + $0x480] sm:$0xff]  ;;  %v282_v33 = vld [vmem:[%s3573_s30 + $0x488] sm:$0xff]  ;;  %v283_v34 = vld [vmem:[%s3573_s30 + $0x490] sm:$0xff] }
  0x96   : > { %2326 = vst [vmem:[%s3585_s17 + $0x468] sm:$0xff] %v1302_v29  ;;  %2327 = vst [vmem:[%s3585_s17 + $0x470] sm:$0xff] %v1303_v30  ;;  %v1305_v35 = vmax.f32 %v281_v32, 0.11  ;;  %v1306_v36 = vmax.f32 %v282_v33, 0.11 }
  0x97   : > { %2328 = vst [vmem:[%s3585_s17 + $0x478] sm:$0xff] %v1304_v31  ;;  %v1307_v37 = vmax.f32 %v283_v34, 0.11  ;;  %v284_v38 = vld [vmem:[%s3573_s30 + $0x498] sm:$0xff]  ;;  %v285_v39 = vld [vmem:[%s3573_s30 + $0x4a0] sm:$0xff]  ;;  %v286_v40 = vld [vmem:[%s3573_s30 + $0x4a8] sm:$0xff] }
  0x98   : > { %2329 = vst [vmem:[%s3585_s17 + $0x480] sm:$0xff] %v1305_v35  ;;  %2330 = vst [vmem:[%s3585_s17 + $0x488] sm:$0xff] %v1306_v36  ;;  %v1308_v41 = vmax.f32 %v284_v38, 0.11  ;;  %v1309_v42 = vmax.f32 %v285_v39, 0.11 }
  0x99   : > { %2331 = vst [vmem:[%s3585_s17 + $0x490] sm:$0xff] %v1307_v37  ;;  %v1310_v43 = vmax.f32 %v286_v40, 0.11  ;;  %v287_v44 = vld [vmem:[%s3573_s30 + $0x4b0] sm:$0xff]  ;;  %v288_v45 = vld [vmem:[%s3573_s30 + $0x4b8] sm:$0xff]  ;;  %v289_v46 = vld [vmem:[%s3573_s30 + $0x4c0] sm:$0xff] }
  0x9a   : > { %2332 = vst [vmem:[%s3585_s17 + $0x498] sm:$0xff] %v1308_v41  ;;  %2333 = vst [vmem:[%s3585_s17 + $0x4a0] sm:$0xff] %v1309_v42  ;;  %v1311_v47 = vmax.f32 %v287_v44, 0.11  ;;  %v1312_v48 = vmax.f32 %v288_v45, 0.11 }
  0x9b   : > { %2334 = vst [vmem:[%s3585_s17 + $0x4a8] sm:$0xff] %v1310_v43  ;;  %v1313_v49 = vmax.f32 %v289_v46, 0.11  ;;  %v290_v50 = vld [vmem:[%s3573_s30 + $0x4c8] sm:$0xff]  ;;  %v291_v51 = vld [vmem:[%s3573_s30 + $0x4d0] sm:$0xff]  ;;  %v292_v52 = vld [vmem:[%s3573_s30 + $0x4d8] sm:$0xff] }
  0x9c   : > { %2335 = vst [vmem:[%s3585_s17 + $0x4b0] sm:$0xff] %v1311_v47  ;;  %2336 = vst [vmem:[%s3585_s17 + $0x4b8] sm:$0xff] %v1312_v48  ;;  %v1314_v53 = vmax.f32 %v290_v50, 0.11  ;;  %v1315_v54 = vmax.f32 %v291_v51, 0.11 }
  0x9d   : > { %2337 = vst [vmem:[%s3585_s17 + $0x4c0] sm:$0xff] %v1313_v49  ;;  %v1316_v55 = vmax.f32 %v292_v52, 0.11  ;;  %v293_v56 = vld [vmem:[%s3573_s30 + $0x4e0] sm:$0xff]  ;;  %v294_v57 = vld [vmem:[%s3573_s30 + $0x4e8] sm:$0xff]  ;;  %v295_v58 = vld [vmem:[%s3573_s30 + $0x4f0] sm:$0xff] }
  0x9e   : > { %2338 = vst [vmem:[%s3585_s17 + $0x4c8] sm:$0xff] %v1314_v53  ;;  %2339 = vst [vmem:[%s3585_s17 + $0x4d0] sm:$0xff] %v1315_v54  ;;  %v1317_v59 = vmax.f32 %v293_v56, 0.11  ;;  %v1318_v60 = vmax.f32 %v294_v57, 0.11 }
  0x9f   : > { %2340 = vst [vmem:[%s3585_s17 + $0x4d8] sm:$0xff] %v1316_v55  ;;  %v1319_v61 = vmax.f32 %v295_v58, 0.11  ;;  %v296_v62 = vld [vmem:[%s3573_s30 + $0x4f8] sm:$0xff]  ;;  %v297_v63 = vld [vmem:[%s3573_s30 + $0x500] sm:$0xff]  ;;  %v298_v0 = vld [vmem:[%s3573_s30 + $0x508] sm:$0xff] }
  0xa0   : > { %2341 = vst [vmem:[%s3585_s17 + $0x4e0] sm:$0xff] %v1317_v59  ;;  %2342 = vst [vmem:[%s3585_s17 + $0x4e8] sm:$0xff] %v1318_v60  ;;  %v1320_v1 = vmax.f32 %v296_v62, 0.11  ;;  %v1321_v2 = vmax.f32 %v297_v63, 0.11 }
  0xa1   : > { %2343 = vst [vmem:[%s3585_s17 + $0x4f0] sm:$0xff] %v1319_v61  ;;  %v1322_v3 = vmax.f32 %v298_v0, 0.11  ;;  %v299_v4 = vld [vmem:[%s3573_s30 + $0x510] sm:$0xff]  ;;  %v300_v5 = vld [vmem:[%s3573_s30 + $0x518] sm:$0xff]  ;;  %v301_v6 = vld [vmem:[%s3573_s30 + $0x520] sm:$0xff] }
  0xa2   : > { %2344 = vst [vmem:[%s3585_s17 + $0x4f8] sm:$0xff] %v1320_v1  ;;  %2345 = vst [vmem:[%s3585_s17 + $0x500] sm:$0xff] %v1321_v2  ;;  %v1323_v7 = vmax.f32 %v299_v4, 0.11  ;;  %v1324_v8 = vmax.f32 %v300_v5, 0.11 }
  0xa3   : > { %2346 = vst [vmem:[%s3585_s17 + $0x508] sm:$0xff] %v1322_v3  ;;  %v1325_v9 = vmax.f32 %v301_v6, 0.11  ;;  %v302_v10 = vld [vmem:[%s3573_s30 + $0x528] sm:$0xff]  ;;  %v303_v11 = vld [vmem:[%s3573_s30 + $0x530] sm:$0xff]  ;;  %v304_v12 = vld [vmem:[%s3573_s30 + $0x538] sm:$0xff] }
  0xa4   : > { %2347 = vst [vmem:[%s3585_s17 + $0x510] sm:$0xff] %v1323_v7  ;;  %2348 = vst [vmem:[%s3585_s17 + $0x518] sm:$0xff] %v1324_v8  ;;  %v1326_v13 = vmax.f32 %v302_v10, 0.11  ;;  %v1327_v14 = vmax.f32 %v303_v11, 0.11 }
  0xa5   : > { %2349 = vst [vmem:[%s3585_s17 + $0x520] sm:$0xff] %v1325_v9  ;;  %v1328_v15 = vmax.f32 %v304_v12, 0.11  ;;  %v305_v16 = vld [vmem:[%s3573_s30 + $0x540] sm:$0xff]  ;;  %v306_v17 = vld [vmem:[%s3573_s30 + $0x548] sm:$0xff]  ;;  %v307_v18 = vld [vmem:[%s3573_s30 + $0x550] sm:$0xff] }
  0xa6   : > { %2350 = vst [vmem:[%s3585_s17 + $0x528] sm:$0xff] %v1326_v13  ;;  %2351 = vst [vmem:[%s3585_s17 + $0x530] sm:$0xff] %v1327_v14  ;;  %v1329_v19 = vmax.f32 %v305_v16, 0.11  ;;  %v1330_v20 = vmax.f32 %v306_v17, 0.11 }
  0xa7   : > { %2352 = vst [vmem:[%s3585_s17 + $0x538] sm:$0xff] %v1328_v15  ;;  %v1331_v21 = vmax.f32 %v307_v18, 0.11  ;;  %v308_v22 = vld [vmem:[%s3573_s30 + $0x558] sm:$0xff]  ;;  %v309_v23 = vld [vmem:[%s3573_s30 + $0x560] sm:$0xff]  ;;  %v310_v24 = vld [vmem:[%s3573_s30 + $0x568] sm:$0xff] }
  0xa8   : > { %2353 = vst [vmem:[%s3585_s17 + $0x540] sm:$0xff] %v1329_v19  ;;  %2354 = vst [vmem:[%s3585_s17 + $0x548] sm:$0xff] %v1330_v20  ;;  %v1332_v25 = vmax.f32 %v308_v22, 0.11  ;;  %v1333_v26 = vmax.f32 %v309_v23, 0.11 }
  0xa9   : > { %2355 = vst [vmem:[%s3585_s17 + $0x550] sm:$0xff] %v1331_v21  ;;  %v1334_v27 = vmax.f32 %v310_v24, 0.11  ;;  %v311_v28 = vld [vmem:[%s3573_s30 + $0x570] sm:$0xff]  ;;  %v312_v29 = vld [vmem:[%s3573_s30 + $0x578] sm:$0xff]  ;;  %v313_v30 = vld [vmem:[%s3573_s30 + $0x580] sm:$0xff] }
  0xaa   : > { %2356 = vst [vmem:[%s3585_s17 + $0x558] sm:$0xff] %v1332_v25  ;;  %2357 = vst [vmem:[%s3585_s17 + $0x560] sm:$0xff] %v1333_v26  ;;  %v1335_v31 = vmax.f32 %v311_v28, 0.11  ;;  %v1336_v32 = vmax.f32 %v312_v29, 0.11 }
  0xab   : > { %2358 = vst [vmem:[%s3585_s17 + $0x568] sm:$0xff] %v1334_v27  ;;  %v1337_v33 = vmax.f32 %v313_v30, 0.11  ;;  %v314_v34 = vld [vmem:[%s3573_s30 + $0x588] sm:$0xff]  ;;  %v315_v35 = vld [vmem:[%s3573_s30 + $0x590] sm:$0xff]  ;;  %v316_v36 = vld [vmem:[%s3573_s30 + $0x598] sm:$0xff] }
  0xac   : > { %2359 = vst [vmem:[%s3585_s17 + $0x570] sm:$0xff] %v1335_v31  ;;  %2360 = vst [vmem:[%s3585_s17 + $0x578] sm:$0xff] %v1336_v32  ;;  %v1338_v37 = vmax.f32 %v314_v34, 0.11  ;;  %v1339_v38 = vmax.f32 %v315_v35, 0.11 }
  0xad   : > { %2361 = vst [vmem:[%s3585_s17 + $0x580] sm:$0xff] %v1337_v33  ;;  %v1340_v39 = vmax.f32 %v316_v36, 0.11  ;;  %v317_v40 = vld [vmem:[%s3573_s30 + $0x5a0] sm:$0xff]  ;;  %v318_v41 = vld [vmem:[%s3573_s30 + $0x5a8] sm:$0xff]  ;;  %v319_v42 = vld [vmem:[%s3573_s30 + $0x5b0] sm:$0xff] }
  0xae   : > { %2362 = vst [vmem:[%s3585_s17 + $0x588] sm:$0xff] %v1338_v37  ;;  %2363 = vst [vmem:[%s3585_s17 + $0x590] sm:$0xff] %v1339_v38  ;;  %v1341_v43 = vmax.f32 %v317_v40, 0.11  ;;  %v1342_v44 = vmax.f32 %v318_v41, 0.11 }
  0xaf   : > { %2364 = vst [vmem:[%s3585_s17 + $0x598] sm:$0xff] %v1340_v39  ;;  %v1343_v45 = vmax.f32 %v319_v42, 0.11  ;;  %v320_v46 = vld [vmem:[%s3573_s30 + $0x5b8] sm:$0xff]  ;;  %v321_v47 = vld [vmem:[%s3573_s30 + $0x5c0] sm:$0xff]  ;;  %v322_v48 = vld [vmem:[%s3573_s30 + $0x5c8] sm:$0xff] }
  0xb0   : > { %2365 = vst [vmem:[%s3585_s17 + $0x5a0] sm:$0xff] %v1341_v43  ;;  %2366 = vst [vmem:[%s3585_s17 + $0x5a8] sm:$0xff] %v1342_v44  ;;  %v1344_v49 = vmax.f32 %v320_v46, 0.11  ;;  %v1345_v50 = vmax.f32 %v321_v47, 0.11 }
  0xb1   : > { %2367 = vst [vmem:[%s3585_s17 + $0x5b0] sm:$0xff] %v1343_v45  ;;  %v1346_v51 = vmax.f32 %v322_v48, 0.11  ;;  %v323_v52 = vld [vmem:[%s3573_s30 + $0x5d0] sm:$0xff]  ;;  %v324_v53 = vld [vmem:[%s3573_s30 + $0x5d8] sm:$0xff]  ;;  %v325_v54 = vld [vmem:[%s3573_s30 + $0x5e0] sm:$0xff] }
  0xb2   : > { %2368 = vst [vmem:[%s3585_s17 + $0x5b8] sm:$0xff] %v1344_v49  ;;  %2369 = vst [vmem:[%s3585_s17 + $0x5c0] sm:$0xff] %v1345_v50  ;;  %v1347_v55 = vmax.f32 %v323_v52, 0.11  ;;  %v1348_v56 = vmax.f32 %v324_v53, 0.11 }
  0xb3   : > { %2370 = vst [vmem:[%s3585_s17 + $0x5c8] sm:$0xff] %v1346_v51  ;;  %v1349_v57 = vmax.f32 %v325_v54, 0.11  ;;  %v326_v58 = vld [vmem:[%s3573_s30 + $0x5e8] sm:$0xff]  ;;  %v327_v59 = vld [vmem:[%s3573_s30 + $0x5f0] sm:$0xff]  ;;  %v328_v60 = vld [vmem:[%s3573_s30 + $0x5f8] sm:$0xff] }
  0xb4   : > { %2371 = vst [vmem:[%s3585_s17 + $0x5d0] sm:$0xff] %v1347_v55  ;;  %2372 = vst [vmem:[%s3585_s17 + $0x5d8] sm:$0xff] %v1348_v56  ;;  %v1350_v61 = vmax.f32 %v326_v58, 0.11  ;;  %v1351_v62 = vmax.f32 %v327_v59, 0.11 }
  0xb5   : > { %2373 = vst [vmem:[%s3585_s17 + $0x5e0] sm:$0xff] %v1349_v57  ;;  %v1352_v63 = vmax.f32 %v328_v60, 0.11  ;;  %v329_v0 = vld [vmem:[%s3573_s30 + $0x600] sm:$0xff]  ;;  %v330_v1 = vld [vmem:[%s3573_s30 + $0x608] sm:$0xff]  ;;  %v331_v2 = vld [vmem:[%s3573_s30 + $0x610] sm:$0xff] }
  0xb6   : > { %2374 = vst [vmem:[%s3585_s17 + $0x5e8] sm:$0xff] %v1350_v61  ;;  %2375 = vst [vmem:[%s3585_s17 + $0x5f0] sm:$0xff] %v1351_v62  ;;  %v1353_v3 = vmax.f32 %v329_v0, 0.11  ;;  %v1354_v4 = vmax.f32 %v330_v1, 0.11 }
  0xb7   : > { %2376 = vst [vmem:[%s3585_s17 + $0x5f8] sm:$0xff] %v1352_v63  ;;  %v1355_v5 = vmax.f32 %v331_v2, 0.11  ;;  %v332_v6 = vld [vmem:[%s3573_s30 + $0x618] sm:$0xff]  ;;  %v333_v7 = vld [vmem:[%s3573_s30 + $0x620] sm:$0xff]  ;;  %v334_v8 = vld [vmem:[%s3573_s30 + $0x628] sm:$0xff] }
  0xb8   : > { %2377 = vst [vmem:[%s3585_s17 + $0x600] sm:$0xff] %v1353_v3  ;;  %2378 = vst [vmem:[%s3585_s17 + $0x608] sm:$0xff] %v1354_v4  ;;  %v1356_v9 = vmax.f32 %v332_v6, 0.11  ;;  %v1357_v10 = vmax.f32 %v333_v7, 0.11 }
  0xb9   : > { %2379 = vst [vmem:[%s3585_s17 + $0x610] sm:$0xff] %v1355_v5  ;;  %v1358_v11 = vmax.f32 %v334_v8, 0.11  ;;  %v335_v12 = vld [vmem:[%s3573_s30 + $0x630] sm:$0xff]  ;;  %v336_v13 = vld [vmem:[%s3573_s30 + $0x638] sm:$0xff]  ;;  %v337_v14 = vld [vmem:[%s3573_s30 + $0x640] sm:$0xff] }
  0xba   : > { %2380 = vst [vmem:[%s3585_s17 + $0x618] sm:$0xff] %v1356_v9  ;;  %2381 = vst [vmem:[%s3585_s17 + $0x620] sm:$0xff] %v1357_v10  ;;  %v1359_v15 = vmax.f32 %v335_v12, 0.11  ;;  %v1360_v16 = vmax.f32 %v336_v13, 0.11 }
  0xbb   : > { %2382 = vst [vmem:[%s3585_s17 + $0x628] sm:$0xff] %v1358_v11  ;;  %v1361_v17 = vmax.f32 %v337_v14, 0.11  ;;  %v338_v18 = vld [vmem:[%s3573_s30 + $0x648] sm:$0xff]  ;;  %v339_v19 = vld [vmem:[%s3573_s30 + $0x650] sm:$0xff]  ;;  %v340_v20 = vld [vmem:[%s3573_s30 + $0x658] sm:$0xff] }
  0xbc   : > { %2383 = vst [vmem:[%s3585_s17 + $0x630] sm:$0xff] %v1359_v15  ;;  %2384 = vst [vmem:[%s3585_s17 + $0x638] sm:$0xff] %v1360_v16  ;;  %v1362_v21 = vmax.f32 %v338_v18, 0.11  ;;  %v1363_v22 = vmax.f32 %v339_v19, 0.11 }
  0xbd   : > { %2385 = vst [vmem:[%s3585_s17 + $0x640] sm:$0xff] %v1361_v17  ;;  %v1364_v23 = vmax.f32 %v340_v20, 0.11  ;;  %v341_v24 = vld [vmem:[%s3573_s30 + $0x660] sm:$0xff]  ;;  %v342_v25 = vld [vmem:[%s3573_s30 + $0x668] sm:$0xff]  ;;  %v343_v26 = vld [vmem:[%s3573_s30 + $0x670] sm:$0xff] }
  0xbe   : > { %2386 = vst [vmem:[%s3585_s17 + $0x648] sm:$0xff] %v1362_v21  ;;  %2387 = vst [vmem:[%s3585_s17 + $0x650] sm:$0xff] %v1363_v22  ;;  %v1365_v27 = vmax.f32 %v341_v24, 0.11  ;;  %v1366_v28 = vmax.f32 %v342_v25, 0.11 }
  0xbf   : > { %2388 = vst [vmem:[%s3585_s17 + $0x658] sm:$0xff] %v1364_v23  ;;  %v1367_v29 = vmax.f32 %v343_v26, 0.11  ;;  %v344_v30 = vld [vmem:[%s3573_s30 + $0x678] sm:$0xff]  ;;  %v345_v31 = vld [vmem:[%s3573_s30 + $0x680] sm:$0xff]  ;;  %v346_v32 = vld [vmem:[%s3573_s30 + $0x688] sm:$0xff] }
  0xc0   : > { %2389 = vst [vmem:[%s3585_s17 + $0x660] sm:$0xff] %v1365_v27  ;;  %2390 = vst [vmem:[%s3585_s17 + $0x668] sm:$0xff] %v1366_v28  ;;  %v1368_v33 = vmax.f32 %v344_v30, 0.11  ;;  %v1369_v34 = vmax.f32 %v345_v31, 0.11 }
  0xc1   : > { %2391 = vst [vmem:[%s3585_s17 + $0x670] sm:$0xff] %v1367_v29  ;;  %v1370_v35 = vmax.f32 %v346_v32, 0.11  ;;  %v347_v36 = vld [vmem:[%s3573_s30 + $0x690] sm:$0xff]  ;;  %v348_v37 = vld [vmem:[%s3573_s30 + $0x698] sm:$0xff]  ;;  %v349_v38 = vld [vmem:[%s3573_s30 + $0x6a0] sm:$0xff] }
  0xc2   : > { %2392 = vst [vmem:[%s3585_s17 + $0x678] sm:$0xff] %v1368_v33  ;;  %2393 = vst [vmem:[%s3585_s17 + $0x680] sm:$0xff] %v1369_v34  ;;  %v1371_v39 = vmax.f32 %v347_v36, 0.11  ;;  %v1372_v40 = vmax.f32 %v348_v37, 0.11 }
  0xc3   : > { %2394 = vst [vmem:[%s3585_s17 + $0x688] sm:$0xff] %v1370_v35  ;;  %v1373_v41 = vmax.f32 %v349_v38, 0.11  ;;  %v350_v42 = vld [vmem:[%s3573_s30 + $0x6a8] sm:$0xff]  ;;  %v351_v43 = vld [vmem:[%s3573_s30 + $0x6b0] sm:$0xff]  ;;  %v352_v44 = vld [vmem:[%s3573_s30 + $0x6b8] sm:$0xff] }
  0xc4   : > { %2395 = vst [vmem:[%s3585_s17 + $0x690] sm:$0xff] %v1371_v39  ;;  %2396 = vst [vmem:[%s3585_s17 + $0x698] sm:$0xff] %v1372_v40  ;;  %v1374_v45 = vmax.f32 %v350_v42, 0.11  ;;  %v1375_v46 = vmax.f32 %v351_v43, 0.11 }
  0xc5   : > { %2397 = vst [vmem:[%s3585_s17 + $0x6a0] sm:$0xff] %v1373_v41  ;;  %v1376_v47 = vmax.f32 %v352_v44, 0.11  ;;  %v353_v48 = vld [vmem:[%s3573_s30 + $0x6c0] sm:$0xff]  ;;  %v354_v49 = vld [vmem:[%s3573_s30 + $0x6c8] sm:$0xff]  ;;  %v355_v50 = vld [vmem:[%s3573_s30 + $0x6d0] sm:$0xff] }
  0xc6   : > { %2398 = vst [vmem:[%s3585_s17 + $0x6a8] sm:$0xff] %v1374_v45  ;;  %2399 = vst [vmem:[%s3585_s17 + $0x6b0] sm:$0xff] %v1375_v46  ;;  %v1377_v51 = vmax.f32 %v353_v48, 0.11  ;;  %v1378_v52 = vmax.f32 %v354_v49, 0.11 }
  0xc7   : > { %2400 = vst [vmem:[%s3585_s17 + $0x6b8] sm:$0xff] %v1376_v47  ;;  %v1379_v53 = vmax.f32 %v355_v50, 0.11  ;;  %v356_v54 = vld [vmem:[%s3573_s30 + $0x6d8] sm:$0xff]  ;;  %v357_v55 = vld [vmem:[%s3573_s30 + $0x6e0] sm:$0xff]  ;;  %v358_v56 = vld [vmem:[%s3573_s30 + $0x6e8] sm:$0xff] }
  0xc8   : > { %2401 = vst [vmem:[%s3585_s17 + $0x6c0] sm:$0xff] %v1377_v51  ;;  %2402 = vst [vmem:[%s3585_s17 + $0x6c8] sm:$0xff] %v1378_v52  ;;  %v1380_v57 = vmax.f32 %v356_v54, 0.11  ;;  %v1381_v58 = vmax.f32 %v357_v55, 0.11 }
  0xc9   : > { %2403 = vst [vmem:[%s3585_s17 + $0x6d0] sm:$0xff] %v1379_v53  ;;  %v1382_v59 = vmax.f32 %v358_v56, 0.11  ;;  %v359_v60 = vld [vmem:[%s3573_s30 + $0x6f0] sm:$0xff]  ;;  %v360_v61 = vld [vmem:[%s3573_s30 + $0x6f8] sm:$0xff]  ;;  %v361_v62 = vld [vmem:[%s3573_s30 + $0x700] sm:$0xff] }
  0xca   : > { %2404 = vst [vmem:[%s3585_s17 + $0x6d8] sm:$0xff] %v1380_v57  ;;  %2405 = vst [vmem:[%s3585_s17 + $0x6e0] sm:$0xff] %v1381_v58  ;;  %v1383_v63 = vmax.f32 %v359_v60, 0.11  ;;  %v1384_v0 = vmax.f32 %v360_v61, 0.11 }
  0xcb   : > { %2406 = vst [vmem:[%s3585_s17 + $0x6e8] sm:$0xff] %v1382_v59  ;;  %v1385_v1 = vmax.f32 %v361_v62, 0.11  ;;  %v362_v2 = vld [vmem:[%s3573_s30 + $0x708] sm:$0xff]  ;;  %v363_v3 = vld [vmem:[%s3573_s30 + $0x710] sm:$0xff]  ;;  %v364_v4 = vld [vmem:[%s3573_s30 + $0x718] sm:$0xff] }
  0xcc   : > { %2407 = vst [vmem:[%s3585_s17 + $0x6f0] sm:$0xff] %v1383_v63  ;;  %2408 = vst [vmem:[%s3585_s17 + $0x6f8] sm:$0xff] %v1384_v0  ;;  %v1386_v5 = vmax.f32 %v362_v2, 0.11  ;;  %v1387_v6 = vmax.f32 %v363_v3, 0.11 }
  0xcd   : > { %2409 = vst [vmem:[%s3585_s17 + $0x700] sm:$0xff] %v1385_v1  ;;  %v1388_v7 = vmax.f32 %v364_v4, 0.11  ;;  %v365_v8 = vld [vmem:[%s3573_s30 + $0x720] sm:$0xff]  ;;  %v366_v9 = vld [vmem:[%s3573_s30 + $0x728] sm:$0xff]  ;;  %v367_v10 = vld [vmem:[%s3573_s30 + $0x730] sm:$0xff] }
  0xce   : > { %2410 = vst [vmem:[%s3585_s17 + $0x708] sm:$0xff] %v1386_v5  ;;  %2411 = vst [vmem:[%s3585_s17 + $0x710] sm:$0xff] %v1387_v6  ;;  %v1389_v11 = vmax.f32 %v365_v8, 0.11  ;;  %v1390_v12 = vmax.f32 %v366_v9, 0.11 }
  0xcf   : > { %2412 = vst [vmem:[%s3585_s17 + $0x718] sm:$0xff] %v1388_v7  ;;  %v1391_v13 = vmax.f32 %v367_v10, 0.11  ;;  %v368_v14 = vld [vmem:[%s3573_s30 + $0x738] sm:$0xff]  ;;  %v369_v15 = vld [vmem:[%s3573_s30 + $0x740] sm:$0xff]  ;;  %v370_v16 = vld [vmem:[%s3573_s30 + $0x748] sm:$0xff] }
  0xd0   : > { %2413 = vst [vmem:[%s3585_s17 + $0x720] sm:$0xff] %v1389_v11  ;;  %2414 = vst [vmem:[%s3585_s17 + $0x728] sm:$0xff] %v1390_v12  ;;  %v1392_v17 = vmax.f32 %v368_v14, 0.11  ;;  %v1393_v18 = vmax.f32 %v369_v15, 0.11 }
  0xd1   : > { %2415 = vst [vmem:[%s3585_s17 + $0x730] sm:$0xff] %v1391_v13  ;;  %v1394_v19 = vmax.f32 %v370_v16, 0.11  ;;  %v371_v20 = vld [vmem:[%s3573_s30 + $0x750] sm:$0xff]  ;;  %v372_v21 = vld [vmem:[%s3573_s30 + $0x758] sm:$0xff]  ;;  %v373_v22 = vld [vmem:[%s3573_s30 + $0x760] sm:$0xff] }
  0xd2   : > { %2416 = vst [vmem:[%s3585_s17 + $0x738] sm:$0xff] %v1392_v17  ;;  %2417 = vst [vmem:[%s3585_s17 + $0x740] sm:$0xff] %v1393_v18  ;;  %v1395_v23 = vmax.f32 %v371_v20, 0.11  ;;  %v1396_v24 = vmax.f32 %v372_v21, 0.11 }
  0xd3   : > { %2418 = vst [vmem:[%s3585_s17 + $0x748] sm:$0xff] %v1394_v19  ;;  %v1397_v25 = vmax.f32 %v373_v22, 0.11  ;;  %v374_v26 = vld [vmem:[%s3573_s30 + $0x768] sm:$0xff]  ;;  %v375_v27 = vld [vmem:[%s3573_s30 + $0x770] sm:$0xff]  ;;  %v376_v28 = vld [vmem:[%s3573_s30 + $0x778] sm:$0xff] }
  0xd4   : > { %2419 = vst [vmem:[%s3585_s17 + $0x750] sm:$0xff] %v1395_v23  ;;  %2420 = vst [vmem:[%s3585_s17 + $0x758] sm:$0xff] %v1396_v24  ;;  %v1398_v29 = vmax.f32 %v374_v26, 0.11  ;;  %v1399_v30 = vmax.f32 %v375_v27, 0.11 }
  0xd5   : > { %2421 = vst [vmem:[%s3585_s17 + $0x760] sm:$0xff] %v1397_v25  ;;  %v1400_v31 = vmax.f32 %v376_v28, 0.11  ;;  %v377_v32 = vld [vmem:[%s3573_s30 + $0x780] sm:$0xff]  ;;  %v378_v33 = vld [vmem:[%s3573_s30 + $0x788] sm:$0xff]  ;;  %v379_v34 = vld [vmem:[%s3573_s30 + $0x790] sm:$0xff] }
  0xd6   : > { %2422 = vst [vmem:[%s3585_s17 + $0x768] sm:$0xff] %v1398_v29  ;;  %2423 = vst [vmem:[%s3585_s17 + $0x770] sm:$0xff] %v1399_v30  ;;  %v1401_v35 = vmax.f32 %v377_v32, 0.11  ;;  %v1402_v36 = vmax.f32 %v378_v33, 0.11 }
  0xd7   : > { %2424 = vst [vmem:[%s3585_s17 + $0x778] sm:$0xff] %v1400_v31  ;;  %v1403_v37 = vmax.f32 %v379_v34, 0.11  ;;  %v380_v38 = vld [vmem:[%s3573_s30 + $0x798] sm:$0xff]  ;;  %v381_v39 = vld [vmem:[%s3573_s30 + $0x7a0] sm:$0xff]  ;;  %v382_v40 = vld [vmem:[%s3573_s30 + $0x7a8] sm:$0xff] }
  0xd8   : > { %2425 = vst [vmem:[%s3585_s17 + $0x780] sm:$0xff] %v1401_v35  ;;  %2426 = vst [vmem:[%s3585_s17 + $0x788] sm:$0xff] %v1402_v36  ;;  %v1404_v41 = vmax.f32 %v380_v38, 0.11  ;;  %v1405_v42 = vmax.f32 %v381_v39, 0.11 }
  0xd9   : > { %2427 = vst [vmem:[%s3585_s17 + $0x790] sm:$0xff] %v1403_v37  ;;  %v1406_v43 = vmax.f32 %v382_v40, 0.11  ;;  %v383_v44 = vld [vmem:[%s3573_s30 + $0x7b0] sm:$0xff]  ;;  %v384_v45 = vld [vmem:[%s3573_s30 + $0x7b8] sm:$0xff]  ;;  %v385_v46 = vld [vmem:[%s3573_s30 + $0x7c0] sm:$0xff] }
  0xda   : > { %2428 = vst [vmem:[%s3585_s17 + $0x798] sm:$0xff] %v1404_v41  ;;  %2429 = vst [vmem:[%s3585_s17 + $0x7a0] sm:$0xff] %v1405_v42  ;;  %v1407_v47 = vmax.f32 %v383_v44, 0.11  ;;  %v1408_v48 = vmax.f32 %v384_v45, 0.11 }
  0xdb   : > { %2430 = vst [vmem:[%s3585_s17 + $0x7a8] sm:$0xff] %v1406_v43  ;;  %v1409_v49 = vmax.f32 %v385_v46, 0.11  ;;  %v386_v50 = vld [vmem:[%s3573_s30 + $0x7c8] sm:$0xff]  ;;  %v387_v51 = vld [vmem:[%s3573_s30 + $0x7d0] sm:$0xff]  ;;  %v388_v52 = vld [vmem:[%s3573_s30 + $0x7d8] sm:$0xff] }
  0xdc   : > { %2431 = vst [vmem:[%s3585_s17 + $0x7b0] sm:$0xff] %v1407_v47  ;;  %2432 = vst [vmem:[%s3585_s17 + $0x7b8] sm:$0xff] %v1408_v48  ;;  %v1410_v53 = vmax.f32 %v386_v50, 0.11  ;;  %v1411_v54 = vmax.f32 %v387_v51, 0.11 }
  0xdd   : > { %2433 = vst [vmem:[%s3585_s17 + $0x7c0] sm:$0xff] %v1409_v49  ;;  %v1412_v55 = vmax.f32 %v388_v52, 0.11  ;;  %v389_v56 = vld [vmem:[%s3573_s30 + $0x7e0] sm:$0xff]  ;;  %v390_v57 = vld [vmem:[%s3573_s30 + $0x7e8] sm:$0xff]  ;;  %v391_v58 = vld [vmem:[%s3573_s30 + $0x7f0] sm:$0xff] }
  0xde   : > { %2434 = vst [vmem:[%s3585_s17 + $0x7c8] sm:$0xff] %v1410_v53  ;;  %2435 = vst [vmem:[%s3585_s17 + $0x7d0] sm:$0xff] %v1411_v54  ;;  %v1413_v59 = vmax.f32 %v389_v56, 0.11  ;;  %v1414_v60 = vmax.f32 %v390_v57, 0.11 }
  0xdf   : > { %2436 = vst [vmem:[%s3585_s17 + $0x7d8] sm:$0xff] %v1412_v55  ;;  %v1415_v61 = vmax.f32 %v391_v58, 0.11  ;;  %v392_v62 = vld [vmem:[%s3573_s30 + $0x7f8] sm:$0xff]  ;;  %v393_v63 = vld [vmem:[%s3573_s30 + $0x800] sm:$0xff]  ;;  %v394_v0 = vld [vmem:[%s3573_s30 + $0x808] sm:$0xff] }
  0xe0   : > { %2437 = vst [vmem:[%s3585_s17 + $0x7e0] sm:$0xff] %v1413_v59  ;;  %2438 = vst [vmem:[%s3585_s17 + $0x7e8] sm:$0xff] %v1414_v60  ;;  %v1416_v1 = vmax.f32 %v392_v62, 0.11  ;;  %v1417_v2 = vmax.f32 %v393_v63, 0.11 }
  0xe1   : > { %2439 = vst [vmem:[%s3585_s17 + $0x7f0] sm:$0xff] %v1415_v61  ;;  %v1418_v3 = vmax.f32 %v394_v0, 0.11  ;;  %v395_v4 = vld [vmem:[%s3573_s30 + $0x810] sm:$0xff]  ;;  %v396_v5 = vld [vmem:[%s3573_s30 + $0x818] sm:$0xff]  ;;  %v397_v6 = vld [vmem:[%s3573_s30 + $0x820] sm:$0xff] }
  0xe2   : > { %2440 = vst [vmem:[%s3585_s17 + $0x7f8] sm:$0xff] %v1416_v1  ;;  %2441 = vst [vmem:[%s3585_s17 + $0x800] sm:$0xff] %v1417_v2  ;;  %v1419_v7 = vmax.f32 %v395_v4, 0.11  ;;  %v1420_v8 = vmax.f32 %v396_v5, 0.11 }
  0xe3   : > { %2442 = vst [vmem:[%s3585_s17 + $0x808] sm:$0xff] %v1418_v3  ;;  %v1421_v9 = vmax.f32 %v397_v6, 0.11  ;;  %v398_v10 = vld [vmem:[%s3573_s30 + $0x828] sm:$0xff]  ;;  %v399_v11 = vld [vmem:[%s3573_s30 + $0x830] sm:$0xff]  ;;  %v400_v12 = vld [vmem:[%s3573_s30 + $0x838] sm:$0xff] }
  0xe4   : > { %2443 = vst [vmem:[%s3585_s17 + $0x810] sm:$0xff] %v1419_v7  ;;  %2444 = vst [vmem:[%s3585_s17 + $0x818] sm:$0xff] %v1420_v8  ;;  %v1422_v13 = vmax.f32 %v398_v10, 0.11  ;;  %v1423_v14 = vmax.f32 %v399_v11, 0.11 }
  0xe5   : > { %2445 = vst [vmem:[%s3585_s17 + $0x820] sm:$0xff] %v1421_v9  ;;  %v1424_v15 = vmax.f32 %v400_v12, 0.11  ;;  %v401_v16 = vld [vmem:[%s3573_s30 + $0x840] sm:$0xff]  ;;  %v402_v17 = vld [vmem:[%s3573_s30 + $0x848] sm:$0xff]  ;;  %v403_v18 = vld [vmem:[%s3573_s30 + $0x850] sm:$0xff] }
  0xe6   : > { %2446 = vst [vmem:[%s3585_s17 + $0x828] sm:$0xff] %v1422_v13  ;;  %2447 = vst [vmem:[%s3585_s17 + $0x830] sm:$0xff] %v1423_v14  ;;  %v1425_v19 = vmax.f32 %v401_v16, 0.11  ;;  %v1426_v20 = vmax.f32 %v402_v17, 0.11 }
  0xe7   : > { %2448 = vst [vmem:[%s3585_s17 + $0x838] sm:$0xff] %v1424_v15  ;;  %v1427_v21 = vmax.f32 %v403_v18, 0.11  ;;  %v404_v22 = vld [vmem:[%s3573_s30 + $0x858] sm:$0xff]  ;;  %v405_v23 = vld [vmem:[%s3573_s30 + $0x860] sm:$0xff]  ;;  %v406_v24 = vld [vmem:[%s3573_s30 + $0x868] sm:$0xff] }
  0xe8   : > { %2449 = vst [vmem:[%s3585_s17 + $0x840] sm:$0xff] %v1425_v19  ;;  %2450 = vst [vmem:[%s3585_s17 + $0x848] sm:$0xff] %v1426_v20  ;;  %v1428_v25 = vmax.f32 %v404_v22, 0.11  ;;  %v1429_v26 = vmax.f32 %v405_v23, 0.11 }
  0xe9   : > { %2451 = vst [vmem:[%s3585_s17 + $0x850] sm:$0xff] %v1427_v21  ;;  %v1430_v27 = vmax.f32 %v406_v24, 0.11  ;;  %v407_v28 = vld [vmem:[%s3573_s30 + $0x870] sm:$0xff]  ;;  %v408_v29 = vld [vmem:[%s3573_s30 + $0x878] sm:$0xff]  ;;  %v409_v30 = vld [vmem:[%s3573_s30 + $0x880] sm:$0xff] }
  0xea   : > { %2452 = vst [vmem:[%s3585_s17 + $0x858] sm:$0xff] %v1428_v25  ;;  %2453 = vst [vmem:[%s3585_s17 + $0x860] sm:$0xff] %v1429_v26  ;;  %v1431_v31 = vmax.f32 %v407_v28, 0.11  ;;  %v1432_v32 = vmax.f32 %v408_v29, 0.11 }
  0xeb   : > { %2454 = vst [vmem:[%s3585_s17 + $0x868] sm:$0xff] %v1430_v27  ;;  %v1433_v33 = vmax.f32 %v409_v30, 0.11  ;;  %v410_v34 = vld [vmem:[%s3573_s30 + $0x888] sm:$0xff]  ;;  %v411_v35 = vld [vmem:[%s3573_s30 + $0x890] sm:$0xff]  ;;  %v412_v36 = vld [vmem:[%s3573_s30 + $0x898] sm:$0xff] }
  0xec   : > { %2455 = vst [vmem:[%s3585_s17 + $0x870] sm:$0xff] %v1431_v31  ;;  %2456 = vst [vmem:[%s3585_s17 + $0x878] sm:$0xff] %v1432_v32  ;;  %v1434_v37 = vmax.f32 %v410_v34, 0.11  ;;  %v1435_v38 = vmax.f32 %v411_v35, 0.11 }
  0xed   : > { %2457 = vst [vmem:[%s3585_s17 + $0x880] sm:$0xff] %v1433_v33  ;;  %v1436_v39 = vmax.f32 %v412_v36, 0.11  ;;  %v413_v40 = vld [vmem:[%s3573_s30 + $0x8a0] sm:$0xff]  ;;  %v414_v41 = vld [vmem:[%s3573_s30 + $0x8a8] sm:$0xff]  ;;  %v415_v42 = vld [vmem:[%s3573_s30 + $0x8b0] sm:$0xff] }
  0xee   : > { %2458 = vst [vmem:[%s3585_s17 + $0x888] sm:$0xff] %v1434_v37  ;;  %2459 = vst [vmem:[%s3585_s17 + $0x890] sm:$0xff] %v1435_v38  ;;  %v1437_v43 = vmax.f32 %v413_v40, 0.11  ;;  %v1438_v44 = vmax.f32 %v414_v41, 0.11 }
  0xef   : > { %2460 = vst [vmem:[%s3585_s17 + $0x898] sm:$0xff] %v1436_v39  ;;  %v1439_v45 = vmax.f32 %v415_v42, 0.11  ;;  %v416_v46 = vld [vmem:[%s3573_s30 + $0x8b8] sm:$0xff]  ;;  %v417_v47 = vld [vmem:[%s3573_s30 + $0x8c0] sm:$0xff]  ;;  %v418_v48 = vld [vmem:[%s3573_s30 + $0x8c8] sm:$0xff] }
  0xf0   : > { %2461 = vst [vmem:[%s3585_s17 + $0x8a0] sm:$0xff] %v1437_v43  ;;  %2462 = vst [vmem:[%s3585_s17 + $0x8a8] sm:$0xff] %v1438_v44  ;;  %v1440_v49 = vmax.f32 %v416_v46, 0.11  ;;  %v1441_v50 = vmax.f32 %v417_v47, 0.11 }
  0xf1   : > { %2463 = vst [vmem:[%s3585_s17 + $0x8b0] sm:$0xff] %v1439_v45  ;;  %v1442_v51 = vmax.f32 %v418_v48, 0.11  ;;  %v419_v52 = vld [vmem:[%s3573_s30 + $0x8d0] sm:$0xff]  ;;  %v420_v53 = vld [vmem:[%s3573_s30 + $0x8d8] sm:$0xff]  ;;  %v421_v54 = vld [vmem:[%s3573_s30 + $0x8e0] sm:$0xff] }
  0xf2   : > { %2464 = vst [vmem:[%s3585_s17 + $0x8b8] sm:$0xff] %v1440_v49  ;;  %2465 = vst [vmem:[%s3585_s17 + $0x8c0] sm:$0xff] %v1441_v50  ;;  %v1443_v55 = vmax.f32 %v419_v52, 0.11  ;;  %v1444_v56 = vmax.f32 %v420_v53, 0.11 }
  0xf3   : > { %2466 = vst [vmem:[%s3585_s17 + $0x8c8] sm:$0xff] %v1442_v51  ;;  %v1445_v57 = vmax.f32 %v421_v54, 0.11  ;;  %v422_v58 = vld [vmem:[%s3573_s30 + $0x8e8] sm:$0xff]  ;;  %v423_v59 = vld [vmem:[%s3573_s30 + $0x8f0] sm:$0xff]  ;;  %v424_v60 = vld [vmem:[%s3573_s30 + $0x8f8] sm:$0xff] }
  0xf4   : > { %2467 = vst [vmem:[%s3585_s17 + $0x8d0] sm:$0xff] %v1443_v55  ;;  %2468 = vst [vmem:[%s3585_s17 + $0x8d8] sm:$0xff] %v1444_v56  ;;  %v1446_v61 = vmax.f32 %v422_v58, 0.11  ;;  %v1447_v62 = vmax.f32 %v423_v59, 0.11 }
  0xf5   : > { %2469 = vst [vmem:[%s3585_s17 + $0x8e0] sm:$0xff] %v1445_v57  ;;  %v1448_v63 = vmax.f32 %v424_v60, 0.11  ;;  %v425_v0 = vld [vmem:[%s3573_s30 + $0x900] sm:$0xff]  ;;  %v426_v1 = vld [vmem:[%s3573_s30 + $0x908] sm:$0xff]  ;;  %v427_v2 = vld [vmem:[%s3573_s30 + $0x910] sm:$0xff] }
  0xf6   : > { %2470 = vst [vmem:[%s3585_s17 + $0x8e8] sm:$0xff] %v1446_v61  ;;  %2471 = vst [vmem:[%s3585_s17 + $0x8f0] sm:$0xff] %v1447_v62  ;;  %v1449_v3 = vmax.f32 %v425_v0, 0.11  ;;  %v1450_v4 = vmax.f32 %v426_v1, 0.11 }
  0xf7   : > { %2472 = vst [vmem:[%s3585_s17 + $0x8f8] sm:$0xff] %v1448_v63  ;;  %v1451_v5 = vmax.f32 %v427_v2, 0.11  ;;  %v428_v6 = vld [vmem:[%s3573_s30 + $0x918] sm:$0xff]  ;;  %v429_v7 = vld [vmem:[%s3573_s30 + $0x920] sm:$0xff]  ;;  %v430_v8 = vld [vmem:[%s3573_s30 + $0x928] sm:$0xff] }
  0xf8   : > { %2473 = vst [vmem:[%s3585_s17 + $0x900] sm:$0xff] %v1449_v3  ;;  %2474 = vst [vmem:[%s3585_s17 + $0x908] sm:$0xff] %v1450_v4  ;;  %v1452_v9 = vmax.f32 %v428_v6, 0.11  ;;  %v1453_v10 = vmax.f32 %v429_v7, 0.11 }
  0xf9   : > { %2475 = vst [vmem:[%s3585_s17 + $0x910] sm:$0xff] %v1451_v5  ;;  %v1454_v11 = vmax.f32 %v430_v8, 0.11  ;;  %v431_v12 = vld [vmem:[%s3573_s30 + $0x930] sm:$0xff]  ;;  %v432_v13 = vld [vmem:[%s3573_s30 + $0x938] sm:$0xff]  ;;  %v433_v14 = vld [vmem:[%s3573_s30 + $0x940] sm:$0xff] }
  0xfa   : > { %2476 = vst [vmem:[%s3585_s17 + $0x918] sm:$0xff] %v1452_v9  ;;  %2477 = vst [vmem:[%s3585_s17 + $0x920] sm:$0xff] %v1453_v10  ;;  %v1455_v15 = vmax.f32 %v431_v12, 0.11  ;;  %v1456_v16 = vmax.f32 %v432_v13, 0.11 }
  0xfb   : > { %2478 = vst [vmem:[%s3585_s17 + $0x928] sm:$0xff] %v1454_v11  ;;  %v1457_v17 = vmax.f32 %v433_v14, 0.11  ;;  %v434_v18 = vld [vmem:[%s3573_s30 + $0x948] sm:$0xff]  ;;  %v435_v19 = vld [vmem:[%s3573_s30 + $0x950] sm:$0xff]  ;;  %v436_v20 = vld [vmem:[%s3573_s30 + $0x958] sm:$0xff] }
  0xfc   : > { %2479 = vst [vmem:[%s3585_s17 + $0x930] sm:$0xff] %v1455_v15  ;;  %2480 = vst [vmem:[%s3585_s17 + $0x938] sm:$0xff] %v1456_v16  ;;  %v1458_v21 = vmax.f32 %v434_v18, 0.11  ;;  %v1459_v22 = vmax.f32 %v435_v19, 0.11 }
  0xfd   : > { %2481 = vst [vmem:[%s3585_s17 + $0x940] sm:$0xff] %v1457_v17  ;;  %v1460_v23 = vmax.f32 %v436_v20, 0.11  ;;  %v437_v24 = vld [vmem:[%s3573_s30 + $0x960] sm:$0xff]  ;;  %v438_v25 = vld [vmem:[%s3573_s30 + $0x968] sm:$0xff]  ;;  %v439_v26 = vld [vmem:[%s3573_s30 + $0x970] sm:$0xff] }
  0xfe   : > { %2482 = vst [vmem:[%s3585_s17 + $0x948] sm:$0xff] %v1458_v21  ;;  %2483 = vst [vmem:[%s3585_s17 + $0x950] sm:$0xff] %v1459_v22  ;;  %v1461_v27 = vmax.f32 %v437_v24, 0.11  ;;  %v1462_v28 = vmax.f32 %v438_v25, 0.11 }
  0xff   : > { %2484 = vst [vmem:[%s3585_s17 + $0x958] sm:$0xff] %v1460_v23  ;;  %v1463_v29 = vmax.f32 %v439_v26, 0.11  ;;  %v440_v30 = vld [vmem:[%s3573_s30 + $0x978] sm:$0xff]  ;;  %v441_v31 = vld [vmem:[%s3573_s30 + $0x980] sm:$0xff]  ;;  %v442_v32 = vld [vmem:[%s3573_s30 + $0x988] sm:$0xff] }
 0x100   : > { %2485 = vst [vmem:[%s3585_s17 + $0x960] sm:$0xff] %v1461_v27  ;;  %2486 = vst [vmem:[%s3585_s17 + $0x968] sm:$0xff] %v1462_v28  ;;  %v1464_v33 = vmax.f32 %v440_v30, 0.11  ;;  %v1465_v34 = vmax.f32 %v441_v31, 0.11 }
 0x101   : > { %2487 = vst [vmem:[%s3585_s17 + $0x970] sm:$0xff] %v1463_v29  ;;  %v1466_v35 = vmax.f32 %v442_v32, 0.11  ;;  %v443_v36 = vld [vmem:[%s3573_s30 + $0x990] sm:$0xff]  ;;  %v444_v37 = vld [vmem:[%s3573_s30 + $0x998] sm:$0xff]  ;;  %v445_v38 = vld [vmem:[%s3573_s30 + $0x9a0] sm:$0xff] }
 0x102   : > { %2488 = vst [vmem:[%s3585_s17 + $0x978] sm:$0xff] %v1464_v33  ;;  %2489 = vst [vmem:[%s3585_s17 + $0x980] sm:$0xff] %v1465_v34  ;;  %v1467_v39 = vmax.f32 %v443_v36, 0.11  ;;  %v1468_v40 = vmax.f32 %v444_v37, 0.11 }
 0x103   : > { %2490 = vst [vmem:[%s3585_s17 + $0x988] sm:$0xff] %v1466_v35  ;;  %v1469_v41 = vmax.f32 %v445_v38, 0.11  ;;  %v446_v42 = vld [vmem:[%s3573_s30 + $0x9a8] sm:$0xff]  ;;  %v447_v43 = vld [vmem:[%s3573_s30 + $0x9b0] sm:$0xff]  ;;  %v448_v44 = vld [vmem:[%s3573_s30 + $0x9b8] sm:$0xff] }
 0x104   : > { %2491 = vst [vmem:[%s3585_s17 + $0x990] sm:$0xff] %v1467_v39  ;;  %2492 = vst [vmem:[%s3585_s17 + $0x998] sm:$0xff] %v1468_v40  ;;  %v1470_v45 = vmax.f32 %v446_v42, 0.11  ;;  %v1471_v46 = vmax.f32 %v447_v43, 0.11 }
 0x105   : > { %2493 = vst [vmem:[%s3585_s17 + $0x9a0] sm:$0xff] %v1469_v41  ;;  %v1472_v47 = vmax.f32 %v448_v44, 0.11  ;;  %v449_v48 = vld [vmem:[%s3573_s30 + $0x9c0] sm:$0xff]  ;;  %v450_v49 = vld [vmem:[%s3573_s30 + $0x9c8] sm:$0xff]  ;;  %v451_v50 = vld [vmem:[%s3573_s30 + $0x9d0] sm:$0xff] }
 0x106   : > { %2494 = vst [vmem:[%s3585_s17 + $0x9a8] sm:$0xff] %v1470_v45  ;;  %2495 = vst [vmem:[%s3585_s17 + $0x9b0] sm:$0xff] %v1471_v46  ;;  %v1473_v51 = vmax.f32 %v449_v48, 0.11  ;;  %v1474_v52 = vmax.f32 %v450_v49, 0.11 }
 0x107   : > { %2496 = vst [vmem:[%s3585_s17 + $0x9b8] sm:$0xff] %v1472_v47  ;;  %v1475_v53 = vmax.f32 %v451_v50, 0.11  ;;  %v452_v54 = vld [vmem:[%s3573_s30 + $0x9d8] sm:$0xff]  ;;  %v453_v55 = vld [vmem:[%s3573_s30 + $0x9e0] sm:$0xff]  ;;  %v454_v56 = vld [vmem:[%s3573_s30 + $0x9e8] sm:$0xff] }
 0x108   : > { %2497 = vst [vmem:[%s3585_s17 + $0x9c0] sm:$0xff] %v1473_v51  ;;  %2498 = vst [vmem:[%s3585_s17 + $0x9c8] sm:$0xff] %v1474_v52  ;;  %v1476_v57 = vmax.f32 %v452_v54, 0.11  ;;  %v1477_v58 = vmax.f32 %v453_v55, 0.11 }
 0x109   : > { %2499 = vst [vmem:[%s3585_s17 + $0x9d0] sm:$0xff] %v1475_v53  ;;  %v1478_v59 = vmax.f32 %v454_v56, 0.11  ;;  %v455_v60 = vld [vmem:[%s3573_s30 + $0x9f0] sm:$0xff]  ;;  %v456_v61 = vld [vmem:[%s3573_s30 + $0x9f8] sm:$0xff]  ;;  %v457_v62 = vld [vmem:[%s3573_s30 + $0xa00] sm:$0xff] }
 0x10a   : > { %2500 = vst [vmem:[%s3585_s17 + $0x9d8] sm:$0xff] %v1476_v57  ;;  %2501 = vst [vmem:[%s3585_s17 + $0x9e0] sm:$0xff] %v1477_v58  ;;  %v1479_v63 = vmax.f32 %v455_v60, 0.11  ;;  %v1480_v0 = vmax.f32 %v456_v61, 0.11 }
 0x10b   : > { %2502 = vst [vmem:[%s3585_s17 + $0x9e8] sm:$0xff] %v1478_v59  ;;  %v1481_v1 = vmax.f32 %v457_v62, 0.11  ;;  %v458_v2 = vld [vmem:[%s3573_s30 + $0xa08] sm:$0xff]  ;;  %v459_v3 = vld [vmem:[%s3573_s30 + $0xa10] sm:$0xff]  ;;  %v460_v4 = vld [vmem:[%s3573_s30 + $0xa18] sm:$0xff] }
 0x10c   : > { %2503 = vst [vmem:[%s3585_s17 + $0x9f0] sm:$0xff] %v1479_v63  ;;  %2504 = vst [vmem:[%s3585_s17 + $0x9f8] sm:$0xff] %v1480_v0  ;;  %v1482_v5 = vmax.f32 %v458_v2, 0.11  ;;  %v1483_v6 = vmax.f32 %v459_v3, 0.11 }
 0x10d   : > { %2505 = vst [vmem:[%s3585_s17 + $0xa00] sm:$0xff] %v1481_v1  ;;  %v1484_v7 = vmax.f32 %v460_v4, 0.11  ;;  %v461_v8 = vld [vmem:[%s3573_s30 + $0xa20] sm:$0xff]  ;;  %v462_v9 = vld [vmem:[%s3573_s30 + $0xa28] sm:$0xff]  ;;  %v463_v10 = vld [vmem:[%s3573_s30 + $0xa30] sm:$0xff] }
 0x10e   : > { %2506 = vst [vmem:[%s3585_s17 + $0xa08] sm:$0xff] %v1482_v5  ;;  %2507 = vst [vmem:[%s3585_s17 + $0xa10] sm:$0xff] %v1483_v6  ;;  %v1485_v11 = vmax.f32 %v461_v8, 0.11  ;;  %v1486_v12 = vmax.f32 %v462_v9, 0.11 }
 0x10f   : > { %2508 = vst [vmem:[%s3585_s17 + $0xa18] sm:$0xff] %v1484_v7  ;;  %v1487_v13 = vmax.f32 %v463_v10, 0.11  ;;  %v464_v14 = vld [vmem:[%s3573_s30 + $0xa38] sm:$0xff]  ;;  %v465_v15 = vld [vmem:[%s3573_s30 + $0xa40] sm:$0xff]  ;;  %v466_v16 = vld [vmem:[%s3573_s30 + $0xa48] sm:$0xff] }
 0x110   : > { %2509 = vst [vmem:[%s3585_s17 + $0xa20] sm:$0xff] %v1485_v11  ;;  %2510 = vst [vmem:[%s3585_s17 + $0xa28] sm:$0xff] %v1486_v12  ;;  %v1488_v17 = vmax.f32 %v464_v14, 0.11  ;;  %v1489_v18 = vmax.f32 %v465_v15, 0.11 }
 0x111   : > { %2511 = vst [vmem:[%s3585_s17 + $0xa30] sm:$0xff] %v1487_v13  ;;  %v1490_v19 = vmax.f32 %v466_v16, 0.11  ;;  %v467_v20 = vld [vmem:[%s3573_s30 + $0xa50] sm:$0xff]  ;;  %v468_v21 = vld [vmem:[%s3573_s30 + $0xa58] sm:$0xff]  ;;  %v469_v22 = vld [vmem:[%s3573_s30 + $0xa60] sm:$0xff] }
 0x112   : > { %2512 = vst [vmem:[%s3585_s17 + $0xa38] sm:$0xff] %v1488_v17  ;;  %2513 = vst [vmem:[%s3585_s17 + $0xa40] sm:$0xff] %v1489_v18  ;;  %v1491_v23 = vmax.f32 %v467_v20, 0.11  ;;  %v1492_v24 = vmax.f32 %v468_v21, 0.11 }
 0x113   : > { %2514 = vst [vmem:[%s3585_s17 + $0xa48] sm:$0xff] %v1490_v19  ;;  %v1493_v25 = vmax.f32 %v469_v22, 0.11  ;;  %v470_v26 = vld [vmem:[%s3573_s30 + $0xa68] sm:$0xff]  ;;  %v471_v27 = vld [vmem:[%s3573_s30 + $0xa70] sm:$0xff]  ;;  %v472_v28 = vld [vmem:[%s3573_s30 + $0xa78] sm:$0xff] }
 0x114   : > { %2515 = vst [vmem:[%s3585_s17 + $0xa50] sm:$0xff] %v1491_v23  ;;  %2516 = vst [vmem:[%s3585_s17 + $0xa58] sm:$0xff] %v1492_v24  ;;  %v1494_v29 = vmax.f32 %v470_v26, 0.11  ;;  %v1495_v30 = vmax.f32 %v471_v27, 0.11 }
 0x115   : > { %2517 = vst [vmem:[%s3585_s17 + $0xa60] sm:$0xff] %v1493_v25  ;;  %v1496_v31 = vmax.f32 %v472_v28, 0.11  ;;  %v473_v32 = vld [vmem:[%s3573_s30 + $0xa80] sm:$0xff]  ;;  %v474_v33 = vld [vmem:[%s3573_s30 + $0xa88] sm:$0xff]  ;;  %v475_v34 = vld [vmem:[%s3573_s30 + $0xa90] sm:$0xff] }
 0x116   : > { %2518 = vst [vmem:[%s3585_s17 + $0xa68] sm:$0xff] %v1494_v29  ;;  %2519 = vst [vmem:[%s3585_s17 + $0xa70] sm:$0xff] %v1495_v30  ;;  %v1497_v35 = vmax.f32 %v473_v32, 0.11  ;;  %v1498_v36 = vmax.f32 %v474_v33, 0.11 }
 0x117   : > { %2520 = vst [vmem:[%s3585_s17 + $0xa78] sm:$0xff] %v1496_v31  ;;  %v1499_v37 = vmax.f32 %v475_v34, 0.11  ;;  %v476_v38 = vld [vmem:[%s3573_s30 + $0xa98] sm:$0xff]  ;;  %v477_v39 = vld [vmem:[%s3573_s30 + $0xaa0] sm:$0xff]  ;;  %v478_v40 = vld [vmem:[%s3573_s30 + $0xaa8] sm:$0xff] }
 0x118   : > { %2521 = vst [vmem:[%s3585_s17 + $0xa80] sm:$0xff] %v1497_v35  ;;  %2522 = vst [vmem:[%s3585_s17 + $0xa88] sm:$0xff] %v1498_v36  ;;  %v1500_v41 = vmax.f32 %v476_v38, 0.11  ;;  %v1501_v42 = vmax.f32 %v477_v39, 0.11 }
 0x119   : > { %2523 = vst [vmem:[%s3585_s17 + $0xa90] sm:$0xff] %v1499_v37  ;;  %v1502_v43 = vmax.f32 %v478_v40, 0.11  ;;  %v479_v44 = vld [vmem:[%s3573_s30 + $0xab0] sm:$0xff]  ;;  %v480_v45 = vld [vmem:[%s3573_s30 + $0xab8] sm:$0xff]  ;;  %v481_v46 = vld [vmem:[%s3573_s30 + $0xac0] sm:$0xff] }
 0x11a   : > { %2524 = vst [vmem:[%s3585_s17 + $0xa98] sm:$0xff] %v1500_v41  ;;  %2525 = vst [vmem:[%s3585_s17 + $0xaa0] sm:$0xff] %v1501_v42  ;;  %v1503_v47 = vmax.f32 %v479_v44, 0.11  ;;  %v1504_v48 = vmax.f32 %v480_v45, 0.11 }
 0x11b   : > { %2526 = vst [vmem:[%s3585_s17 + $0xaa8] sm:$0xff] %v1502_v43  ;;  %v1505_v49 = vmax.f32 %v481_v46, 0.11  ;;  %v482_v50 = vld [vmem:[%s3573_s30 + $0xac8] sm:$0xff]  ;;  %v483_v51 = vld [vmem:[%s3573_s30 + $0xad0] sm:$0xff]  ;;  %v484_v52 = vld [vmem:[%s3573_s30 + $0xad8] sm:$0xff] }
 0x11c   : > { %2527 = vst [vmem:[%s3585_s17 + $0xab0] sm:$0xff] %v1503_v47  ;;  %2528 = vst [vmem:[%s3585_s17 + $0xab8] sm:$0xff] %v1504_v48  ;;  %v1506_v53 = vmax.f32 %v482_v50, 0.11  ;;  %v1507_v54 = vmax.f32 %v483_v51, 0.11 }
 0x11d   : > { %2529 = vst [vmem:[%s3585_s17 + $0xac0] sm:$0xff] %v1505_v49  ;;  %v1508_v55 = vmax.f32 %v484_v52, 0.11  ;;  %v485_v56 = vld [vmem:[%s3573_s30 + $0xae0] sm:$0xff]  ;;  %v486_v57 = vld [vmem:[%s3573_s30 + $0xae8] sm:$0xff]  ;;  %v487_v58 = vld [vmem:[%s3573_s30 + $0xaf0] sm:$0xff] }
 0x11e   : > { %2530 = vst [vmem:[%s3585_s17 + $0xac8] sm:$0xff] %v1506_v53  ;;  %2531 = vst [vmem:[%s3585_s17 + $0xad0] sm:$0xff] %v1507_v54  ;;  %v1509_v59 = vmax.f32 %v485_v56, 0.11  ;;  %v1510_v60 = vmax.f32 %v486_v57, 0.11 }
 0x11f   : > { %2532 = vst [vmem:[%s3585_s17 + $0xad8] sm:$0xff] %v1508_v55  ;;  %v1511_v61 = vmax.f32 %v487_v58, 0.11  ;;  %v488_v62 = vld [vmem:[%s3573_s30 + $0xaf8] sm:$0xff]  ;;  %v489_v63 = vld [vmem:[%s3573_s30 + $0xb00] sm:$0xff]  ;;  %v490_v0 = vld [vmem:[%s3573_s30 + $0xb08] sm:$0xff] }
 0x120   : > { %2533 = vst [vmem:[%s3585_s17 + $0xae0] sm:$0xff] %v1509_v59  ;;  %2534 = vst [vmem:[%s3585_s17 + $0xae8] sm:$0xff] %v1510_v60  ;;  %v1512_v1 = vmax.f32 %v488_v62, 0.11  ;;  %v1513_v2 = vmax.f32 %v489_v63, 0.11 }
 0x121   : > { %2535 = vst [vmem:[%s3585_s17 + $0xaf0] sm:$0xff] %v1511_v61  ;;  %v1514_v3 = vmax.f32 %v490_v0, 0.11  ;;  %v491_v4 = vld [vmem:[%s3573_s30 + $0xb10] sm:$0xff]  ;;  %v492_v5 = vld [vmem:[%s3573_s30 + $0xb18] sm:$0xff]  ;;  %v493_v6 = vld [vmem:[%s3573_s30 + $0xb20] sm:$0xff] }
 0x122   : > { %2536 = vst [vmem:[%s3585_s17 + $0xaf8] sm:$0xff] %v1512_v1  ;;  %2537 = vst [vmem:[%s3585_s17 + $0xb00] sm:$0xff] %v1513_v2  ;;  %v1515_v7 = vmax.f32 %v491_v4, 0.11  ;;  %v1516_v8 = vmax.f32 %v492_v5, 0.11 }
 0x123   : > { %2538 = vst [vmem:[%s3585_s17 + $0xb08] sm:$0xff] %v1514_v3  ;;  %v1517_v9 = vmax.f32 %v493_v6, 0.11  ;;  %v494_v10 = vld [vmem:[%s3573_s30 + $0xb28] sm:$0xff]  ;;  %v495_v11 = vld [vmem:[%s3573_s30 + $0xb30] sm:$0xff]  ;;  %v496_v12 = vld [vmem:[%s3573_s30 + $0xb38] sm:$0xff] }
 0x124   : > { %2539 = vst [vmem:[%s3585_s17 + $0xb10] sm:$0xff] %v1515_v7  ;;  %2540 = vst [vmem:[%s3585_s17 + $0xb18] sm:$0xff] %v1516_v8  ;;  %v1518_v13 = vmax.f32 %v494_v10, 0.11  ;;  %v1519_v14 = vmax.f32 %v495_v11, 0.11 }
 0x125   : > { %2541 = vst [vmem:[%s3585_s17 + $0xb20] sm:$0xff] %v1517_v9  ;;  %v1520_v15 = vmax.f32 %v496_v12, 0.11  ;;  %v497_v16 = vld [vmem:[%s3573_s30 + $0xb40] sm:$0xff]  ;;  %v498_v17 = vld [vmem:[%s3573_s30 + $0xb48] sm:$0xff]  ;;  %v499_v18 = vld [vmem:[%s3573_s30 + $0xb50] sm:$0xff] }
 0x126   : > { %2542 = vst [vmem:[%s3585_s17 + $0xb28] sm:$0xff] %v1518_v13  ;;  %2543 = vst [vmem:[%s3585_s17 + $0xb30] sm:$0xff] %v1519_v14  ;;  %v1521_v19 = vmax.f32 %v497_v16, 0.11  ;;  %v1522_v20 = vmax.f32 %v498_v17, 0.11 }
 0x127   : > { %2544 = vst [vmem:[%s3585_s17 + $0xb38] sm:$0xff] %v1520_v15  ;;  %v1523_v21 = vmax.f32 %v499_v18, 0.11  ;;  %v500_v22 = vld [vmem:[%s3573_s30 + $0xb58] sm:$0xff]  ;;  %v501_v23 = vld [vmem:[%s3573_s30 + $0xb60] sm:$0xff]  ;;  %v502_v24 = vld [vmem:[%s3573_s30 + $0xb68] sm:$0xff] }
 0x128   : > { %2545 = vst [vmem:[%s3585_s17 + $0xb40] sm:$0xff] %v1521_v19  ;;  %2546 = vst [vmem:[%s3585_s17 + $0xb48] sm:$0xff] %v1522_v20  ;;  %v1524_v25 = vmax.f32 %v500_v22, 0.11  ;;  %v1525_v26 = vmax.f32 %v501_v23, 0.11 }
 0x129   : > { %2547 = vst [vmem:[%s3585_s17 + $0xb50] sm:$0xff] %v1523_v21  ;;  %v1526_v27 = vmax.f32 %v502_v24, 0.11  ;;  %v503_v28 = vld [vmem:[%s3573_s30 + $0xb70] sm:$0xff]  ;;  %v504_v29 = vld [vmem:[%s3573_s30 + $0xb78] sm:$0xff]  ;;  %v505_v30 = vld [vmem:[%s3573_s30 + $0xb80] sm:$0xff] }
 0x12a   : > { %2548 = vst [vmem:[%s3585_s17 + $0xb58] sm:$0xff] %v1524_v25  ;;  %2549 = vst [vmem:[%s3585_s17 + $0xb60] sm:$0xff] %v1525_v26  ;;  %v1527_v31 = vmax.f32 %v503_v28, 0.11  ;;  %v1528_v32 = vmax.f32 %v504_v29, 0.11 }
 0x12b   : > { %2550 = vst [vmem:[%s3585_s17 + $0xb68] sm:$0xff] %v1526_v27  ;;  %v1529_v33 = vmax.f32 %v505_v30, 0.11  ;;  %v506_v34 = vld [vmem:[%s3573_s30 + $0xb88] sm:$0xff]  ;;  %v507_v35 = vld [vmem:[%s3573_s30 + $0xb90] sm:$0xff]  ;;  %v508_v36 = vld [vmem:[%s3573_s30 + $0xb98] sm:$0xff] }
 0x12c   : > { %2551 = vst [vmem:[%s3585_s17 + $0xb70] sm:$0xff] %v1527_v31  ;;  %2552 = vst [vmem:[%s3585_s17 + $0xb78] sm:$0xff] %v1528_v32  ;;  %v1530_v37 = vmax.f32 %v506_v34, 0.11  ;;  %v1531_v38 = vmax.f32 %v507_v35, 0.11 }
 0x12d   : > { %2553 = vst [vmem:[%s3585_s17 + $0xb80] sm:$0xff] %v1529_v33  ;;  %v1532_v39 = vmax.f32 %v508_v36, 0.11  ;;  %v509_v40 = vld [vmem:[%s3573_s30 + $0xba0] sm:$0xff]  ;;  %v510_v41 = vld [vmem:[%s3573_s30 + $0xba8] sm:$0xff]  ;;  %v511_v42 = vld [vmem:[%s3573_s30 + $0xbb0] sm:$0xff] }
 0x12e   : > { %2554 = vst [vmem:[%s3585_s17 + $0xb88] sm:$0xff] %v1530_v37  ;;  %2555 = vst [vmem:[%s3585_s17 + $0xb90] sm:$0xff] %v1531_v38  ;;  %v1533_v43 = vmax.f32 %v509_v40, 0.11  ;;  %v1534_v44 = vmax.f32 %v510_v41, 0.11 }
 0x12f   : > { %2556 = vst [vmem:[%s3585_s17 + $0xb98] sm:$0xff] %v1532_v39  ;;  %v1535_v45 = vmax.f32 %v511_v42, 0.11  ;;  %v512_v46 = vld [vmem:[%s3573_s30 + $0xbb8] sm:$0xff]  ;;  %v513_v47 = vld [vmem:[%s3573_s30 + $0xbc0] sm:$0xff]  ;;  %v514_v48 = vld [vmem:[%s3573_s30 + $0xbc8] sm:$0xff] }
 0x130   : > { %2557 = vst [vmem:[%s3585_s17 + $0xba0] sm:$0xff] %v1533_v43  ;;  %2558 = vst [vmem:[%s3585_s17 + $0xba8] sm:$0xff] %v1534_v44  ;;  %v1536_v49 = vmax.f32 %v512_v46, 0.11  ;;  %v1537_v50 = vmax.f32 %v513_v47, 0.11 }
 0x131   : > { %2559 = vst [vmem:[%s3585_s17 + $0xbb0] sm:$0xff] %v1535_v45  ;;  %v1538_v51 = vmax.f32 %v514_v48, 0.11  ;;  %v515_v52 = vld [vmem:[%s3573_s30 + $0xbd0] sm:$0xff]  ;;  %v516_v53 = vld [vmem:[%s3573_s30 + $0xbd8] sm:$0xff]  ;;  %v517_v54 = vld [vmem:[%s3573_s30 + $0xbe0] sm:$0xff] }
 0x132   : > { %2560 = vst [vmem:[%s3585_s17 + $0xbb8] sm:$0xff] %v1536_v49  ;;  %2561 = vst [vmem:[%s3585_s17 + $0xbc0] sm:$0xff] %v1537_v50  ;;  %v1539_v55 = vmax.f32 %v515_v52, 0.11  ;;  %v1540_v56 = vmax.f32 %v516_v53, 0.11 }
 0x133   : > { %2562 = vst [vmem:[%s3585_s17 + $0xbc8] sm:$0xff] %v1538_v51  ;;  %v1541_v57 = vmax.f32 %v517_v54, 0.11  ;;  %v518_v58 = vld [vmem:[%s3573_s30 + $0xbe8] sm:$0xff]  ;;  %v519_v59 = vld [vmem:[%s3573_s30 + $0xbf0] sm:$0xff]  ;;  %v520_v60 = vld [vmem:[%s3573_s30 + $0xbf8] sm:$0xff] }
 0x134   : > { %2563 = vst [vmem:[%s3585_s17 + $0xbd0] sm:$0xff] %v1539_v55  ;;  %2564 = vst [vmem:[%s3585_s17 + $0xbd8] sm:$0xff] %v1540_v56  ;;  %v1542_v61 = vmax.f32 %v518_v58, 0.11  ;;  %v1543_v62 = vmax.f32 %v519_v59, 0.11 }
 0x135   : > { %2565 = vst [vmem:[%s3585_s17 + $0xbe0] sm:$0xff] %v1541_v57  ;;  %v1544_v63 = vmax.f32 %v520_v60, 0.11  ;;  %v521_v0 = vld [vmem:[%s3573_s30 + $0xc00] sm:$0xff]  ;;  %v522_v1 = vld [vmem:[%s3573_s30 + $0xc08] sm:$0xff]  ;;  %v523_v2 = vld [vmem:[%s3573_s30 + $0xc10] sm:$0xff] }
 0x136   : > { %2566 = vst [vmem:[%s3585_s17 + $0xbe8] sm:$0xff] %v1542_v61  ;;  %2567 = vst [vmem:[%s3585_s17 + $0xbf0] sm:$0xff] %v1543_v62  ;;  %v1545_v3 = vmax.f32 %v521_v0, 0.11  ;;  %v1546_v4 = vmax.f32 %v522_v1, 0.11 }
 0x137   : > { %2568 = vst [vmem:[%s3585_s17 + $0xbf8] sm:$0xff] %v1544_v63  ;;  %v1547_v5 = vmax.f32 %v523_v2, 0.11  ;;  %v524_v6 = vld [vmem:[%s3573_s30 + $0xc18] sm:$0xff]  ;;  %v525_v7 = vld [vmem:[%s3573_s30 + $0xc20] sm:$0xff]  ;;  %v526_v8 = vld [vmem:[%s3573_s30 + $0xc28] sm:$0xff] }
 0x138   : > { %2569 = vst [vmem:[%s3585_s17 + $0xc00] sm:$0xff] %v1545_v3  ;;  %2570 = vst [vmem:[%s3585_s17 + $0xc08] sm:$0xff] %v1546_v4  ;;  %v1548_v9 = vmax.f32 %v524_v6, 0.11  ;;  %v1549_v10 = vmax.f32 %v525_v7, 0.11 }
 0x139   : > { %2571 = vst [vmem:[%s3585_s17 + $0xc10] sm:$0xff] %v1547_v5  ;;  %v1550_v11 = vmax.f32 %v526_v8, 0.11  ;;  %v527_v12 = vld [vmem:[%s3573_s30 + $0xc30] sm:$0xff]  ;;  %v528_v13 = vld [vmem:[%s3573_s30 + $0xc38] sm:$0xff]  ;;  %v529_v14 = vld [vmem:[%s3573_s30 + $0xc40] sm:$0xff] }
 0x13a   : > { %2572 = vst [vmem:[%s3585_s17 + $0xc18] sm:$0xff] %v1548_v9  ;;  %2573 = vst [vmem:[%s3585_s17 + $0xc20] sm:$0xff] %v1549_v10  ;;  %v1551_v15 = vmax.f32 %v527_v12, 0.11  ;;  %v1552_v16 = vmax.f32 %v528_v13, 0.11 }
 0x13b   : > { %2574 = vst [vmem:[%s3585_s17 + $0xc28] sm:$0xff] %v1550_v11  ;;  %v1553_v17 = vmax.f32 %v529_v14, 0.11  ;;  %v530_v18 = vld [vmem:[%s3573_s30 + $0xc48] sm:$0xff]  ;;  %v531_v19 = vld [vmem:[%s3573_s30 + $0xc50] sm:$0xff]  ;;  %v532_v20 = vld [vmem:[%s3573_s30 + $0xc58] sm:$0xff] }
 0x13c   : > { %2575 = vst [vmem:[%s3585_s17 + $0xc30] sm:$0xff] %v1551_v15  ;;  %2576 = vst [vmem:[%s3585_s17 + $0xc38] sm:$0xff] %v1552_v16  ;;  %v1554_v21 = vmax.f32 %v530_v18, 0.11  ;;  %v1555_v22 = vmax.f32 %v531_v19, 0.11 }
 0x13d   : > { %2577 = vst [vmem:[%s3585_s17 + $0xc40] sm:$0xff] %v1553_v17  ;;  %v1556_v23 = vmax.f32 %v532_v20, 0.11  ;;  %v533_v24 = vld [vmem:[%s3573_s30 + $0xc60] sm:$0xff]  ;;  %v534_v25 = vld [vmem:[%s3573_s30 + $0xc68] sm:$0xff]  ;;  %v535_v26 = vld [vmem:[%s3573_s30 + $0xc70] sm:$0xff] }
 0x13e   : > { %2578 = vst [vmem:[%s3585_s17 + $0xc48] sm:$0xff] %v1554_v21  ;;  %2579 = vst [vmem:[%s3585_s17 + $0xc50] sm:$0xff] %v1555_v22  ;;  %v1557_v27 = vmax.f32 %v533_v24, 0.11  ;;  %v1558_v28 = vmax.f32 %v534_v25, 0.11 }
 0x13f   : > { %2580 = vst [vmem:[%s3585_s17 + $0xc58] sm:$0xff] %v1556_v23  ;;  %v1559_v29 = vmax.f32 %v535_v26, 0.11  ;;  %v536_v30 = vld [vmem:[%s3573_s30 + $0xc78] sm:$0xff]  ;;  %v537_v31 = vld [vmem:[%s3573_s30 + $0xc80] sm:$0xff]  ;;  %v538_v32 = vld [vmem:[%s3573_s30 + $0xc88] sm:$0xff] }
 0x140   : > { %2581 = vst [vmem:[%s3585_s17 + $0xc60] sm:$0xff] %v1557_v27  ;;  %2582 = vst [vmem:[%s3585_s17 + $0xc68] sm:$0xff] %v1558_v28  ;;  %v1560_v33 = vmax.f32 %v536_v30, 0.11  ;;  %v1561_v34 = vmax.f32 %v537_v31, 0.11 }
 0x141   : > { %2583 = vst [vmem:[%s3585_s17 + $0xc70] sm:$0xff] %v1559_v29  ;;  %v1562_v35 = vmax.f32 %v538_v32, 0.11  ;;  %v539_v36 = vld [vmem:[%s3573_s30 + $0xc90] sm:$0xff]  ;;  %v540_v37 = vld [vmem:[%s3573_s30 + $0xc98] sm:$0xff]  ;;  %v541_v38 = vld [vmem:[%s3573_s30 + $0xca0] sm:$0xff] }
 0x142   : > { %2584 = vst [vmem:[%s3585_s17 + $0xc78] sm:$0xff] %v1560_v33  ;;  %2585 = vst [vmem:[%s3585_s17 + $0xc80] sm:$0xff] %v1561_v34  ;;  %v1563_v39 = vmax.f32 %v539_v36, 0.11  ;;  %v1564_v40 = vmax.f32 %v540_v37, 0.11 }
 0x143   : > { %2586 = vst [vmem:[%s3585_s17 + $0xc88] sm:$0xff] %v1562_v35  ;;  %v1565_v41 = vmax.f32 %v541_v38, 0.11  ;;  %v542_v42 = vld [vmem:[%s3573_s30 + $0xca8] sm:$0xff]  ;;  %v543_v43 = vld [vmem:[%s3573_s30 + $0xcb0] sm:$0xff]  ;;  %v544_v44 = vld [vmem:[%s3573_s30 + $0xcb8] sm:$0xff] }
 0x144   : > { %2587 = vst [vmem:[%s3585_s17 + $0xc90] sm:$0xff] %v1563_v39  ;;  %2588 = vst [vmem:[%s3585_s17 + $0xc98] sm:$0xff] %v1564_v40  ;;  %v1566_v45 = vmax.f32 %v542_v42, 0.11  ;;  %v1567_v46 = vmax.f32 %v543_v43, 0.11 }
 0x145   : > { %2589 = vst [vmem:[%s3585_s17 + $0xca0] sm:$0xff] %v1565_v41  ;;  %v1568_v47 = vmax.f32 %v544_v44, 0.11  ;;  %v545_v48 = vld [vmem:[%s3573_s30 + $0xcc0] sm:$0xff]  ;;  %v546_v49 = vld [vmem:[%s3573_s30 + $0xcc8] sm:$0xff]  ;;  %v547_v50 = vld [vmem:[%s3573_s30 + $0xcd0] sm:$0xff] }
 0x146   : > { %2590 = vst [vmem:[%s3585_s17 + $0xca8] sm:$0xff] %v1566_v45  ;;  %2591 = vst [vmem:[%s3585_s17 + $0xcb0] sm:$0xff] %v1567_v46  ;;  %v1569_v51 = vmax.f32 %v545_v48, 0.11  ;;  %v1570_v52 = vmax.f32 %v546_v49, 0.11 }
 0x147   : > { %2592 = vst [vmem:[%s3585_s17 + $0xcb8] sm:$0xff] %v1568_v47  ;;  %v1571_v53 = vmax.f32 %v547_v50, 0.11  ;;  %v548_v54 = vld [vmem:[%s3573_s30 + $0xcd8] sm:$0xff]  ;;  %v549_v55 = vld [vmem:[%s3573_s30 + $0xce0] sm:$0xff]  ;;  %v550_v56 = vld [vmem:[%s3573_s30 + $0xce8] sm:$0xff] }
 0x148   : > { %2593 = vst [vmem:[%s3585_s17 + $0xcc0] sm:$0xff] %v1569_v51  ;;  %2594 = vst [vmem:[%s3585_s17 + $0xcc8] sm:$0xff] %v1570_v52  ;;  %v1572_v57 = vmax.f32 %v548_v54, 0.11  ;;  %v1573_v58 = vmax.f32 %v549_v55, 0.11 }
 0x149   : > { %2595 = vst [vmem:[%s3585_s17 + $0xcd0] sm:$0xff] %v1571_v53  ;;  %v1574_v59 = vmax.f32 %v550_v56, 0.11  ;;  %v551_v60 = vld [vmem:[%s3573_s30 + $0xcf0] sm:$0xff]  ;;  %v552_v61 = vld [vmem:[%s3573_s30 + $0xcf8] sm:$0xff]  ;;  %v553_v62 = vld [vmem:[%s3573_s30 + $0xd00] sm:$0xff] }
 0x14a   : > { %2596 = vst [vmem:[%s3585_s17 + $0xcd8] sm:$0xff] %v1572_v57  ;;  %2597 = vst [vmem:[%s3585_s17 + $0xce0] sm:$0xff] %v1573_v58  ;;  %v1575_v63 = vmax.f32 %v551_v60, 0.11  ;;  %v1576_v0 = vmax.f32 %v552_v61, 0.11 }
 0x14b   : > { %2598 = vst [vmem:[%s3585_s17 + $0xce8] sm:$0xff] %v1574_v59  ;;  %v1577_v1 = vmax.f32 %v553_v62, 0.11  ;;  %v554_v2 = vld [vmem:[%s3573_s30 + $0xd08] sm:$0xff]  ;;  %v555_v3 = vld [vmem:[%s3573_s30 + $0xd10] sm:$0xff]  ;;  %v556_v4 = vld [vmem:[%s3573_s30 + $0xd18] sm:$0xff] }
 0x14c   : > { %2599 = vst [vmem:[%s3585_s17 + $0xcf0] sm:$0xff] %v1575_v63  ;;  %2600 = vst [vmem:[%s3585_s17 + $0xcf8] sm:$0xff] %v1576_v0  ;;  %v1578_v5 = vmax.f32 %v554_v2, 0.11  ;;  %v1579_v6 = vmax.f32 %v555_v3, 0.11 }
 0x14d   : > { %2601 = vst [vmem:[%s3585_s17 + $0xd00] sm:$0xff] %v1577_v1  ;;  %v1580_v7 = vmax.f32 %v556_v4, 0.11  ;;  %v557_v8 = vld [vmem:[%s3573_s30 + $0xd20] sm:$0xff]  ;;  %v558_v9 = vld [vmem:[%s3573_s30 + $0xd28] sm:$0xff]  ;;  %v559_v10 = vld [vmem:[%s3573_s30 + $0xd30] sm:$0xff] }
 0x14e   : > { %2602 = vst [vmem:[%s3585_s17 + $0xd08] sm:$0xff] %v1578_v5  ;;  %2603 = vst [vmem:[%s3585_s17 + $0xd10] sm:$0xff] %v1579_v6  ;;  %v1581_v11 = vmax.f32 %v557_v8, 0.11  ;;  %v1582_v12 = vmax.f32 %v558_v9, 0.11 }
 0x14f   : > { %2604 = vst [vmem:[%s3585_s17 + $0xd18] sm:$0xff] %v1580_v7  ;;  %v1583_v13 = vmax.f32 %v559_v10, 0.11  ;;  %v560_v14 = vld [vmem:[%s3573_s30 + $0xd38] sm:$0xff]  ;;  %v561_v15 = vld [vmem:[%s3573_s30 + $0xd40] sm:$0xff]  ;;  %v562_v16 = vld [vmem:[%s3573_s30 + $0xd48] sm:$0xff] }
 0x150   : > { %2605 = vst [vmem:[%s3585_s17 + $0xd20] sm:$0xff] %v1581_v11  ;;  %2606 = vst [vmem:[%s3585_s17 + $0xd28] sm:$0xff] %v1582_v12  ;;  %v1584_v17 = vmax.f32 %v560_v14, 0.11  ;;  %v1585_v18 = vmax.f32 %v561_v15, 0.11 }
 0x151   : > { %2607 = vst [vmem:[%s3585_s17 + $0xd30] sm:$0xff] %v1583_v13  ;;  %v1586_v19 = vmax.f32 %v562_v16, 0.11  ;;  %v563_v20 = vld [vmem:[%s3573_s30 + $0xd50] sm:$0xff]  ;;  %v564_v21 = vld [vmem:[%s3573_s30 + $0xd58] sm:$0xff]  ;;  %v565_v22 = vld [vmem:[%s3573_s30 + $0xd60] sm:$0xff] }
 0x152   : > { %2608 = vst [vmem:[%s3585_s17 + $0xd38] sm:$0xff] %v1584_v17  ;;  %2609 = vst [vmem:[%s3585_s17 + $0xd40] sm:$0xff] %v1585_v18  ;;  %v1587_v23 = vmax.f32 %v563_v20, 0.11  ;;  %v1588_v24 = vmax.f32 %v564_v21, 0.11 }
 0x153   : > { %2610 = vst [vmem:[%s3585_s17 + $0xd48] sm:$0xff] %v1586_v19  ;;  %v1589_v25 = vmax.f32 %v565_v22, 0.11  ;;  %v566_v26 = vld [vmem:[%s3573_s30 + $0xd68] sm:$0xff]  ;;  %v567_v27 = vld [vmem:[%s3573_s30 + $0xd70] sm:$0xff]  ;;  %v568_v28 = vld [vmem:[%s3573_s30 + $0xd78] sm:$0xff] }
 0x154   : > { %2611 = vst [vmem:[%s3585_s17 + $0xd50] sm:$0xff] %v1587_v23  ;;  %2612 = vst [vmem:[%s3585_s17 + $0xd58] sm:$0xff] %v1588_v24  ;;  %v1590_v29 = vmax.f32 %v566_v26, 0.11  ;;  %v1591_v30 = vmax.f32 %v567_v27, 0.11 }
 0x155   : > { %2613 = vst [vmem:[%s3585_s17 + $0xd60] sm:$0xff] %v1589_v25  ;;  %v1592_v31 = vmax.f32 %v568_v28, 0.11  ;;  %v569_v32 = vld [vmem:[%s3573_s30 + $0xd80] sm:$0xff]  ;;  %v570_v33 = vld [vmem:[%s3573_s30 + $0xd88] sm:$0xff]  ;;  %v571_v34 = vld [vmem:[%s3573_s30 + $0xd90] sm:$0xff] }
 0x156   : > { %2614 = vst [vmem:[%s3585_s17 + $0xd68] sm:$0xff] %v1590_v29  ;;  %2615 = vst [vmem:[%s3585_s17 + $0xd70] sm:$0xff] %v1591_v30  ;;  %v1593_v35 = vmax.f32 %v569_v32, 0.11  ;;  %v1594_v36 = vmax.f32 %v570_v33, 0.11 }
 0x157   : > { %2616 = vst [vmem:[%s3585_s17 + $0xd78] sm:$0xff] %v1592_v31  ;;  %v1595_v37 = vmax.f32 %v571_v34, 0.11  ;;  %v572_v38 = vld [vmem:[%s3573_s30 + $0xd98] sm:$0xff]  ;;  %v573_v39 = vld [vmem:[%s3573_s30 + $0xda0] sm:$0xff]  ;;  %v574_v40 = vld [vmem:[%s3573_s30 + $0xda8] sm:$0xff] }
 0x158   : > { %2617 = vst [vmem:[%s3585_s17 + $0xd80] sm:$0xff] %v1593_v35  ;;  %2618 = vst [vmem:[%s3585_s17 + $0xd88] sm:$0xff] %v1594_v36  ;;  %v1596_v41 = vmax.f32 %v572_v38, 0.11  ;;  %v1597_v42 = vmax.f32 %v573_v39, 0.11 }
 0x159   : > { %2619 = vst [vmem:[%s3585_s17 + $0xd90] sm:$0xff] %v1595_v37  ;;  %v1598_v43 = vmax.f32 %v574_v40, 0.11  ;;  %v575_v44 = vld [vmem:[%s3573_s30 + $0xdb0] sm:$0xff]  ;;  %v576_v45 = vld [vmem:[%s3573_s30 + $0xdb8] sm:$0xff]  ;;  %v577_v46 = vld [vmem:[%s3573_s30 + $0xdc0] sm:$0xff] }
 0x15a   : > { %2620 = vst [vmem:[%s3585_s17 + $0xd98] sm:$0xff] %v1596_v41  ;;  %2621 = vst [vmem:[%s3585_s17 + $0xda0] sm:$0xff] %v1597_v42  ;;  %v1599_v47 = vmax.f32 %v575_v44, 0.11  ;;  %v1600_v48 = vmax.f32 %v576_v45, 0.11 }
 0x15b   : > { %2622 = vst [vmem:[%s3585_s17 + $0xda8] sm:$0xff] %v1598_v43  ;;  %v1601_v49 = vmax.f32 %v577_v46, 0.11  ;;  %v578_v50 = vld [vmem:[%s3573_s30 + $0xdc8] sm:$0xff]  ;;  %v579_v51 = vld [vmem:[%s3573_s30 + $0xdd0] sm:$0xff]  ;;  %v580_v52 = vld [vmem:[%s3573_s30 + $0xdd8] sm:$0xff] }
 0x15c   : > { %2623 = vst [vmem:[%s3585_s17 + $0xdb0] sm:$0xff] %v1599_v47  ;;  %2624 = vst [vmem:[%s3585_s17 + $0xdb8] sm:$0xff] %v1600_v48  ;;  %v1602_v53 = vmax.f32 %v578_v50, 0.11  ;;  %v1603_v54 = vmax.f32 %v579_v51, 0.11 }
 0x15d   : > { %2625 = vst [vmem:[%s3585_s17 + $0xdc0] sm:$0xff] %v1601_v49  ;;  %v1604_v55 = vmax.f32 %v580_v52, 0.11  ;;  %v581_v56 = vld [vmem:[%s3573_s30 + $0xde0] sm:$0xff]  ;;  %v582_v57 = vld [vmem:[%s3573_s30 + $0xde8] sm:$0xff]  ;;  %v583_v58 = vld [vmem:[%s3573_s30 + $0xdf0] sm:$0xff] }
 0x15e   : > { %2626 = vst [vmem:[%s3585_s17 + $0xdc8] sm:$0xff] %v1602_v53  ;;  %2627 = vst [vmem:[%s3585_s17 + $0xdd0] sm:$0xff] %v1603_v54  ;;  %v1605_v59 = vmax.f32 %v581_v56, 0.11  ;;  %v1606_v60 = vmax.f32 %v582_v57, 0.11 }
 0x15f   : > { %2628 = vst [vmem:[%s3585_s17 + $0xdd8] sm:$0xff] %v1604_v55  ;;  %v1607_v61 = vmax.f32 %v583_v58, 0.11  ;;  %v584_v62 = vld [vmem:[%s3573_s30 + $0xdf8] sm:$0xff]  ;;  %v585_v63 = vld [vmem:[%s3573_s30 + $0xe00] sm:$0xff]  ;;  %v586_v0 = vld [vmem:[%s3573_s30 + $0xe08] sm:$0xff] }
 0x160   : > { %2629 = vst [vmem:[%s3585_s17 + $0xde0] sm:$0xff] %v1605_v59  ;;  %2630 = vst [vmem:[%s3585_s17 + $0xde8] sm:$0xff] %v1606_v60  ;;  %v1608_v1 = vmax.f32 %v584_v62, 0.11  ;;  %v1609_v2 = vmax.f32 %v585_v63, 0.11 }
 0x161   : > { %2631 = vst [vmem:[%s3585_s17 + $0xdf0] sm:$0xff] %v1607_v61  ;;  %v1610_v3 = vmax.f32 %v586_v0, 0.11  ;;  %v587_v4 = vld [vmem:[%s3573_s30 + $0xe10] sm:$0xff]  ;;  %v588_v5 = vld [vmem:[%s3573_s30 + $0xe18] sm:$0xff]  ;;  %v589_v6 = vld [vmem:[%s3573_s30 + $0xe20] sm:$0xff] }
 0x162   : > { %2632 = vst [vmem:[%s3585_s17 + $0xdf8] sm:$0xff] %v1608_v1  ;;  %2633 = vst [vmem:[%s3585_s17 + $0xe00] sm:$0xff] %v1609_v2  ;;  %v1611_v7 = vmax.f32 %v587_v4, 0.11  ;;  %v1612_v8 = vmax.f32 %v588_v5, 0.11 }
 0x163   : > { %2634 = vst [vmem:[%s3585_s17 + $0xe08] sm:$0xff] %v1610_v3  ;;  %v1613_v9 = vmax.f32 %v589_v6, 0.11  ;;  %v590_v10 = vld [vmem:[%s3573_s30 + $0xe28] sm:$0xff]  ;;  %v591_v11 = vld [vmem:[%s3573_s30 + $0xe30] sm:$0xff]  ;;  %v592_v12 = vld [vmem:[%s3573_s30 + $0xe38] sm:$0xff] }
 0x164   : > { %2635 = vst [vmem:[%s3585_s17 + $0xe10] sm:$0xff] %v1611_v7  ;;  %2636 = vst [vmem:[%s3585_s17 + $0xe18] sm:$0xff] %v1612_v8  ;;  %v1614_v13 = vmax.f32 %v590_v10, 0.11  ;;  %v1615_v14 = vmax.f32 %v591_v11, 0.11 }
 0x165   : > { %2637 = vst [vmem:[%s3585_s17 + $0xe20] sm:$0xff] %v1613_v9  ;;  %v1616_v15 = vmax.f32 %v592_v12, 0.11  ;;  %v593_v16 = vld [vmem:[%s3573_s30 + $0xe40] sm:$0xff]  ;;  %v594_v17 = vld [vmem:[%s3573_s30 + $0xe48] sm:$0xff]  ;;  %v595_v18 = vld [vmem:[%s3573_s30 + $0xe50] sm:$0xff] }
 0x166   : > { %2638 = vst [vmem:[%s3585_s17 + $0xe28] sm:$0xff] %v1614_v13  ;;  %2639 = vst [vmem:[%s3585_s17 + $0xe30] sm:$0xff] %v1615_v14  ;;  %v1617_v19 = vmax.f32 %v593_v16, 0.11  ;;  %v1618_v20 = vmax.f32 %v594_v17, 0.11 }
 0x167   : > { %2640 = vst [vmem:[%s3585_s17 + $0xe38] sm:$0xff] %v1616_v15  ;;  %v1619_v21 = vmax.f32 %v595_v18, 0.11  ;;  %v596_v22 = vld [vmem:[%s3573_s30 + $0xe58] sm:$0xff]  ;;  %v597_v23 = vld [vmem:[%s3573_s30 + $0xe60] sm:$0xff]  ;;  %v598_v24 = vld [vmem:[%s3573_s30 + $0xe68] sm:$0xff] }
 0x168   : > { %2641 = vst [vmem:[%s3585_s17 + $0xe40] sm:$0xff] %v1617_v19  ;;  %2642 = vst [vmem:[%s3585_s17 + $0xe48] sm:$0xff] %v1618_v20  ;;  %v1620_v25 = vmax.f32 %v596_v22, 0.11  ;;  %v1621_v26 = vmax.f32 %v597_v23, 0.11 }
 0x169   : > { %2643 = vst [vmem:[%s3585_s17 + $0xe50] sm:$0xff] %v1619_v21  ;;  %v1622_v27 = vmax.f32 %v598_v24, 0.11  ;;  %v599_v28 = vld [vmem:[%s3573_s30 + $0xe70] sm:$0xff]  ;;  %v600_v29 = vld [vmem:[%s3573_s30 + $0xe78] sm:$0xff]  ;;  %v601_v30 = vld [vmem:[%s3573_s30 + $0xe80] sm:$0xff] }
 0x16a   : > { %2644 = vst [vmem:[%s3585_s17 + $0xe58] sm:$0xff] %v1620_v25  ;;  %2645 = vst [vmem:[%s3585_s17 + $0xe60] sm:$0xff] %v1621_v26  ;;  %v1623_v31 = vmax.f32 %v599_v28, 0.11  ;;  %v1624_v32 = vmax.f32 %v600_v29, 0.11 }
 0x16b   : > { %2646 = vst [vmem:[%s3585_s17 + $0xe68] sm:$0xff] %v1622_v27  ;;  %v1625_v33 = vmax.f32 %v601_v30, 0.11  ;;  %v602_v34 = vld [vmem:[%s3573_s30 + $0xe88] sm:$0xff]  ;;  %v603_v35 = vld [vmem:[%s3573_s30 + $0xe90] sm:$0xff]  ;;  %v604_v36 = vld [vmem:[%s3573_s30 + $0xe98] sm:$0xff] }
 0x16c   : > { %2647 = vst [vmem:[%s3585_s17 + $0xe70] sm:$0xff] %v1623_v31  ;;  %2648 = vst [vmem:[%s3585_s17 + $0xe78] sm:$0xff] %v1624_v32  ;;  %v1626_v37 = vmax.f32 %v602_v34, 0.11  ;;  %v1627_v38 = vmax.f32 %v603_v35, 0.11 }
 0x16d   : > { %2649 = vst [vmem:[%s3585_s17 + $0xe80] sm:$0xff] %v1625_v33  ;;  %v1628_v39 = vmax.f32 %v604_v36, 0.11  ;;  %v605_v40 = vld [vmem:[%s3573_s30 + $0xea0] sm:$0xff]  ;;  %v606_v41 = vld [vmem:[%s3573_s30 + $0xea8] sm:$0xff]  ;;  %v607_v42 = vld [vmem:[%s3573_s30 + $0xeb0] sm:$0xff] }
 0x16e   : > { %2650 = vst [vmem:[%s3585_s17 + $0xe88] sm:$0xff] %v1626_v37  ;;  %2651 = vst [vmem:[%s3585_s17 + $0xe90] sm:$0xff] %v1627_v38  ;;  %v1629_v43 = vmax.f32 %v605_v40, 0.11  ;;  %v1630_v44 = vmax.f32 %v606_v41, 0.11 }
 0x16f   : > { %2652 = vst [vmem:[%s3585_s17 + $0xe98] sm:$0xff] %v1628_v39  ;;  %v1631_v45 = vmax.f32 %v607_v42, 0.11  ;;  %v608_v46 = vld [vmem:[%s3573_s30 + $0xeb8] sm:$0xff]  ;;  %v609_v47 = vld [vmem:[%s3573_s30 + $0xec0] sm:$0xff]  ;;  %v610_v48 = vld [vmem:[%s3573_s30 + $0xec8] sm:$0xff] }
 0x170   : > { %2653 = vst [vmem:[%s3585_s17 + $0xea0] sm:$0xff] %v1629_v43  ;;  %2654 = vst [vmem:[%s3585_s17 + $0xea8] sm:$0xff] %v1630_v44  ;;  %v1632_v49 = vmax.f32 %v608_v46, 0.11  ;;  %v1633_v50 = vmax.f32 %v609_v47, 0.11 }
 0x171   : > { %2655 = vst [vmem:[%s3585_s17 + $0xeb0] sm:$0xff] %v1631_v45  ;;  %v1634_v51 = vmax.f32 %v610_v48, 0.11  ;;  %v611_v52 = vld [vmem:[%s3573_s30 + $0xed0] sm:$0xff]  ;;  %v612_v53 = vld [vmem:[%s3573_s30 + $0xed8] sm:$0xff]  ;;  %v613_v54 = vld [vmem:[%s3573_s30 + $0xee0] sm:$0xff] }
 0x172   : > { %2656 = vst [vmem:[%s3585_s17 + $0xeb8] sm:$0xff] %v1632_v49  ;;  %2657 = vst [vmem:[%s3585_s17 + $0xec0] sm:$0xff] %v1633_v50  ;;  %v1635_v55 = vmax.f32 %v611_v52, 0.11  ;;  %v1636_v56 = vmax.f32 %v612_v53, 0.11 }
 0x173   : > { %2658 = vst [vmem:[%s3585_s17 + $0xec8] sm:$0xff] %v1634_v51  ;;  %v1637_v57 = vmax.f32 %v613_v54, 0.11  ;;  %v614_v58 = vld [vmem:[%s3573_s30 + $0xee8] sm:$0xff]  ;;  %v615_v59 = vld [vmem:[%s3573_s30 + $0xef0] sm:$0xff]  ;;  %v616_v60 = vld [vmem:[%s3573_s30 + $0xef8] sm:$0xff] }
 0x174   : > { %2659 = vst [vmem:[%s3585_s17 + $0xed0] sm:$0xff] %v1635_v55  ;;  %2660 = vst [vmem:[%s3585_s17 + $0xed8] sm:$0xff] %v1636_v56  ;;  %v1638_v61 = vmax.f32 %v614_v58, 0.11  ;;  %v1639_v62 = vmax.f32 %v615_v59, 0.11 }
 0x175   : > { %2661 = vst [vmem:[%s3585_s17 + $0xee0] sm:$0xff] %v1637_v57  ;;  %v1640_v63 = vmax.f32 %v616_v60, 0.11  ;;  %v617_v0 = vld [vmem:[%s3573_s30 + $0xf00] sm:$0xff]  ;;  %v618_v1 = vld [vmem:[%s3573_s30 + $0xf08] sm:$0xff]  ;;  %v619_v2 = vld [vmem:[%s3573_s30 + $0xf10] sm:$0xff] }
 0x176   : > { %2662 = vst [vmem:[%s3585_s17 + $0xee8] sm:$0xff] %v1638_v61  ;;  %2663 = vst [vmem:[%s3585_s17 + $0xef0] sm:$0xff] %v1639_v62  ;;  %v1641_v3 = vmax.f32 %v617_v0, 0.11  ;;  %v1642_v4 = vmax.f32 %v618_v1, 0.11 }
 0x177   : > { %2664 = vst [vmem:[%s3585_s17 + $0xef8] sm:$0xff] %v1640_v63  ;;  %v1643_v5 = vmax.f32 %v619_v2, 0.11  ;;  %v620_v6 = vld [vmem:[%s3573_s30 + $0xf18] sm:$0xff]  ;;  %v621_v7 = vld [vmem:[%s3573_s30 + $0xf20] sm:$0xff]  ;;  %v622_v8 = vld [vmem:[%s3573_s30 + $0xf28] sm:$0xff] }
 0x178   : > { %2665 = vst [vmem:[%s3585_s17 + $0xf00] sm:$0xff] %v1641_v3  ;;  %2666 = vst [vmem:[%s3585_s17 + $0xf08] sm:$0xff] %v1642_v4  ;;  %v1644_v9 = vmax.f32 %v620_v6, 0.11  ;;  %v1645_v10 = vmax.f32 %v621_v7, 0.11 }
 0x179   : > { %2667 = vst [vmem:[%s3585_s17 + $0xf10] sm:$0xff] %v1643_v5  ;;  %v1646_v11 = vmax.f32 %v622_v8, 0.11  ;;  %v623_v12 = vld [vmem:[%s3573_s30 + $0xf30] sm:$0xff]  ;;  %v624_v13 = vld [vmem:[%s3573_s30 + $0xf38] sm:$0xff]  ;;  %v625_v14 = vld [vmem:[%s3573_s30 + $0xf40] sm:$0xff] }
 0x17a   : > { %2668 = vst [vmem:[%s3585_s17 + $0xf18] sm:$0xff] %v1644_v9  ;;  %2669 = vst [vmem:[%s3585_s17 + $0xf20] sm:$0xff] %v1645_v10  ;;  %v1647_v15 = vmax.f32 %v623_v12, 0.11  ;;  %v1648_v16 = vmax.f32 %v624_v13, 0.11 }
 0x17b   : > { %2670 = vst [vmem:[%s3585_s17 + $0xf28] sm:$0xff] %v1646_v11  ;;  %v1649_v17 = vmax.f32 %v625_v14, 0.11  ;;  %v626_v18 = vld [vmem:[%s3573_s30 + $0xf48] sm:$0xff]  ;;  %v627_v19 = vld [vmem:[%s3573_s30 + $0xf50] sm:$0xff]  ;;  %v628_v20 = vld [vmem:[%s3573_s30 + $0xf58] sm:$0xff] }
 0x17c   : > { %2671 = vst [vmem:[%s3585_s17 + $0xf30] sm:$0xff] %v1647_v15  ;;  %2672 = vst [vmem:[%s3585_s17 + $0xf38] sm:$0xff] %v1648_v16  ;;  %v1650_v21 = vmax.f32 %v626_v18, 0.11  ;;  %v1651_v22 = vmax.f32 %v627_v19, 0.11 }
 0x17d   : > { %2673 = vst [vmem:[%s3585_s17 + $0xf40] sm:$0xff] %v1649_v17  ;;  %v1652_v23 = vmax.f32 %v628_v20, 0.11  ;;  %v629_v24 = vld [vmem:[%s3573_s30 + $0xf60] sm:$0xff]  ;;  %v630_v25 = vld [vmem:[%s3573_s30 + $0xf68] sm:$0xff]  ;;  %v631_v26 = vld [vmem:[%s3573_s30 + $0xf70] sm:$0xff] }
 0x17e   : > { %2674 = vst [vmem:[%s3585_s17 + $0xf48] sm:$0xff] %v1650_v21  ;;  %2675 = vst [vmem:[%s3585_s17 + $0xf50] sm:$0xff] %v1651_v22  ;;  %v1653_v27 = vmax.f32 %v629_v24, 0.11  ;;  %v1654_v28 = vmax.f32 %v630_v25, 0.11 }
 0x17f   : > { %2676 = vst [vmem:[%s3585_s17 + $0xf58] sm:$0xff] %v1652_v23  ;;  %v1655_v29 = vmax.f32 %v631_v26, 0.11  ;;  %v632_v30 = vld [vmem:[%s3573_s30 + $0xf78] sm:$0xff]  ;;  %v633_v31 = vld [vmem:[%s3573_s30 + $0xf80] sm:$0xff]  ;;  %v634_v32 = vld [vmem:[%s3573_s30 + $0xf88] sm:$0xff] }
 0x180   : > { %2677 = vst [vmem:[%s3585_s17 + $0xf60] sm:$0xff] %v1653_v27  ;;  %2678 = vst [vmem:[%s3585_s17 + $0xf68] sm:$0xff] %v1654_v28  ;;  %v1656_v33 = vmax.f32 %v632_v30, 0.11  ;;  %v1657_v34 = vmax.f32 %v633_v31, 0.11 }
 0x181   : > { %2679 = vst [vmem:[%s3585_s17 + $0xf70] sm:$0xff] %v1655_v29  ;;  %v1658_v35 = vmax.f32 %v634_v32, 0.11  ;;  %v635_v36 = vld [vmem:[%s3573_s30 + $0xf90] sm:$0xff]  ;;  %v636_v37 = vld [vmem:[%s3573_s30 + $0xf98] sm:$0xff]  ;;  %v637_v38 = vld [vmem:[%s3573_s30 + $0xfa0] sm:$0xff] }
 0x182   : > { %2680 = vst [vmem:[%s3585_s17 + $0xf78] sm:$0xff] %v1656_v33  ;;  %2681 = vst [vmem:[%s3585_s17 + $0xf80] sm:$0xff] %v1657_v34  ;;  %v1659_v39 = vmax.f32 %v635_v36, 0.11  ;;  %v1660_v40 = vmax.f32 %v636_v37, 0.11 }
 0x183   : > { %2682 = vst [vmem:[%s3585_s17 + $0xf88] sm:$0xff] %v1658_v35  ;;  %v1661_v41 = vmax.f32 %v637_v38, 0.11  ;;  %v638_v42 = vld [vmem:[%s3573_s30 + $0xfa8] sm:$0xff]  ;;  %v639_v43 = vld [vmem:[%s3573_s30 + $0xfb0] sm:$0xff]  ;;  %v640_v44 = vld [vmem:[%s3573_s30 + $0xfb8] sm:$0xff] }
 0x184   : > { %2683 = vst [vmem:[%s3585_s17 + $0xf90] sm:$0xff] %v1659_v39  ;;  %2684 = vst [vmem:[%s3585_s17 + $0xf98] sm:$0xff] %v1660_v40  ;;  %v1662_v45 = vmax.f32 %v638_v42, 0.11  ;;  %v1663_v46 = vmax.f32 %v639_v43, 0.11 }
 0x185   : > { %2685 = vst [vmem:[%s3585_s17 + $0xfa0] sm:$0xff] %v1661_v41  ;;  %v1664_v47 = vmax.f32 %v640_v44, 0.11  ;;  %v641_v48 = vld [vmem:[%s3573_s30 + $0xfc0] sm:$0xff]  ;;  %v642_v49 = vld [vmem:[%s3573_s30 + $0xfc8] sm:$0xff]  ;;  %v643_v50 = vld [vmem:[%s3573_s30 + $0xfd0] sm:$0xff] }
 0x186   : > { %2686 = vst [vmem:[%s3585_s17 + $0xfa8] sm:$0xff] %v1662_v45  ;;  %2687 = vst [vmem:[%s3585_s17 + $0xfb0] sm:$0xff] %v1663_v46  ;;  %v1665_v51 = vmax.f32 %v641_v48, 0.11  ;;  %v1666_v52 = vmax.f32 %v642_v49, 0.11 }
 0x187   : > { %2688 = vst [vmem:[%s3585_s17 + $0xfb8] sm:$0xff] %v1664_v47  ;;  %v1667_v53 = vmax.f32 %v643_v50, 0.11  ;;  %v644_v54 = vld [vmem:[%s3573_s30 + $0xfd8] sm:$0xff]  ;;  %v645_v55 = vld [vmem:[%s3573_s30 + $0xfe0] sm:$0xff]  ;;  %v646_v56 = vld [vmem:[%s3573_s30 + $0xfe8] sm:$0xff] }
 0x188   : > { %2689 = vst [vmem:[%s3585_s17 + $0xfc0] sm:$0xff] %v1665_v51  ;;  %2690 = vst [vmem:[%s3585_s17 + $0xfc8] sm:$0xff] %v1666_v52  ;;  %v1668_v57 = vmax.f32 %v644_v54, 0.11  ;;  %v1669_v58 = vmax.f32 %v645_v55, 0.11 }
 0x189   : > { %2691 = vst [vmem:[%s3585_s17 + $0xfd0] sm:$0xff] %v1667_v53  ;;  %v1670_v59 = vmax.f32 %v646_v56, 0.11  ;;  %v647_v60 = vld [vmem:[%s3573_s30 + $0xff0] sm:$0xff]  ;;  %v648_v61 = vld [vmem:[%s3573_s30 + $0xff8] sm:$0xff]  ;;  %v649_v62 = vld [vmem:[%s3573_s30 + $0x1000] sm:$0xff] }
 0x18a   : > { %2692 = vst [vmem:[%s3585_s17 + $0xfd8] sm:$0xff] %v1668_v57  ;;  %2693 = vst [vmem:[%s3585_s17 + $0xfe0] sm:$0xff] %v1669_v58  ;;  %v1671_v63 = vmax.f32 %v647_v60, 0.11  ;;  %v1672_v0 = vmax.f32 %v648_v61, 0.11 }
 0x18b   : > { %2694 = vst [vmem:[%s3585_s17 + $0xfe8] sm:$0xff] %v1670_v59  ;;  %v1673_v1 = vmax.f32 %v649_v62, 0.11  ;;  %v650_v2 = vld [vmem:[%s3573_s30 + $0x1008] sm:$0xff]  ;;  %v651_v3 = vld [vmem:[%s3573_s30 + $0x1010] sm:$0xff]  ;;  %v652_v4 = vld [vmem:[%s3573_s30 + $0x1018] sm:$0xff] }
 0x18c   : > { %2695 = vst [vmem:[%s3585_s17 + $0xff0] sm:$0xff] %v1671_v63  ;;  %2696 = vst [vmem:[%s3585_s17 + $0xff8] sm:$0xff] %v1672_v0  ;;  %v1674_v5 = vmax.f32 %v650_v2, 0.11  ;;  %v1675_v6 = vmax.f32 %v651_v3, 0.11 }
 0x18d   : > { %2697 = vst [vmem:[%s3585_s17 + $0x1000] sm:$0xff] %v1673_v1  ;;  %v1676_v7 = vmax.f32 %v652_v4, 0.11  ;;  %v653_v8 = vld [vmem:[%s3573_s30 + $0x1020] sm:$0xff]  ;;  %v654_v9 = vld [vmem:[%s3573_s30 + $0x1028] sm:$0xff]  ;;  %v655_v10 = vld [vmem:[%s3573_s30 + $0x1030] sm:$0xff] }
 0x18e   : > { %2698 = vst [vmem:[%s3585_s17 + $0x1008] sm:$0xff] %v1674_v5  ;;  %2699 = vst [vmem:[%s3585_s17 + $0x1010] sm:$0xff] %v1675_v6  ;;  %v1677_v11 = vmax.f32 %v653_v8, 0.11  ;;  %v1678_v12 = vmax.f32 %v654_v9, 0.11 }
 0x18f   : > { %2700 = vst [vmem:[%s3585_s17 + $0x1018] sm:$0xff] %v1676_v7  ;;  %v1679_v13 = vmax.f32 %v655_v10, 0.11  ;;  %v656_v14 = vld [vmem:[%s3573_s30 + $0x1038] sm:$0xff]  ;;  %v657_v15 = vld [vmem:[%s3573_s30 + $0x1040] sm:$0xff]  ;;  %v658_v16 = vld [vmem:[%s3573_s30 + $0x1048] sm:$0xff] }
 0x190   : > { %2701 = vst [vmem:[%s3585_s17 + $0x1020] sm:$0xff] %v1677_v11  ;;  %2702 = vst [vmem:[%s3585_s17 + $0x1028] sm:$0xff] %v1678_v12  ;;  %v1680_v17 = vmax.f32 %v656_v14, 0.11  ;;  %v1681_v18 = vmax.f32 %v657_v15, 0.11 }
 0x191   : > { %2703 = vst [vmem:[%s3585_s17 + $0x1030] sm:$0xff] %v1679_v13  ;;  %v1682_v19 = vmax.f32 %v658_v16, 0.11  ;;  %v659_v20 = vld [vmem:[%s3573_s30 + $0x1050] sm:$0xff]  ;;  %v660_v21 = vld [vmem:[%s3573_s30 + $0x1058] sm:$0xff]  ;;  %v661_v22 = vld [vmem:[%s3573_s30 + $0x1060] sm:$0xff] }
 0x192   : > { %2704 = vst [vmem:[%s3585_s17 + $0x1038] sm:$0xff] %v1680_v17  ;;  %2705 = vst [vmem:[%s3585_s17 + $0x1040] sm:$0xff] %v1681_v18  ;;  %v1683_v23 = vmax.f32 %v659_v20, 0.11  ;;  %v1684_v24 = vmax.f32 %v660_v21, 0.11 }
 0x193   : > { %2706 = vst [vmem:[%s3585_s17 + $0x1048] sm:$0xff] %v1682_v19  ;;  %v1685_v25 = vmax.f32 %v661_v22, 0.11  ;;  %v662_v26 = vld [vmem:[%s3573_s30 + $0x1068] sm:$0xff]  ;;  %v663_v27 = vld [vmem:[%s3573_s30 + $0x1070] sm:$0xff]  ;;  %v664_v28 = vld [vmem:[%s3573_s30 + $0x1078] sm:$0xff] }
 0x194   : > { %2707 = vst [vmem:[%s3585_s17 + $0x1050] sm:$0xff] %v1683_v23  ;;  %2708 = vst [vmem:[%s3585_s17 + $0x1058] sm:$0xff] %v1684_v24  ;;  %v1686_v29 = vmax.f32 %v662_v26, 0.11  ;;  %v1687_v30 = vmax.f32 %v663_v27, 0.11 }
 0x195   : > { %2709 = vst [vmem:[%s3585_s17 + $0x1060] sm:$0xff] %v1685_v25  ;;  %v1688_v31 = vmax.f32 %v664_v28, 0.11  ;;  %v665_v32 = vld [vmem:[%s3573_s30 + $0x1080] sm:$0xff]  ;;  %v666_v33 = vld [vmem:[%s3573_s30 + $0x1088] sm:$0xff]  ;;  %v667_v34 = vld [vmem:[%s3573_s30 + $0x1090] sm:$0xff] }
 0x196   : > { %2710 = vst [vmem:[%s3585_s17 + $0x1068] sm:$0xff] %v1686_v29  ;;  %2711 = vst [vmem:[%s3585_s17 + $0x1070] sm:$0xff] %v1687_v30  ;;  %v1689_v35 = vmax.f32 %v665_v32, 0.11  ;;  %v1690_v36 = vmax.f32 %v666_v33, 0.11 }
 0x197   : > { %2712 = vst [vmem:[%s3585_s17 + $0x1078] sm:$0xff] %v1688_v31  ;;  %v1691_v37 = vmax.f32 %v667_v34, 0.11  ;;  %v668_v38 = vld [vmem:[%s3573_s30 + $0x1098] sm:$0xff]  ;;  %v669_v39 = vld [vmem:[%s3573_s30 + $0x10a0] sm:$0xff]  ;;  %v670_v40 = vld [vmem:[%s3573_s30 + $0x10a8] sm:$0xff] }
 0x198   : > { %2713 = vst [vmem:[%s3585_s17 + $0x1080] sm:$0xff] %v1689_v35  ;;  %2714 = vst [vmem:[%s3585_s17 + $0x1088] sm:$0xff] %v1690_v36  ;;  %v1692_v41 = vmax.f32 %v668_v38, 0.11  ;;  %v1693_v42 = vmax.f32 %v669_v39, 0.11 }
 0x199   : > { %2715 = vst [vmem:[%s3585_s17 + $0x1090] sm:$0xff] %v1691_v37  ;;  %v1694_v43 = vmax.f32 %v670_v40, 0.11  ;;  %v671_v44 = vld [vmem:[%s3573_s30 + $0x10b0] sm:$0xff]  ;;  %v672_v45 = vld [vmem:[%s3573_s30 + $0x10b8] sm:$0xff]  ;;  %v673_v46 = vld [vmem:[%s3573_s30 + $0x10c0] sm:$0xff] }
 0x19a   : > { %2716 = vst [vmem:[%s3585_s17 + $0x1098] sm:$0xff] %v1692_v41  ;;  %2717 = vst [vmem:[%s3585_s17 + $0x10a0] sm:$0xff] %v1693_v42  ;;  %v1695_v47 = vmax.f32 %v671_v44, 0.11  ;;  %v1696_v48 = vmax.f32 %v672_v45, 0.11 }
 0x19b   : > { %2718 = vst [vmem:[%s3585_s17 + $0x10a8] sm:$0xff] %v1694_v43  ;;  %v1697_v49 = vmax.f32 %v673_v46, 0.11  ;;  %v674_v50 = vld [vmem:[%s3573_s30 + $0x10c8] sm:$0xff]  ;;  %v675_v51 = vld [vmem:[%s3573_s30 + $0x10d0] sm:$0xff]  ;;  %v676_v52 = vld [vmem:[%s3573_s30 + $0x10d8] sm:$0xff] }
 0x19c   : > { %2719 = vst [vmem:[%s3585_s17 + $0x10b0] sm:$0xff] %v1695_v47  ;;  %2720 = vst [vmem:[%s3585_s17 + $0x10b8] sm:$0xff] %v1696_v48  ;;  %v1698_v53 = vmax.f32 %v674_v50, 0.11  ;;  %v1699_v54 = vmax.f32 %v675_v51, 0.11 }
 0x19d   : > { %2721 = vst [vmem:[%s3585_s17 + $0x10c0] sm:$0xff] %v1697_v49  ;;  %v1700_v55 = vmax.f32 %v676_v52, 0.11  ;;  %v677_v56 = vld [vmem:[%s3573_s30 + $0x10e0] sm:$0xff]  ;;  %v678_v57 = vld [vmem:[%s3573_s30 + $0x10e8] sm:$0xff]  ;;  %v679_v58 = vld [vmem:[%s3573_s30 + $0x10f0] sm:$0xff] }
 0x19e   : > { %2722 = vst [vmem:[%s3585_s17 + $0x10c8] sm:$0xff] %v1698_v53  ;;  %2723 = vst [vmem:[%s3585_s17 + $0x10d0] sm:$0xff] %v1699_v54  ;;  %v1701_v59 = vmax.f32 %v677_v56, 0.11  ;;  %v1702_v60 = vmax.f32 %v678_v57, 0.11 }
 0x19f   : > { %2724 = vst [vmem:[%s3585_s17 + $0x10d8] sm:$0xff] %v1700_v55  ;;  %v1703_v61 = vmax.f32 %v679_v58, 0.11  ;;  %v680_v62 = vld [vmem:[%s3573_s30 + $0x10f8] sm:$0xff]  ;;  %v681_v63 = vld [vmem:[%s3573_s30 + $0x1100] sm:$0xff]  ;;  %v682_v0 = vld [vmem:[%s3573_s30 + $0x1108] sm:$0xff] }
 0x1a0   : > { %2725 = vst [vmem:[%s3585_s17 + $0x10e0] sm:$0xff] %v1701_v59  ;;  %2726 = vst [vmem:[%s3585_s17 + $0x10e8] sm:$0xff] %v1702_v60  ;;  %v1704_v1 = vmax.f32 %v680_v62, 0.11  ;;  %v1705_v2 = vmax.f32 %v681_v63, 0.11 }
 0x1a1   : > { %2727 = vst [vmem:[%s3585_s17 + $0x10f0] sm:$0xff] %v1703_v61  ;;  %v1706_v3 = vmax.f32 %v682_v0, 0.11  ;;  %v683_v4 = vld [vmem:[%s3573_s30 + $0x1110] sm:$0xff]  ;;  %v684_v5 = vld [vmem:[%s3573_s30 + $0x1118] sm:$0xff]  ;;  %v685_v6 = vld [vmem:[%s3573_s30 + $0x1120] sm:$0xff] }
 0x1a2   : > { %2728 = vst [vmem:[%s3585_s17 + $0x10f8] sm:$0xff] %v1704_v1  ;;  %2729 = vst [vmem:[%s3585_s17 + $0x1100] sm:$0xff] %v1705_v2  ;;  %v1707_v7 = vmax.f32 %v683_v4, 0.11  ;;  %v1708_v8 = vmax.f32 %v684_v5, 0.11 }
 0x1a3   : > { %2730 = vst [vmem:[%s3585_s17 + $0x1108] sm:$0xff] %v1706_v3  ;;  %v1709_v9 = vmax.f32 %v685_v6, 0.11  ;;  %v686_v10 = vld [vmem:[%s3573_s30 + $0x1128] sm:$0xff]  ;;  %v687_v11 = vld [vmem:[%s3573_s30 + $0x1130] sm:$0xff]  ;;  %v688_v12 = vld [vmem:[%s3573_s30 + $0x1138] sm:$0xff] }
 0x1a4   : > { %2731 = vst [vmem:[%s3585_s17 + $0x1110] sm:$0xff] %v1707_v7  ;;  %2732 = vst [vmem:[%s3585_s17 + $0x1118] sm:$0xff] %v1708_v8  ;;  %v1710_v13 = vmax.f32 %v686_v10, 0.11  ;;  %v1711_v14 = vmax.f32 %v687_v11, 0.11 }
 0x1a5   : > { %2733 = vst [vmem:[%s3585_s17 + $0x1120] sm:$0xff] %v1709_v9  ;;  %v1712_v15 = vmax.f32 %v688_v12, 0.11  ;;  %v689_v16 = vld [vmem:[%s3573_s30 + $0x1140] sm:$0xff]  ;;  %v690_v17 = vld [vmem:[%s3573_s30 + $0x1148] sm:$0xff]  ;;  %v691_v18 = vld [vmem:[%s3573_s30 + $0x1150] sm:$0xff] }
 0x1a6   : > { %2734 = vst [vmem:[%s3585_s17 + $0x1128] sm:$0xff] %v1710_v13  ;;  %2735 = vst [vmem:[%s3585_s17 + $0x1130] sm:$0xff] %v1711_v14  ;;  %v1713_v19 = vmax.f32 %v689_v16, 0.11  ;;  %v1714_v20 = vmax.f32 %v690_v17, 0.11 }
 0x1a7   : > { %2736 = vst [vmem:[%s3585_s17 + $0x1138] sm:$0xff] %v1712_v15  ;;  %v1715_v21 = vmax.f32 %v691_v18, 0.11  ;;  %v692_v22 = vld [vmem:[%s3573_s30 + $0x1158] sm:$0xff]  ;;  %v693_v23 = vld [vmem:[%s3573_s30 + $0x1160] sm:$0xff]  ;;  %v694_v24 = vld [vmem:[%s3573_s30 + $0x1168] sm:$0xff] }
 0x1a8   : > { %2737 = vst [vmem:[%s3585_s17 + $0x1140] sm:$0xff] %v1713_v19  ;;  %2738 = vst [vmem:[%s3585_s17 + $0x1148] sm:$0xff] %v1714_v20  ;;  %v1716_v25 = vmax.f32 %v692_v22, 0.11  ;;  %v1717_v26 = vmax.f32 %v693_v23, 0.11 }
 0x1a9   : > { %2739 = vst [vmem:[%s3585_s17 + $0x1150] sm:$0xff] %v1715_v21  ;;  %v1718_v27 = vmax.f32 %v694_v24, 0.11  ;;  %v695_v28 = vld [vmem:[%s3573_s30 + $0x1170] sm:$0xff]  ;;  %v696_v29 = vld [vmem:[%s3573_s30 + $0x1178] sm:$0xff]  ;;  %v697_v30 = vld [vmem:[%s3573_s30 + $0x1180] sm:$0xff] }
 0x1aa   : > { %2740 = vst [vmem:[%s3585_s17 + $0x1158] sm:$0xff] %v1716_v25  ;;  %2741 = vst [vmem:[%s3585_s17 + $0x1160] sm:$0xff] %v1717_v26  ;;  %v1719_v31 = vmax.f32 %v695_v28, 0.11  ;;  %v1720_v32 = vmax.f32 %v696_v29, 0.11 }
 0x1ab   : > { %2742 = vst [vmem:[%s3585_s17 + $0x1168] sm:$0xff] %v1718_v27  ;;  %v1721_v33 = vmax.f32 %v697_v30, 0.11  ;;  %v698_v34 = vld [vmem:[%s3573_s30 + $0x1188] sm:$0xff]  ;;  %v699_v35 = vld [vmem:[%s3573_s30 + $0x1190] sm:$0xff]  ;;  %v700_v36 = vld [vmem:[%s3573_s30 + $0x1198] sm:$0xff] }
 0x1ac   : > { %2743 = vst [vmem:[%s3585_s17 + $0x1170] sm:$0xff] %v1719_v31  ;;  %2744 = vst [vmem:[%s3585_s17 + $0x1178] sm:$0xff] %v1720_v32  ;;  %v1722_v37 = vmax.f32 %v698_v34, 0.11  ;;  %v1723_v38 = vmax.f32 %v699_v35, 0.11 }
 0x1ad   : > { %2745 = vst [vmem:[%s3585_s17 + $0x1180] sm:$0xff] %v1721_v33  ;;  %v1724_v39 = vmax.f32 %v700_v36, 0.11  ;;  %v701_v40 = vld [vmem:[%s3573_s30 + $0x11a0] sm:$0xff]  ;;  %v702_v41 = vld [vmem:[%s3573_s30 + $0x11a8] sm:$0xff]  ;;  %v703_v42 = vld [vmem:[%s3573_s30 + $0x11b0] sm:$0xff] }
 0x1ae   : > { %2746 = vst [vmem:[%s3585_s17 + $0x1188] sm:$0xff] %v1722_v37  ;;  %2747 = vst [vmem:[%s3585_s17 + $0x1190] sm:$0xff] %v1723_v38  ;;  %v1725_v43 = vmax.f32 %v701_v40, 0.11  ;;  %v1726_v44 = vmax.f32 %v702_v41, 0.11 }
 0x1af   : > { %2748 = vst [vmem:[%s3585_s17 + $0x1198] sm:$0xff] %v1724_v39  ;;  %v1727_v45 = vmax.f32 %v703_v42, 0.11  ;;  %v704_v46 = vld [vmem:[%s3573_s30 + $0x11b8] sm:$0xff]  ;;  %v705_v47 = vld [vmem:[%s3573_s30 + $0x11c0] sm:$0xff]  ;;  %v706_v48 = vld [vmem:[%s3573_s30 + $0x11c8] sm:$0xff] }
 0x1b0   : > { %2749 = vst [vmem:[%s3585_s17 + $0x11a0] sm:$0xff] %v1725_v43  ;;  %2750 = vst [vmem:[%s3585_s17 + $0x11a8] sm:$0xff] %v1726_v44  ;;  %v1728_v49 = vmax.f32 %v704_v46, 0.11  ;;  %v1729_v50 = vmax.f32 %v705_v47, 0.11 }
 0x1b1   : > { %2751 = vst [vmem:[%s3585_s17 + $0x11b0] sm:$0xff] %v1727_v45  ;;  %v1730_v51 = vmax.f32 %v706_v48, 0.11  ;;  %v707_v52 = vld [vmem:[%s3573_s30 + $0x11d0] sm:$0xff]  ;;  %v708_v53 = vld [vmem:[%s3573_s30 + $0x11d8] sm:$0xff]  ;;  %v709_v54 = vld [vmem:[%s3573_s30 + $0x11e0] sm:$0xff] }
 0x1b2   : > { %2752 = vst [vmem:[%s3585_s17 + $0x11b8] sm:$0xff] %v1728_v49  ;;  %2753 = vst [vmem:[%s3585_s17 + $0x11c0] sm:$0xff] %v1729_v50  ;;  %v1731_v55 = vmax.f32 %v707_v52, 0.11  ;;  %v1732_v56 = vmax.f32 %v708_v53, 0.11 }
 0x1b3   : > { %2754 = vst [vmem:[%s3585_s17 + $0x11c8] sm:$0xff] %v1730_v51  ;;  %v1733_v57 = vmax.f32 %v709_v54, 0.11  ;;  %v710_v58 = vld [vmem:[%s3573_s30 + $0x11e8] sm:$0xff]  ;;  %v711_v59 = vld [vmem:[%s3573_s30 + $0x11f0] sm:$0xff]  ;;  %v712_v60 = vld [vmem:[%s3573_s30 + $0x11f8] sm:$0xff] }
 0x1b4   : > { %2755 = vst [vmem:[%s3585_s17 + $0x11d0] sm:$0xff] %v1731_v55  ;;  %2756 = vst [vmem:[%s3585_s17 + $0x11d8] sm:$0xff] %v1732_v56  ;;  %v1734_v61 = vmax.f32 %v710_v58, 0.11  ;;  %v1735_v62 = vmax.f32 %v711_v59, 0.11 }
 0x1b5   : > { %2757 = vst [vmem:[%s3585_s17 + $0x11e0] sm:$0xff] %v1733_v57  ;;  %v1736_v63 = vmax.f32 %v712_v60, 0.11  ;;  %v713_v0 = vld [vmem:[%s3573_s30 + $0x1200] sm:$0xff]  ;;  %v714_v1 = vld [vmem:[%s3573_s30 + $0x1208] sm:$0xff]  ;;  %v715_v2 = vld [vmem:[%s3573_s30 + $0x1210] sm:$0xff] }
 0x1b6   : > { %2758 = vst [vmem:[%s3585_s17 + $0x11e8] sm:$0xff] %v1734_v61  ;;  %2759 = vst [vmem:[%s3585_s17 + $0x11f0] sm:$0xff] %v1735_v62  ;;  %v1737_v3 = vmax.f32 %v713_v0, 0.11  ;;  %v1738_v4 = vmax.f32 %v714_v1, 0.11 }
 0x1b7   : > { %2760 = vst [vmem:[%s3585_s17 + $0x11f8] sm:$0xff] %v1736_v63  ;;  %v1739_v5 = vmax.f32 %v715_v2, 0.11  ;;  %v716_v6 = vld [vmem:[%s3573_s30 + $0x1218] sm:$0xff]  ;;  %v717_v7 = vld [vmem:[%s3573_s30 + $0x1220] sm:$0xff]  ;;  %v718_v8 = vld [vmem:[%s3573_s30 + $0x1228] sm:$0xff] }
 0x1b8   : > { %2761 = vst [vmem:[%s3585_s17 + $0x1200] sm:$0xff] %v1737_v3  ;;  %2762 = vst [vmem:[%s3585_s17 + $0x1208] sm:$0xff] %v1738_v4  ;;  %v1740_v9 = vmax.f32 %v716_v6, 0.11  ;;  %v1741_v10 = vmax.f32 %v717_v7, 0.11 }
 0x1b9   : > { %2763 = vst [vmem:[%s3585_s17 + $0x1210] sm:$0xff] %v1739_v5  ;;  %v1742_v11 = vmax.f32 %v718_v8, 0.11  ;;  %v719_v12 = vld [vmem:[%s3573_s30 + $0x1230] sm:$0xff]  ;;  %v720_v13 = vld [vmem:[%s3573_s30 + $0x1238] sm:$0xff]  ;;  %v721_v14 = vld [vmem:[%s3573_s30 + $0x1240] sm:$0xff] }
 0x1ba   : > { %2764 = vst [vmem:[%s3585_s17 + $0x1218] sm:$0xff] %v1740_v9  ;;  %2765 = vst [vmem:[%s3585_s17 + $0x1220] sm:$0xff] %v1741_v10  ;;  %v1743_v15 = vmax.f32 %v719_v12, 0.11  ;;  %v1744_v16 = vmax.f32 %v720_v13, 0.11 }
 0x1bb   : > { %2766 = vst [vmem:[%s3585_s17 + $0x1228] sm:$0xff] %v1742_v11  ;;  %v1745_v17 = vmax.f32 %v721_v14, 0.11  ;;  %v722_v18 = vld [vmem:[%s3573_s30 + $0x1248] sm:$0xff]  ;;  %v723_v19 = vld [vmem:[%s3573_s30 + $0x1250] sm:$0xff]  ;;  %v724_v20 = vld [vmem:[%s3573_s30 + $0x1258] sm:$0xff] }
 0x1bc   : > { %2767 = vst [vmem:[%s3585_s17 + $0x1230] sm:$0xff] %v1743_v15  ;;  %2768 = vst [vmem:[%s3585_s17 + $0x1238] sm:$0xff] %v1744_v16  ;;  %v1746_v21 = vmax.f32 %v722_v18, 0.11  ;;  %v1747_v22 = vmax.f32 %v723_v19, 0.11 }
 0x1bd   : > { %2769 = vst [vmem:[%s3585_s17 + $0x1240] sm:$0xff] %v1745_v17  ;;  %v1748_v23 = vmax.f32 %v724_v20, 0.11  ;;  %v725_v24 = vld [vmem:[%s3573_s30 + $0x1260] sm:$0xff]  ;;  %v726_v25 = vld [vmem:[%s3573_s30 + $0x1268] sm:$0xff]  ;;  %v727_v26 = vld [vmem:[%s3573_s30 + $0x1270] sm:$0xff] }
 0x1be   : > { %2770 = vst [vmem:[%s3585_s17 + $0x1248] sm:$0xff] %v1746_v21  ;;  %2771 = vst [vmem:[%s3585_s17 + $0x1250] sm:$0xff] %v1747_v22  ;;  %v1749_v27 = vmax.f32 %v725_v24, 0.11  ;;  %v1750_v28 = vmax.f32 %v726_v25, 0.11 }
 0x1bf   : > { %2772 = vst [vmem:[%s3585_s17 + $0x1258] sm:$0xff] %v1748_v23  ;;  %v1751_v29 = vmax.f32 %v727_v26, 0.11  ;;  %v728_v30 = vld [vmem:[%s3573_s30 + $0x1278] sm:$0xff]  ;;  %v729_v31 = vld [vmem:[%s3573_s30 + $0x1280] sm:$0xff]  ;;  %v730_v32 = vld [vmem:[%s3573_s30 + $0x1288] sm:$0xff] }
 0x1c0   : > { %2773 = vst [vmem:[%s3585_s17 + $0x1260] sm:$0xff] %v1749_v27  ;;  %2774 = vst [vmem:[%s3585_s17 + $0x1268] sm:$0xff] %v1750_v28  ;;  %v1752_v33 = vmax.f32 %v728_v30, 0.11  ;;  %v1753_v34 = vmax.f32 %v729_v31, 0.11 }
 0x1c1   : > { %2775 = vst [vmem:[%s3585_s17 + $0x1270] sm:$0xff] %v1751_v29  ;;  %v1754_v35 = vmax.f32 %v730_v32, 0.11  ;;  %v731_v36 = vld [vmem:[%s3573_s30 + $0x1290] sm:$0xff]  ;;  %v732_v37 = vld [vmem:[%s3573_s30 + $0x1298] sm:$0xff]  ;;  %v733_v38 = vld [vmem:[%s3573_s30 + $0x12a0] sm:$0xff] }
 0x1c2   : > { %2776 = vst [vmem:[%s3585_s17 + $0x1278] sm:$0xff] %v1752_v33  ;;  %2777 = vst [vmem:[%s3585_s17 + $0x1280] sm:$0xff] %v1753_v34  ;;  %v1755_v39 = vmax.f32 %v731_v36, 0.11  ;;  %v1756_v40 = vmax.f32 %v732_v37, 0.11 }
 0x1c3   : > { %2778 = vst [vmem:[%s3585_s17 + $0x1288] sm:$0xff] %v1754_v35  ;;  %v1757_v41 = vmax.f32 %v733_v38, 0.11  ;;  %v734_v42 = vld [vmem:[%s3573_s30 + $0x12a8] sm:$0xff]  ;;  %v735_v43 = vld [vmem:[%s3573_s30 + $0x12b0] sm:$0xff]  ;;  %v736_v44 = vld [vmem:[%s3573_s30 + $0x12b8] sm:$0xff] }
 0x1c4   : > { %2779 = vst [vmem:[%s3585_s17 + $0x1290] sm:$0xff] %v1755_v39  ;;  %2780 = vst [vmem:[%s3585_s17 + $0x1298] sm:$0xff] %v1756_v40  ;;  %v1758_v45 = vmax.f32 %v734_v42, 0.11  ;;  %v1759_v46 = vmax.f32 %v735_v43, 0.11 }
 0x1c5   : > { %2781 = vst [vmem:[%s3585_s17 + $0x12a0] sm:$0xff] %v1757_v41  ;;  %v1760_v47 = vmax.f32 %v736_v44, 0.11  ;;  %v737_v48 = vld [vmem:[%s3573_s30 + $0x12c0] sm:$0xff]  ;;  %v738_v49 = vld [vmem:[%s3573_s30 + $0x12c8] sm:$0xff]  ;;  %v739_v50 = vld [vmem:[%s3573_s30 + $0x12d0] sm:$0xff] }
 0x1c6   : > { %2782 = vst [vmem:[%s3585_s17 + $0x12a8] sm:$0xff] %v1758_v45  ;;  %2783 = vst [vmem:[%s3585_s17 + $0x12b0] sm:$0xff] %v1759_v46  ;;  %v1761_v51 = vmax.f32 %v737_v48, 0.11  ;;  %v1762_v52 = vmax.f32 %v738_v49, 0.11 }
 0x1c7   : > { %2784 = vst [vmem:[%s3585_s17 + $0x12b8] sm:$0xff] %v1760_v47  ;;  %v1763_v53 = vmax.f32 %v739_v50, 0.11  ;;  %v740_v54 = vld [vmem:[%s3573_s30 + $0x12d8] sm:$0xff]  ;;  %v741_v55 = vld [vmem:[%s3573_s30 + $0x12e0] sm:$0xff]  ;;  %v742_v56 = vld [vmem:[%s3573_s30 + $0x12e8] sm:$0xff] }
 0x1c8   : > { %2785 = vst [vmem:[%s3585_s17 + $0x12c0] sm:$0xff] %v1761_v51  ;;  %2786 = vst [vmem:[%s3585_s17 + $0x12c8] sm:$0xff] %v1762_v52  ;;  %v1764_v57 = vmax.f32 %v740_v54, 0.11  ;;  %v1765_v58 = vmax.f32 %v741_v55, 0.11 }
 0x1c9   : > { %2787 = vst [vmem:[%s3585_s17 + $0x12d0] sm:$0xff] %v1763_v53  ;;  %v1766_v59 = vmax.f32 %v742_v56, 0.11  ;;  %v743_v60 = vld [vmem:[%s3573_s30 + $0x12f0] sm:$0xff]  ;;  %v744_v61 = vld [vmem:[%s3573_s30 + $0x12f8] sm:$0xff]  ;;  %v745_v62 = vld [vmem:[%s3573_s30 + $0x1300] sm:$0xff] }
 0x1ca   : > { %2788 = vst [vmem:[%s3585_s17 + $0x12d8] sm:$0xff] %v1764_v57  ;;  %2789 = vst [vmem:[%s3585_s17 + $0x12e0] sm:$0xff] %v1765_v58  ;;  %v1767_v63 = vmax.f32 %v743_v60, 0.11  ;;  %v1768_v0 = vmax.f32 %v744_v61, 0.11 }
 0x1cb   : > { %2790 = vst [vmem:[%s3585_s17 + $0x12e8] sm:$0xff] %v1766_v59  ;;  %v1769_v1 = vmax.f32 %v745_v62, 0.11  ;;  %v746_v2 = vld [vmem:[%s3573_s30 + $0x1308] sm:$0xff]  ;;  %v747_v3 = vld [vmem:[%s3573_s30 + $0x1310] sm:$0xff]  ;;  %v748_v4 = vld [vmem:[%s3573_s30 + $0x1318] sm:$0xff] }
 0x1cc   : > { %2791 = vst [vmem:[%s3585_s17 + $0x12f0] sm:$0xff] %v1767_v63  ;;  %2792 = vst [vmem:[%s3585_s17 + $0x12f8] sm:$0xff] %v1768_v0  ;;  %v1770_v5 = vmax.f32 %v746_v2, 0.11  ;;  %v1771_v6 = vmax.f32 %v747_v3, 0.11 }
 0x1cd   : > { %2793 = vst [vmem:[%s3585_s17 + $0x1300] sm:$0xff] %v1769_v1  ;;  %v1772_v7 = vmax.f32 %v748_v4, 0.11  ;;  %v749_v8 = vld [vmem:[%s3573_s30 + $0x1320] sm:$0xff]  ;;  %v750_v9 = vld [vmem:[%s3573_s30 + $0x1328] sm:$0xff]  ;;  %v751_v10 = vld [vmem:[%s3573_s30 + $0x1330] sm:$0xff] }
 0x1ce   : > { %2794 = vst [vmem:[%s3585_s17 + $0x1308] sm:$0xff] %v1770_v5  ;;  %2795 = vst [vmem:[%s3585_s17 + $0x1310] sm:$0xff] %v1771_v6  ;;  %v1773_v11 = vmax.f32 %v749_v8, 0.11  ;;  %v1774_v12 = vmax.f32 %v750_v9, 0.11 }
 0x1cf   : > { %2796 = vst [vmem:[%s3585_s17 + $0x1318] sm:$0xff] %v1772_v7  ;;  %v1775_v13 = vmax.f32 %v751_v10, 0.11  ;;  %v752_v14 = vld [vmem:[%s3573_s30 + $0x1338] sm:$0xff]  ;;  %v753_v15 = vld [vmem:[%s3573_s30 + $0x1340] sm:$0xff]  ;;  %v754_v16 = vld [vmem:[%s3573_s30 + $0x1348] sm:$0xff] }
 0x1d0   : > { %2797 = vst [vmem:[%s3585_s17 + $0x1320] sm:$0xff] %v1773_v11  ;;  %2798 = vst [vmem:[%s3585_s17 + $0x1328] sm:$0xff] %v1774_v12  ;;  %v1776_v17 = vmax.f32 %v752_v14, 0.11  ;;  %v1777_v18 = vmax.f32 %v753_v15, 0.11 }
 0x1d1   : > { %2799 = vst [vmem:[%s3585_s17 + $0x1330] sm:$0xff] %v1775_v13  ;;  %v1778_v19 = vmax.f32 %v754_v16, 0.11  ;;  %v755_v20 = vld [vmem:[%s3573_s30 + $0x1350] sm:$0xff]  ;;  %v756_v21 = vld [vmem:[%s3573_s30 + $0x1358] sm:$0xff]  ;;  %v757_v22 = vld [vmem:[%s3573_s30 + $0x1360] sm:$0xff] }
 0x1d2   : > { %2800 = vst [vmem:[%s3585_s17 + $0x1338] sm:$0xff] %v1776_v17  ;;  %2801 = vst [vmem:[%s3585_s17 + $0x1340] sm:$0xff] %v1777_v18  ;;  %v1779_v23 = vmax.f32 %v755_v20, 0.11  ;;  %v1780_v24 = vmax.f32 %v756_v21, 0.11 }
 0x1d3   : > { %2802 = vst [vmem:[%s3585_s17 + $0x1348] sm:$0xff] %v1778_v19  ;;  %v1781_v25 = vmax.f32 %v757_v22, 0.11  ;;  %v758_v26 = vld [vmem:[%s3573_s30 + $0x1368] sm:$0xff]  ;;  %v759_v27 = vld [vmem:[%s3573_s30 + $0x1370] sm:$0xff]  ;;  %v760_v28 = vld [vmem:[%s3573_s30 + $0x1378] sm:$0xff] }
 0x1d4   : > { %2803 = vst [vmem:[%s3585_s17 + $0x1350] sm:$0xff] %v1779_v23  ;;  %2804 = vst [vmem:[%s3585_s17 + $0x1358] sm:$0xff] %v1780_v24  ;;  %v1782_v29 = vmax.f32 %v758_v26, 0.11  ;;  %v1783_v30 = vmax.f32 %v759_v27, 0.11 }
 0x1d5   : > { %2805 = vst [vmem:[%s3585_s17 + $0x1360] sm:$0xff] %v1781_v25  ;;  %v1784_v31 = vmax.f32 %v760_v28, 0.11  ;;  %v761_v32 = vld [vmem:[%s3573_s30 + $0x1380] sm:$0xff]  ;;  %v762_v33 = vld [vmem:[%s3573_s30 + $0x1388] sm:$0xff]  ;;  %v763_v34 = vld [vmem:[%s3573_s30 + $0x1390] sm:$0xff] }
 0x1d6   : > { %2806 = vst [vmem:[%s3585_s17 + $0x1368] sm:$0xff] %v1782_v29  ;;  %2807 = vst [vmem:[%s3585_s17 + $0x1370] sm:$0xff] %v1783_v30  ;;  %v1785_v35 = vmax.f32 %v761_v32, 0.11  ;;  %v1786_v36 = vmax.f32 %v762_v33, 0.11 }
 0x1d7   : > { %2808 = vst [vmem:[%s3585_s17 + $0x1378] sm:$0xff] %v1784_v31  ;;  %v1787_v37 = vmax.f32 %v763_v34, 0.11  ;;  %v764_v38 = vld [vmem:[%s3573_s30 + $0x1398] sm:$0xff]  ;;  %v765_v39 = vld [vmem:[%s3573_s30 + $0x13a0] sm:$0xff]  ;;  %v766_v40 = vld [vmem:[%s3573_s30 + $0x13a8] sm:$0xff] }
 0x1d8   : > { %2809 = vst [vmem:[%s3585_s17 + $0x1380] sm:$0xff] %v1785_v35  ;;  %2810 = vst [vmem:[%s3585_s17 + $0x1388] sm:$0xff] %v1786_v36  ;;  %v1788_v41 = vmax.f32 %v764_v38, 0.11  ;;  %v1789_v42 = vmax.f32 %v765_v39, 0.11 }
 0x1d9   : > { %2811 = vst [vmem:[%s3585_s17 + $0x1390] sm:$0xff] %v1787_v37  ;;  %v1790_v43 = vmax.f32 %v766_v40, 0.11  ;;  %v767_v44 = vld [vmem:[%s3573_s30 + $0x13b0] sm:$0xff]  ;;  %v768_v45 = vld [vmem:[%s3573_s30 + $0x13b8] sm:$0xff]  ;;  %v769_v46 = vld [vmem:[%s3573_s30 + $0x13c0] sm:$0xff] }
 0x1da   : > { %2812 = vst [vmem:[%s3585_s17 + $0x1398] sm:$0xff] %v1788_v41  ;;  %2813 = vst [vmem:[%s3585_s17 + $0x13a0] sm:$0xff] %v1789_v42  ;;  %v1791_v47 = vmax.f32 %v767_v44, 0.11  ;;  %v1792_v48 = vmax.f32 %v768_v45, 0.11 }
 0x1db   : > { %2814 = vst [vmem:[%s3585_s17 + $0x13a8] sm:$0xff] %v1790_v43  ;;  %v1793_v49 = vmax.f32 %v769_v46, 0.11  ;;  %v770_v50 = vld [vmem:[%s3573_s30 + $0x13c8] sm:$0xff]  ;;  %v771_v51 = vld [vmem:[%s3573_s30 + $0x13d0] sm:$0xff]  ;;  %v772_v52 = vld [vmem:[%s3573_s30 + $0x13d8] sm:$0xff] }
 0x1dc   : > { %2815 = vst [vmem:[%s3585_s17 + $0x13b0] sm:$0xff] %v1791_v47  ;;  %2816 = vst [vmem:[%s3585_s17 + $0x13b8] sm:$0xff] %v1792_v48  ;;  %v1794_v53 = vmax.f32 %v770_v50, 0.11  ;;  %v1795_v54 = vmax.f32 %v771_v51, 0.11 }
 0x1dd   : > { %2817 = vst [vmem:[%s3585_s17 + $0x13c0] sm:$0xff] %v1793_v49  ;;  %v1796_v55 = vmax.f32 %v772_v52, 0.11  ;;  %v773_v56 = vld [vmem:[%s3573_s30 + $0x13e0] sm:$0xff]  ;;  %v774_v57 = vld [vmem:[%s3573_s30 + $0x13e8] sm:$0xff]  ;;  %v775_v58 = vld [vmem:[%s3573_s30 + $0x13f0] sm:$0xff] }
 0x1de   : > { %2818 = vst [vmem:[%s3585_s17 + $0x13c8] sm:$0xff] %v1794_v53  ;;  %2819 = vst [vmem:[%s3585_s17 + $0x13d0] sm:$0xff] %v1795_v54  ;;  %v1797_v59 = vmax.f32 %v773_v56, 0.11  ;;  %v1798_v60 = vmax.f32 %v774_v57, 0.11 }
 0x1df   : > { %2820 = vst [vmem:[%s3585_s17 + $0x13d8] sm:$0xff] %v1796_v55  ;;  %v1799_v61 = vmax.f32 %v775_v58, 0.11  ;;  %v776_v62 = vld [vmem:[%s3573_s30 + $0x13f8] sm:$0xff]  ;;  %v777_v63 = vld [vmem:[%s3573_s30 + $0x1400] sm:$0xff]  ;;  %v778_v0 = vld [vmem:[%s3573_s30 + $0x1408] sm:$0xff] }
 0x1e0   : > { %2821 = vst [vmem:[%s3585_s17 + $0x13e0] sm:$0xff] %v1797_v59  ;;  %2822 = vst [vmem:[%s3585_s17 + $0x13e8] sm:$0xff] %v1798_v60  ;;  %v1800_v1 = vmax.f32 %v776_v62, 0.11  ;;  %v1801_v2 = vmax.f32 %v777_v63, 0.11 }
 0x1e1   : > { %2823 = vst [vmem:[%s3585_s17 + $0x13f0] sm:$0xff] %v1799_v61  ;;  %v1802_v3 = vmax.f32 %v778_v0, 0.11  ;;  %v779_v4 = vld [vmem:[%s3573_s30 + $0x1410] sm:$0xff]  ;;  %v780_v5 = vld [vmem:[%s3573_s30 + $0x1418] sm:$0xff]  ;;  %v781_v6 = vld [vmem:[%s3573_s30 + $0x1420] sm:$0xff] }
 0x1e2   : > { %2824 = vst [vmem:[%s3585_s17 + $0x13f8] sm:$0xff] %v1800_v1  ;;  %2825 = vst [vmem:[%s3585_s17 + $0x1400] sm:$0xff] %v1801_v2  ;;  %v1803_v7 = vmax.f32 %v779_v4, 0.11  ;;  %v1804_v8 = vmax.f32 %v780_v5, 0.11 }
 0x1e3   : > { %2826 = vst [vmem:[%s3585_s17 + $0x1408] sm:$0xff] %v1802_v3  ;;  %v1805_v9 = vmax.f32 %v781_v6, 0.11  ;;  %v782_v10 = vld [vmem:[%s3573_s30 + $0x1428] sm:$0xff]  ;;  %v783_v11 = vld [vmem:[%s3573_s30 + $0x1430] sm:$0xff]  ;;  %v784_v12 = vld [vmem:[%s3573_s30 + $0x1438] sm:$0xff] }
 0x1e4   : > { %2827 = vst [vmem:[%s3585_s17 + $0x1410] sm:$0xff] %v1803_v7  ;;  %2828 = vst [vmem:[%s3585_s17 + $0x1418] sm:$0xff] %v1804_v8  ;;  %v1806_v13 = vmax.f32 %v782_v10, 0.11  ;;  %v1807_v14 = vmax.f32 %v783_v11, 0.11 }
 0x1e5   : > { %2829 = vst [vmem:[%s3585_s17 + $0x1420] sm:$0xff] %v1805_v9  ;;  %v1808_v15 = vmax.f32 %v784_v12, 0.11  ;;  %v785_v16 = vld [vmem:[%s3573_s30 + $0x1440] sm:$0xff]  ;;  %v786_v17 = vld [vmem:[%s3573_s30 + $0x1448] sm:$0xff]  ;;  %v787_v18 = vld [vmem:[%s3573_s30 + $0x1450] sm:$0xff] }
 0x1e6   : > { %2830 = vst [vmem:[%s3585_s17 + $0x1428] sm:$0xff] %v1806_v13  ;;  %2831 = vst [vmem:[%s3585_s17 + $0x1430] sm:$0xff] %v1807_v14  ;;  %v1809_v19 = vmax.f32 %v785_v16, 0.11  ;;  %v1810_v20 = vmax.f32 %v786_v17, 0.11 }
 0x1e7   : > { %2832 = vst [vmem:[%s3585_s17 + $0x1438] sm:$0xff] %v1808_v15  ;;  %v1811_v21 = vmax.f32 %v787_v18, 0.11  ;;  %v788_v22 = vld [vmem:[%s3573_s30 + $0x1458] sm:$0xff]  ;;  %v789_v23 = vld [vmem:[%s3573_s30 + $0x1460] sm:$0xff]  ;;  %v790_v24 = vld [vmem:[%s3573_s30 + $0x1468] sm:$0xff] }
 0x1e8   : > { %2833 = vst [vmem:[%s3585_s17 + $0x1440] sm:$0xff] %v1809_v19  ;;  %2834 = vst [vmem:[%s3585_s17 + $0x1448] sm:$0xff] %v1810_v20  ;;  %v1812_v25 = vmax.f32 %v788_v22, 0.11  ;;  %v1813_v26 = vmax.f32 %v789_v23, 0.11 }
 0x1e9   : > { %2835 = vst [vmem:[%s3585_s17 + $0x1450] sm:$0xff] %v1811_v21  ;;  %v1814_v27 = vmax.f32 %v790_v24, 0.11  ;;  %v791_v28 = vld [vmem:[%s3573_s30 + $0x1470] sm:$0xff]  ;;  %v792_v29 = vld [vmem:[%s3573_s30 + $0x1478] sm:$0xff]  ;;  %v793_v30 = vld [vmem:[%s3573_s30 + $0x1480] sm:$0xff] }
 0x1ea   : > { %2836 = vst [vmem:[%s3585_s17 + $0x1458] sm:$0xff] %v1812_v25  ;;  %2837 = vst [vmem:[%s3585_s17 + $0x1460] sm:$0xff] %v1813_v26  ;;  %v1815_v31 = vmax.f32 %v791_v28, 0.11  ;;  %v1816_v32 = vmax.f32 %v792_v29, 0.11 }
 0x1eb   : > { %2838 = vst [vmem:[%s3585_s17 + $0x1468] sm:$0xff] %v1814_v27  ;;  %v1817_v33 = vmax.f32 %v793_v30, 0.11  ;;  %v794_v34 = vld [vmem:[%s3573_s30 + $0x1488] sm:$0xff]  ;;  %v795_v35 = vld [vmem:[%s3573_s30 + $0x1490] sm:$0xff]  ;;  %v796_v36 = vld [vmem:[%s3573_s30 + $0x1498] sm:$0xff] }
 0x1ec   : > { %2839 = vst [vmem:[%s3585_s17 + $0x1470] sm:$0xff] %v1815_v31  ;;  %2840 = vst [vmem:[%s3585_s17 + $0x1478] sm:$0xff] %v1816_v32  ;;  %v1818_v37 = vmax.f32 %v794_v34, 0.11  ;;  %v1819_v38 = vmax.f32 %v795_v35, 0.11 }
 0x1ed   : > { %2841 = vst [vmem:[%s3585_s17 + $0x1480] sm:$0xff] %v1817_v33  ;;  %v1820_v39 = vmax.f32 %v796_v36, 0.11  ;;  %v797_v40 = vld [vmem:[%s3573_s30 + $0x14a0] sm:$0xff]  ;;  %v798_v41 = vld [vmem:[%s3573_s30 + $0x14a8] sm:$0xff]  ;;  %v799_v42 = vld [vmem:[%s3573_s30 + $0x14b0] sm:$0xff] }
 0x1ee   : > { %2842 = vst [vmem:[%s3585_s17 + $0x1488] sm:$0xff] %v1818_v37  ;;  %2843 = vst [vmem:[%s3585_s17 + $0x1490] sm:$0xff] %v1819_v38  ;;  %v1821_v43 = vmax.f32 %v797_v40, 0.11  ;;  %v1822_v44 = vmax.f32 %v798_v41, 0.11 }
 0x1ef   : > { %2844 = vst [vmem:[%s3585_s17 + $0x1498] sm:$0xff] %v1820_v39  ;;  %v1823_v45 = vmax.f32 %v799_v42, 0.11  ;;  %v800_v46 = vld [vmem:[%s3573_s30 + $0x14b8] sm:$0xff]  ;;  %v801_v47 = vld [vmem:[%s3573_s30 + $0x14c0] sm:$0xff]  ;;  %v802_v48 = vld [vmem:[%s3573_s30 + $0x14c8] sm:$0xff] }
 0x1f0   : > { %2845 = vst [vmem:[%s3585_s17 + $0x14a0] sm:$0xff] %v1821_v43  ;;  %2846 = vst [vmem:[%s3585_s17 + $0x14a8] sm:$0xff] %v1822_v44  ;;  %v1824_v49 = vmax.f32 %v800_v46, 0.11  ;;  %v1825_v50 = vmax.f32 %v801_v47, 0.11 }
 0x1f1   : > { %2847 = vst [vmem:[%s3585_s17 + $0x14b0] sm:$0xff] %v1823_v45  ;;  %v1826_v51 = vmax.f32 %v802_v48, 0.11  ;;  %v803_v52 = vld [vmem:[%s3573_s30 + $0x14d0] sm:$0xff]  ;;  %v804_v53 = vld [vmem:[%s3573_s30 + $0x14d8] sm:$0xff]  ;;  %v805_v54 = vld [vmem:[%s3573_s30 + $0x14e0] sm:$0xff] }
 0x1f2   : > { %2848 = vst [vmem:[%s3585_s17 + $0x14b8] sm:$0xff] %v1824_v49  ;;  %2849 = vst [vmem:[%s3585_s17 + $0x14c0] sm:$0xff] %v1825_v50  ;;  %v1827_v55 = vmax.f32 %v803_v52, 0.11  ;;  %v1828_v56 = vmax.f32 %v804_v53, 0.11 }
 0x1f3   : > { %2850 = vst [vmem:[%s3585_s17 + $0x14c8] sm:$0xff] %v1826_v51  ;;  %v1829_v57 = vmax.f32 %v805_v54, 0.11  ;;  %v806_v58 = vld [vmem:[%s3573_s30 + $0x14e8] sm:$0xff]  ;;  %v807_v59 = vld [vmem:[%s3573_s30 + $0x14f0] sm:$0xff]  ;;  %v808_v60 = vld [vmem:[%s3573_s30 + $0x14f8] sm:$0xff] }
 0x1f4   : > { %2851 = vst [vmem:[%s3585_s17 + $0x14d0] sm:$0xff] %v1827_v55  ;;  %2852 = vst [vmem:[%s3585_s17 + $0x14d8] sm:$0xff] %v1828_v56  ;;  %v1830_v61 = vmax.f32 %v806_v58, 0.11  ;;  %v1831_v62 = vmax.f32 %v807_v59, 0.11 }
 0x1f5   : > { %2853 = vst [vmem:[%s3585_s17 + $0x14e0] sm:$0xff] %v1829_v57  ;;  %v1832_v63 = vmax.f32 %v808_v60, 0.11  ;;  %v809_v0 = vld [vmem:[%s3573_s30 + $0x1500] sm:$0xff]  ;;  %v810_v1 = vld [vmem:[%s3573_s30 + $0x1508] sm:$0xff]  ;;  %v811_v2 = vld [vmem:[%s3573_s30 + $0x1510] sm:$0xff] }
 0x1f6   : > { %2854 = vst [vmem:[%s3585_s17 + $0x14e8] sm:$0xff] %v1830_v61  ;;  %2855 = vst [vmem:[%s3585_s17 + $0x14f0] sm:$0xff] %v1831_v62  ;;  %v1833_v3 = vmax.f32 %v809_v0, 0.11  ;;  %v1834_v4 = vmax.f32 %v810_v1, 0.11 }
 0x1f7   : > { %2856 = vst [vmem:[%s3585_s17 + $0x14f8] sm:$0xff] %v1832_v63  ;;  %v1835_v5 = vmax.f32 %v811_v2, 0.11  ;;  %v812_v6 = vld [vmem:[%s3573_s30 + $0x1518] sm:$0xff]  ;;  %v813_v7 = vld [vmem:[%s3573_s30 + $0x1520] sm:$0xff]  ;;  %v814_v8 = vld [vmem:[%s3573_s30 + $0x1528] sm:$0xff] }
 0x1f8   : > { %2857 = vst [vmem:[%s3585_s17 + $0x1500] sm:$0xff] %v1833_v3  ;;  %2858 = vst [vmem:[%s3585_s17 + $0x1508] sm:$0xff] %v1834_v4  ;;  %v1836_v9 = vmax.f32 %v812_v6, 0.11  ;;  %v1837_v10 = vmax.f32 %v813_v7, 0.11 }
 0x1f9   : > { %2859 = vst [vmem:[%s3585_s17 + $0x1510] sm:$0xff] %v1835_v5  ;;  %v1838_v11 = vmax.f32 %v814_v8, 0.11  ;;  %v815_v12 = vld [vmem:[%s3573_s30 + $0x1530] sm:$0xff]  ;;  %v816_v13 = vld [vmem:[%s3573_s30 + $0x1538] sm:$0xff]  ;;  %v817_v14 = vld [vmem:[%s3573_s30 + $0x1540] sm:$0xff] }
 0x1fa   : > { %2860 = vst [vmem:[%s3585_s17 + $0x1518] sm:$0xff] %v1836_v9  ;;  %2861 = vst [vmem:[%s3585_s17 + $0x1520] sm:$0xff] %v1837_v10  ;;  %v1839_v15 = vmax.f32 %v815_v12, 0.11  ;;  %v1840_v16 = vmax.f32 %v816_v13, 0.11 }
 0x1fb   : > { %2862 = vst [vmem:[%s3585_s17 + $0x1528] sm:$0xff] %v1838_v11  ;;  %v1841_v17 = vmax.f32 %v817_v14, 0.11  ;;  %v818_v18 = vld [vmem:[%s3573_s30 + $0x1548] sm:$0xff]  ;;  %v819_v19 = vld [vmem:[%s3573_s30 + $0x1550] sm:$0xff]  ;;  %v820_v20 = vld [vmem:[%s3573_s30 + $0x1558] sm:$0xff] }
 0x1fc   : > { %2863 = vst [vmem:[%s3585_s17 + $0x1530] sm:$0xff] %v1839_v15  ;;  %2864 = vst [vmem:[%s3585_s17 + $0x1538] sm:$0xff] %v1840_v16  ;;  %v1842_v21 = vmax.f32 %v818_v18, 0.11  ;;  %v1843_v22 = vmax.f32 %v819_v19, 0.11 }
 0x1fd   : > { %2865 = vst [vmem:[%s3585_s17 + $0x1540] sm:$0xff] %v1841_v17  ;;  %v1844_v23 = vmax.f32 %v820_v20, 0.11  ;;  %v821_v24 = vld [vmem:[%s3573_s30 + $0x1560] sm:$0xff]  ;;  %v822_v25 = vld [vmem:[%s3573_s30 + $0x1568] sm:$0xff]  ;;  %v823_v26 = vld [vmem:[%s3573_s30 + $0x1570] sm:$0xff] }
 0x1fe   : > { %2866 = vst [vmem:[%s3585_s17 + $0x1548] sm:$0xff] %v1842_v21  ;;  %2867 = vst [vmem:[%s3585_s17 + $0x1550] sm:$0xff] %v1843_v22  ;;  %v1845_v27 = vmax.f32 %v821_v24, 0.11  ;;  %v1846_v28 = vmax.f32 %v822_v25, 0.11 }
 0x1ff   : > { %2868 = vst [vmem:[%s3585_s17 + $0x1558] sm:$0xff] %v1844_v23  ;;  %v1847_v29 = vmax.f32 %v823_v26, 0.11  ;;  %v824_v30 = vld [vmem:[%s3573_s30 + $0x1578] sm:$0xff]  ;;  %v825_v31 = vld [vmem:[%s3573_s30 + $0x1580] sm:$0xff]  ;;  %v826_v32 = vld [vmem:[%s3573_s30 + $0x1588] sm:$0xff] }
 0x200   : > { %2869 = vst [vmem:[%s3585_s17 + $0x1560] sm:$0xff] %v1845_v27  ;;  %2870 = vst [vmem:[%s3585_s17 + $0x1568] sm:$0xff] %v1846_v28  ;;  %v1848_v33 = vmax.f32 %v824_v30, 0.11  ;;  %v1849_v34 = vmax.f32 %v825_v31, 0.11 }
 0x201   : > { %2871 = vst [vmem:[%s3585_s17 + $0x1570] sm:$0xff] %v1847_v29  ;;  %v1850_v35 = vmax.f32 %v826_v32, 0.11  ;;  %v827_v36 = vld [vmem:[%s3573_s30 + $0x1590] sm:$0xff]  ;;  %v828_v37 = vld [vmem:[%s3573_s30 + $0x1598] sm:$0xff]  ;;  %v829_v38 = vld [vmem:[%s3573_s30 + $0x15a0] sm:$0xff] }
 0x202   : > { %2872 = vst [vmem:[%s3585_s17 + $0x1578] sm:$0xff] %v1848_v33  ;;  %2873 = vst [vmem:[%s3585_s17 + $0x1580] sm:$0xff] %v1849_v34  ;;  %v1851_v39 = vmax.f32 %v827_v36, 0.11  ;;  %v1852_v40 = vmax.f32 %v828_v37, 0.11 }
 0x203   : > { %2874 = vst [vmem:[%s3585_s17 + $0x1588] sm:$0xff] %v1850_v35  ;;  %v1853_v41 = vmax.f32 %v829_v38, 0.11  ;;  %v830_v42 = vld [vmem:[%s3573_s30 + $0x15a8] sm:$0xff]  ;;  %v831_v43 = vld [vmem:[%s3573_s30 + $0x15b0] sm:$0xff]  ;;  %v832_v44 = vld [vmem:[%s3573_s30 + $0x15b8] sm:$0xff] }
 0x204   : > { %2875 = vst [vmem:[%s3585_s17 + $0x1590] sm:$0xff] %v1851_v39  ;;  %2876 = vst [vmem:[%s3585_s17 + $0x1598] sm:$0xff] %v1852_v40  ;;  %v1854_v45 = vmax.f32 %v830_v42, 0.11  ;;  %v1855_v46 = vmax.f32 %v831_v43, 0.11 }
 0x205   : > { %2877 = vst [vmem:[%s3585_s17 + $0x15a0] sm:$0xff] %v1853_v41  ;;  %v1856_v47 = vmax.f32 %v832_v44, 0.11  ;;  %v833_v48 = vld [vmem:[%s3573_s30 + $0x15c0] sm:$0xff]  ;;  %v834_v49 = vld [vmem:[%s3573_s30 + $0x15c8] sm:$0xff]  ;;  %v835_v50 = vld [vmem:[%s3573_s30 + $0x15d0] sm:$0xff] }
 0x206   : > { %2878 = vst [vmem:[%s3585_s17 + $0x15a8] sm:$0xff] %v1854_v45  ;;  %2879 = vst [vmem:[%s3585_s17 + $0x15b0] sm:$0xff] %v1855_v46  ;;  %v1857_v51 = vmax.f32 %v833_v48, 0.11  ;;  %v1858_v52 = vmax.f32 %v834_v49, 0.11 }
 0x207   : > { %2880 = vst [vmem:[%s3585_s17 + $0x15b8] sm:$0xff] %v1856_v47  ;;  %v1859_v53 = vmax.f32 %v835_v50, 0.11  ;;  %v836_v54 = vld [vmem:[%s3573_s30 + $0x15d8] sm:$0xff]  ;;  %v837_v55 = vld [vmem:[%s3573_s30 + $0x15e0] sm:$0xff]  ;;  %v838_v56 = vld [vmem:[%s3573_s30 + $0x15e8] sm:$0xff] }
 0x208   : > { %2881 = vst [vmem:[%s3585_s17 + $0x15c0] sm:$0xff] %v1857_v51  ;;  %2882 = vst [vmem:[%s3585_s17 + $0x15c8] sm:$0xff] %v1858_v52  ;;  %v1860_v57 = vmax.f32 %v836_v54, 0.11  ;;  %v1861_v58 = vmax.f32 %v837_v55, 0.11 }
 0x209   : > { %2883 = vst [vmem:[%s3585_s17 + $0x15d0] sm:$0xff] %v1859_v53  ;;  %v1862_v59 = vmax.f32 %v838_v56, 0.11  ;;  %v839_v60 = vld [vmem:[%s3573_s30 + $0x15f0] sm:$0xff]  ;;  %v840_v61 = vld [vmem:[%s3573_s30 + $0x15f8] sm:$0xff]  ;;  %v841_v62 = vld [vmem:[%s3573_s30 + $0x1600] sm:$0xff] }
 0x20a   : > { %2884 = vst [vmem:[%s3585_s17 + $0x15d8] sm:$0xff] %v1860_v57  ;;  %2885 = vst [vmem:[%s3585_s17 + $0x15e0] sm:$0xff] %v1861_v58  ;;  %v1863_v63 = vmax.f32 %v839_v60, 0.11  ;;  %v1864_v0 = vmax.f32 %v840_v61, 0.11 }
 0x20b   : > { %2886 = vst [vmem:[%s3585_s17 + $0x15e8] sm:$0xff] %v1862_v59  ;;  %v1865_v1 = vmax.f32 %v841_v62, 0.11  ;;  %v842_v2 = vld [vmem:[%s3573_s30 + $0x1608] sm:$0xff]  ;;  %v843_v3 = vld [vmem:[%s3573_s30 + $0x1610] sm:$0xff]  ;;  %v844_v4 = vld [vmem:[%s3573_s30 + $0x1618] sm:$0xff] }
 0x20c   : > { %2887 = vst [vmem:[%s3585_s17 + $0x15f0] sm:$0xff] %v1863_v63  ;;  %2888 = vst [vmem:[%s3585_s17 + $0x15f8] sm:$0xff] %v1864_v0  ;;  %v1866_v5 = vmax.f32 %v842_v2, 0.11  ;;  %v1867_v6 = vmax.f32 %v843_v3, 0.11 }
 0x20d   : > { %2889 = vst [vmem:[%s3585_s17 + $0x1600] sm:$0xff] %v1865_v1  ;;  %v1868_v7 = vmax.f32 %v844_v4, 0.11  ;;  %v845_v8 = vld [vmem:[%s3573_s30 + $0x1620] sm:$0xff]  ;;  %v846_v9 = vld [vmem:[%s3573_s30 + $0x1628] sm:$0xff]  ;;  %v847_v10 = vld [vmem:[%s3573_s30 + $0x1630] sm:$0xff] }
 0x20e   : > { %2890 = vst [vmem:[%s3585_s17 + $0x1608] sm:$0xff] %v1866_v5  ;;  %2891 = vst [vmem:[%s3585_s17 + $0x1610] sm:$0xff] %v1867_v6  ;;  %v1869_v11 = vmax.f32 %v845_v8, 0.11  ;;  %v1870_v12 = vmax.f32 %v846_v9, 0.11 }
 0x20f   : > { %2892 = vst [vmem:[%s3585_s17 + $0x1618] sm:$0xff] %v1868_v7  ;;  %v1871_v13 = vmax.f32 %v847_v10, 0.11  ;;  %v848_v14 = vld [vmem:[%s3573_s30 + $0x1638] sm:$0xff]  ;;  %v849_v15 = vld [vmem:[%s3573_s30 + $0x1640] sm:$0xff]  ;;  %v850_v16 = vld [vmem:[%s3573_s30 + $0x1648] sm:$0xff] }
 0x210   : > { %2893 = vst [vmem:[%s3585_s17 + $0x1620] sm:$0xff] %v1869_v11  ;;  %2894 = vst [vmem:[%s3585_s17 + $0x1628] sm:$0xff] %v1870_v12  ;;  %v1872_v17 = vmax.f32 %v848_v14, 0.11  ;;  %v1873_v18 = vmax.f32 %v849_v15, 0.11 }
 0x211   : > { %2895 = vst [vmem:[%s3585_s17 + $0x1630] sm:$0xff] %v1871_v13  ;;  %v1874_v19 = vmax.f32 %v850_v16, 0.11  ;;  %v851_v20 = vld [vmem:[%s3573_s30 + $0x1650] sm:$0xff]  ;;  %v852_v21 = vld [vmem:[%s3573_s30 + $0x1658] sm:$0xff]  ;;  %v853_v22 = vld [vmem:[%s3573_s30 + $0x1660] sm:$0xff] }
 0x212   : > { %2896 = vst [vmem:[%s3585_s17 + $0x1638] sm:$0xff] %v1872_v17  ;;  %2897 = vst [vmem:[%s3585_s17 + $0x1640] sm:$0xff] %v1873_v18  ;;  %v1875_v23 = vmax.f32 %v851_v20, 0.11  ;;  %v1876_v24 = vmax.f32 %v852_v21, 0.11 }
 0x213   : > { %2898 = vst [vmem:[%s3585_s17 + $0x1648] sm:$0xff] %v1874_v19  ;;  %v1877_v25 = vmax.f32 %v853_v22, 0.11  ;;  %v854_v26 = vld [vmem:[%s3573_s30 + $0x1668] sm:$0xff]  ;;  %v855_v27 = vld [vmem:[%s3573_s30 + $0x1670] sm:$0xff]  ;;  %v856_v28 = vld [vmem:[%s3573_s30 + $0x1678] sm:$0xff] }
 0x214   : > { %2899 = vst [vmem:[%s3585_s17 + $0x1650] sm:$0xff] %v1875_v23  ;;  %2900 = vst [vmem:[%s3585_s17 + $0x1658] sm:$0xff] %v1876_v24  ;;  %v1878_v29 = vmax.f32 %v854_v26, 0.11  ;;  %v1879_v30 = vmax.f32 %v855_v27, 0.11 }
 0x215   : > { %2901 = vst [vmem:[%s3585_s17 + $0x1660] sm:$0xff] %v1877_v25  ;;  %v1880_v31 = vmax.f32 %v856_v28, 0.11  ;;  %v857_v32 = vld [vmem:[%s3573_s30 + $0x1680] sm:$0xff]  ;;  %v858_v33 = vld [vmem:[%s3573_s30 + $0x1688] sm:$0xff]  ;;  %v859_v34 = vld [vmem:[%s3573_s30 + $0x1690] sm:$0xff] }
 0x216   : > { %2902 = vst [vmem:[%s3585_s17 + $0x1668] sm:$0xff] %v1878_v29  ;;  %2903 = vst [vmem:[%s3585_s17 + $0x1670] sm:$0xff] %v1879_v30  ;;  %v1881_v35 = vmax.f32 %v857_v32, 0.11  ;;  %v1882_v36 = vmax.f32 %v858_v33, 0.11 }
 0x217   : > { %2904 = vst [vmem:[%s3585_s17 + $0x1678] sm:$0xff] %v1880_v31  ;;  %v1883_v37 = vmax.f32 %v859_v34, 0.11  ;;  %v860_v38 = vld [vmem:[%s3573_s30 + $0x1698] sm:$0xff]  ;;  %v861_v39 = vld [vmem:[%s3573_s30 + $0x16a0] sm:$0xff]  ;;  %v862_v40 = vld [vmem:[%s3573_s30 + $0x16a8] sm:$0xff] }
 0x218   : > { %2905 = vst [vmem:[%s3585_s17 + $0x1680] sm:$0xff] %v1881_v35  ;;  %2906 = vst [vmem:[%s3585_s17 + $0x1688] sm:$0xff] %v1882_v36  ;;  %v1884_v41 = vmax.f32 %v860_v38, 0.11  ;;  %v1885_v42 = vmax.f32 %v861_v39, 0.11 }
 0x219   : > { %2907 = vst [vmem:[%s3585_s17 + $0x1690] sm:$0xff] %v1883_v37  ;;  %v1886_v43 = vmax.f32 %v862_v40, 0.11  ;;  %v863_v44 = vld [vmem:[%s3573_s30 + $0x16b0] sm:$0xff]  ;;  %v864_v45 = vld [vmem:[%s3573_s30 + $0x16b8] sm:$0xff]  ;;  %v865_v46 = vld [vmem:[%s3573_s30 + $0x16c0] sm:$0xff] }
 0x21a   : > { %2908 = vst [vmem:[%s3585_s17 + $0x1698] sm:$0xff] %v1884_v41  ;;  %2909 = vst [vmem:[%s3585_s17 + $0x16a0] sm:$0xff] %v1885_v42  ;;  %v1887_v47 = vmax.f32 %v863_v44, 0.11  ;;  %v1888_v48 = vmax.f32 %v864_v45, 0.11 }
 0x21b   : > { %2910 = vst [vmem:[%s3585_s17 + $0x16a8] sm:$0xff] %v1886_v43  ;;  %v1889_v49 = vmax.f32 %v865_v46, 0.11  ;;  %v866_v50 = vld [vmem:[%s3573_s30 + $0x16c8] sm:$0xff]  ;;  %v867_v51 = vld [vmem:[%s3573_s30 + $0x16d0] sm:$0xff]  ;;  %v868_v52 = vld [vmem:[%s3573_s30 + $0x16d8] sm:$0xff] }
 0x21c   : > { %2911 = vst [vmem:[%s3585_s17 + $0x16b0] sm:$0xff] %v1887_v47  ;;  %2912 = vst [vmem:[%s3585_s17 + $0x16b8] sm:$0xff] %v1888_v48  ;;  %v1890_v53 = vmax.f32 %v866_v50, 0.11  ;;  %v1891_v54 = vmax.f32 %v867_v51, 0.11 }
 0x21d   : > { %2913 = vst [vmem:[%s3585_s17 + $0x16c0] sm:$0xff] %v1889_v49  ;;  %v1892_v55 = vmax.f32 %v868_v52, 0.11  ;;  %v869_v56 = vld [vmem:[%s3573_s30 + $0x16e0] sm:$0xff]  ;;  %v870_v57 = vld [vmem:[%s3573_s30 + $0x16e8] sm:$0xff]  ;;  %v871_v58 = vld [vmem:[%s3573_s30 + $0x16f0] sm:$0xff] }
 0x21e   : > { %2914 = vst [vmem:[%s3585_s17 + $0x16c8] sm:$0xff] %v1890_v53  ;;  %2915 = vst [vmem:[%s3585_s17 + $0x16d0] sm:$0xff] %v1891_v54  ;;  %v1893_v59 = vmax.f32 %v869_v56, 0.11  ;;  %v1894_v60 = vmax.f32 %v870_v57, 0.11 }
 0x21f   : > { %2916 = vst [vmem:[%s3585_s17 + $0x16d8] sm:$0xff] %v1892_v55  ;;  %v1895_v61 = vmax.f32 %v871_v58, 0.11  ;;  %v872_v62 = vld [vmem:[%s3573_s30 + $0x16f8] sm:$0xff]  ;;  %v873_v63 = vld [vmem:[%s3573_s30 + $0x1700] sm:$0xff]  ;;  %v874_v0 = vld [vmem:[%s3573_s30 + $0x1708] sm:$0xff] }
 0x220   : > { %2917 = vst [vmem:[%s3585_s17 + $0x16e0] sm:$0xff] %v1893_v59  ;;  %2918 = vst [vmem:[%s3585_s17 + $0x16e8] sm:$0xff] %v1894_v60  ;;  %v1896_v1 = vmax.f32 %v872_v62, 0.11  ;;  %v1897_v2 = vmax.f32 %v873_v63, 0.11 }
 0x221   : > { %2919 = vst [vmem:[%s3585_s17 + $0x16f0] sm:$0xff] %v1895_v61  ;;  %v1898_v3 = vmax.f32 %v874_v0, 0.11  ;;  %v875_v4 = vld [vmem:[%s3573_s30 + $0x1710] sm:$0xff]  ;;  %v876_v5 = vld [vmem:[%s3573_s30 + $0x1718] sm:$0xff]  ;;  %v877_v6 = vld [vmem:[%s3573_s30 + $0x1720] sm:$0xff] }
 0x222   : > { %2920 = vst [vmem:[%s3585_s17 + $0x16f8] sm:$0xff] %v1896_v1  ;;  %2921 = vst [vmem:[%s3585_s17 + $0x1700] sm:$0xff] %v1897_v2  ;;  %v1899_v7 = vmax.f32 %v875_v4, 0.11  ;;  %v1900_v8 = vmax.f32 %v876_v5, 0.11 }
 0x223   : > { %2922 = vst [vmem:[%s3585_s17 + $0x1708] sm:$0xff] %v1898_v3  ;;  %v1901_v9 = vmax.f32 %v877_v6, 0.11  ;;  %v878_v10 = vld [vmem:[%s3573_s30 + $0x1728] sm:$0xff]  ;;  %v879_v11 = vld [vmem:[%s3573_s30 + $0x1730] sm:$0xff]  ;;  %v880_v12 = vld [vmem:[%s3573_s30 + $0x1738] sm:$0xff] }
 0x224   : > { %2923 = vst [vmem:[%s3585_s17 + $0x1710] sm:$0xff] %v1899_v7  ;;  %2924 = vst [vmem:[%s3585_s17 + $0x1718] sm:$0xff] %v1900_v8  ;;  %v1902_v13 = vmax.f32 %v878_v10, 0.11  ;;  %v1903_v14 = vmax.f32 %v879_v11, 0.11 }
 0x225   : > { %2925 = vst [vmem:[%s3585_s17 + $0x1720] sm:$0xff] %v1901_v9  ;;  %v1904_v15 = vmax.f32 %v880_v12, 0.11  ;;  %v881_v16 = vld [vmem:[%s3573_s30 + $0x1740] sm:$0xff]  ;;  %v882_v17 = vld [vmem:[%s3573_s30 + $0x1748] sm:$0xff]  ;;  %v883_v18 = vld [vmem:[%s3573_s30 + $0x1750] sm:$0xff] }
 0x226   : > { %2926 = vst [vmem:[%s3585_s17 + $0x1728] sm:$0xff] %v1902_v13  ;;  %2927 = vst [vmem:[%s3585_s17 + $0x1730] sm:$0xff] %v1903_v14  ;;  %v1905_v19 = vmax.f32 %v881_v16, 0.11  ;;  %v1906_v20 = vmax.f32 %v882_v17, 0.11 }
 0x227   : > { %2928 = vst [vmem:[%s3585_s17 + $0x1738] sm:$0xff] %v1904_v15  ;;  %v1907_v21 = vmax.f32 %v883_v18, 0.11  ;;  %v884_v22 = vld [vmem:[%s3573_s30 + $0x1758] sm:$0xff]  ;;  %v885_v23 = vld [vmem:[%s3573_s30 + $0x1760] sm:$0xff]  ;;  %v886_v24 = vld [vmem:[%s3573_s30 + $0x1768] sm:$0xff] }
 0x228   : > { %2929 = vst [vmem:[%s3585_s17 + $0x1740] sm:$0xff] %v1905_v19  ;;  %2930 = vst [vmem:[%s3585_s17 + $0x1748] sm:$0xff] %v1906_v20  ;;  %v1908_v25 = vmax.f32 %v884_v22, 0.11  ;;  %v1909_v26 = vmax.f32 %v885_v23, 0.11 }
 0x229   : > { %2931 = vst [vmem:[%s3585_s17 + $0x1750] sm:$0xff] %v1907_v21  ;;  %v1910_v27 = vmax.f32 %v886_v24, 0.11  ;;  %v887_v28 = vld [vmem:[%s3573_s30 + $0x1770] sm:$0xff]  ;;  %v888_v29 = vld [vmem:[%s3573_s30 + $0x1778] sm:$0xff]  ;;  %v889_v30 = vld [vmem:[%s3573_s30 + $0x1780] sm:$0xff] }
 0x22a   : > { %2932 = vst [vmem:[%s3585_s17 + $0x1758] sm:$0xff] %v1908_v25  ;;  %2933 = vst [vmem:[%s3585_s17 + $0x1760] sm:$0xff] %v1909_v26  ;;  %v1911_v31 = vmax.f32 %v887_v28, 0.11  ;;  %v1912_v32 = vmax.f32 %v888_v29, 0.11 }
 0x22b   : > { %2934 = vst [vmem:[%s3585_s17 + $0x1768] sm:$0xff] %v1910_v27  ;;  %v1913_v33 = vmax.f32 %v889_v30, 0.11  ;;  %v890_v34 = vld [vmem:[%s3573_s30 + $0x1788] sm:$0xff]  ;;  %v891_v35 = vld [vmem:[%s3573_s30 + $0x1790] sm:$0xff]  ;;  %v892_v36 = vld [vmem:[%s3573_s30 + $0x1798] sm:$0xff] }
 0x22c   : > { %2935 = vst [vmem:[%s3585_s17 + $0x1770] sm:$0xff] %v1911_v31  ;;  %2936 = vst [vmem:[%s3585_s17 + $0x1778] sm:$0xff] %v1912_v32  ;;  %v1914_v37 = vmax.f32 %v890_v34, 0.11  ;;  %v1915_v38 = vmax.f32 %v891_v35, 0.11 }
 0x22d   : > { %2937 = vst [vmem:[%s3585_s17 + $0x1780] sm:$0xff] %v1913_v33  ;;  %v1916_v39 = vmax.f32 %v892_v36, 0.11  ;;  %v893_v40 = vld [vmem:[%s3573_s30 + $0x17a0] sm:$0xff]  ;;  %v894_v41 = vld [vmem:[%s3573_s30 + $0x17a8] sm:$0xff]  ;;  %v895_v42 = vld [vmem:[%s3573_s30 + $0x17b0] sm:$0xff] }
 0x22e   : > { %2938 = vst [vmem:[%s3585_s17 + $0x1788] sm:$0xff] %v1914_v37  ;;  %2939 = vst [vmem:[%s3585_s17 + $0x1790] sm:$0xff] %v1915_v38  ;;  %v1917_v43 = vmax.f32 %v893_v40, 0.11  ;;  %v1918_v44 = vmax.f32 %v894_v41, 0.11 }
 0x22f   : > { %2940 = vst [vmem:[%s3585_s17 + $0x1798] sm:$0xff] %v1916_v39  ;;  %v1919_v45 = vmax.f32 %v895_v42, 0.11  ;;  %v896_v46 = vld [vmem:[%s3573_s30 + $0x17b8] sm:$0xff]  ;;  %v897_v47 = vld [vmem:[%s3573_s30 + $0x17c0] sm:$0xff]  ;;  %v898_v48 = vld [vmem:[%s3573_s30 + $0x17c8] sm:$0xff] }
 0x230   : > { %2941 = vst [vmem:[%s3585_s17 + $0x17a0] sm:$0xff] %v1917_v43  ;;  %2942 = vst [vmem:[%s3585_s17 + $0x17a8] sm:$0xff] %v1918_v44  ;;  %v1920_v49 = vmax.f32 %v896_v46, 0.11  ;;  %v1921_v50 = vmax.f32 %v897_v47, 0.11 }
 0x231   : > { %2943 = vst [vmem:[%s3585_s17 + $0x17b0] sm:$0xff] %v1919_v45  ;;  %v1922_v51 = vmax.f32 %v898_v48, 0.11  ;;  %v899_v52 = vld [vmem:[%s3573_s30 + $0x17d0] sm:$0xff]  ;;  %v900_v53 = vld [vmem:[%s3573_s30 + $0x17d8] sm:$0xff]  ;;  %v901_v54 = vld [vmem:[%s3573_s30 + $0x17e0] sm:$0xff] }
 0x232   : > { %2944 = vst [vmem:[%s3585_s17 + $0x17b8] sm:$0xff] %v1920_v49  ;;  %2945 = vst [vmem:[%s3585_s17 + $0x17c0] sm:$0xff] %v1921_v50  ;;  %v1923_v55 = vmax.f32 %v899_v52, 0.11  ;;  %v1924_v56 = vmax.f32 %v900_v53, 0.11 }
 0x233   : > { %2946 = vst [vmem:[%s3585_s17 + $0x17c8] sm:$0xff] %v1922_v51  ;;  %v1925_v57 = vmax.f32 %v901_v54, 0.11  ;;  %v902_v58 = vld [vmem:[%s3573_s30 + $0x17e8] sm:$0xff]  ;;  %v903_v59 = vld [vmem:[%s3573_s30 + $0x17f0] sm:$0xff]  ;;  %v904_v60 = vld [vmem:[%s3573_s30 + $0x17f8] sm:$0xff] }
 0x234   : > { %2947 = vst [vmem:[%s3585_s17 + $0x17d0] sm:$0xff] %v1923_v55  ;;  %2948 = vst [vmem:[%s3585_s17 + $0x17d8] sm:$0xff] %v1924_v56  ;;  %v1926_v61 = vmax.f32 %v902_v58, 0.11  ;;  %v1927_v62 = vmax.f32 %v903_v59, 0.11 }
 0x235   : > { %2949 = vst [vmem:[%s3585_s17 + $0x17e0] sm:$0xff] %v1925_v57  ;;  %v1928_v63 = vmax.f32 %v904_v60, 0.11  ;;  %v905_v0 = vld [vmem:[%s3573_s30 + $0x1800] sm:$0xff]  ;;  %v906_v1 = vld [vmem:[%s3573_s30 + $0x1808] sm:$0xff]  ;;  %v907_v2 = vld [vmem:[%s3573_s30 + $0x1810] sm:$0xff] }
 0x236   : > { %2950 = vst [vmem:[%s3585_s17 + $0x17e8] sm:$0xff] %v1926_v61  ;;  %2951 = vst [vmem:[%s3585_s17 + $0x17f0] sm:$0xff] %v1927_v62  ;;  %v1929_v3 = vmax.f32 %v905_v0, 0.11  ;;  %v1930_v4 = vmax.f32 %v906_v1, 0.11 }
 0x237   : > { %2952 = vst [vmem:[%s3585_s17 + $0x17f8] sm:$0xff] %v1928_v63  ;;  %v1931_v5 = vmax.f32 %v907_v2, 0.11  ;;  %v908_v6 = vld [vmem:[%s3573_s30 + $0x1818] sm:$0xff]  ;;  %v909_v7 = vld [vmem:[%s3573_s30 + $0x1820] sm:$0xff]  ;;  %v910_v8 = vld [vmem:[%s3573_s30 + $0x1828] sm:$0xff] }
 0x238   : > { %2953 = vst [vmem:[%s3585_s17 + $0x1800] sm:$0xff] %v1929_v3  ;;  %2954 = vst [vmem:[%s3585_s17 + $0x1808] sm:$0xff] %v1930_v4  ;;  %v1932_v9 = vmax.f32 %v908_v6, 0.11  ;;  %v1933_v10 = vmax.f32 %v909_v7, 0.11 }
 0x239   : > { %2955 = vst [vmem:[%s3585_s17 + $0x1810] sm:$0xff] %v1931_v5  ;;  %v1934_v11 = vmax.f32 %v910_v8, 0.11  ;;  %v911_v12 = vld [vmem:[%s3573_s30 + $0x1830] sm:$0xff]  ;;  %v912_v13 = vld [vmem:[%s3573_s30 + $0x1838] sm:$0xff]  ;;  %v913_v14 = vld [vmem:[%s3573_s30 + $0x1840] sm:$0xff] }
 0x23a   : > { %2956 = vst [vmem:[%s3585_s17 + $0x1818] sm:$0xff] %v1932_v9  ;;  %2957 = vst [vmem:[%s3585_s17 + $0x1820] sm:$0xff] %v1933_v10  ;;  %v1935_v15 = vmax.f32 %v911_v12, 0.11  ;;  %v1936_v16 = vmax.f32 %v912_v13, 0.11 }
 0x23b   : > { %2958 = vst [vmem:[%s3585_s17 + $0x1828] sm:$0xff] %v1934_v11  ;;  %v1937_v17 = vmax.f32 %v913_v14, 0.11  ;;  %v914_v18 = vld [vmem:[%s3573_s30 + $0x1848] sm:$0xff]  ;;  %v915_v19 = vld [vmem:[%s3573_s30 + $0x1850] sm:$0xff]  ;;  %v916_v20 = vld [vmem:[%s3573_s30 + $0x1858] sm:$0xff] }
 0x23c   : > { %2959 = vst [vmem:[%s3585_s17 + $0x1830] sm:$0xff] %v1935_v15  ;;  %2960 = vst [vmem:[%s3585_s17 + $0x1838] sm:$0xff] %v1936_v16  ;;  %v1938_v21 = vmax.f32 %v914_v18, 0.11  ;;  %v1939_v22 = vmax.f32 %v915_v19, 0.11 }
 0x23d   : > { %2961 = vst [vmem:[%s3585_s17 + $0x1840] sm:$0xff] %v1937_v17  ;;  %v1940_v23 = vmax.f32 %v916_v20, 0.11  ;;  %v917_v24 = vld [vmem:[%s3573_s30 + $0x1860] sm:$0xff]  ;;  %v918_v25 = vld [vmem:[%s3573_s30 + $0x1868] sm:$0xff]  ;;  %v919_v26 = vld [vmem:[%s3573_s30 + $0x1870] sm:$0xff] }
 0x23e   : > { %2962 = vst [vmem:[%s3585_s17 + $0x1848] sm:$0xff] %v1938_v21  ;;  %2963 = vst [vmem:[%s3585_s17 + $0x1850] sm:$0xff] %v1939_v22  ;;  %v1941_v27 = vmax.f32 %v917_v24, 0.11  ;;  %v1942_v28 = vmax.f32 %v918_v25, 0.11 }
 0x23f   : > { %2964 = vst [vmem:[%s3585_s17 + $0x1858] sm:$0xff] %v1940_v23  ;;  %v1943_v29 = vmax.f32 %v919_v26, 0.11  ;;  %v920_v30 = vld [vmem:[%s3573_s30 + $0x1878] sm:$0xff]  ;;  %v921_v31 = vld [vmem:[%s3573_s30 + $0x1880] sm:$0xff]  ;;  %v922_v32 = vld [vmem:[%s3573_s30 + $0x1888] sm:$0xff] }
 0x240   : > { %2965 = vst [vmem:[%s3585_s17 + $0x1860] sm:$0xff] %v1941_v27  ;;  %2966 = vst [vmem:[%s3585_s17 + $0x1868] sm:$0xff] %v1942_v28  ;;  %v1944_v33 = vmax.f32 %v920_v30, 0.11  ;;  %v1945_v34 = vmax.f32 %v921_v31, 0.11 }
 0x241   : > { %2967 = vst [vmem:[%s3585_s17 + $0x1870] sm:$0xff] %v1943_v29  ;;  %v1946_v35 = vmax.f32 %v922_v32, 0.11  ;;  %v923_v36 = vld [vmem:[%s3573_s30 + $0x1890] sm:$0xff]  ;;  %v924_v37 = vld [vmem:[%s3573_s30 + $0x1898] sm:$0xff]  ;;  %v925_v38 = vld [vmem:[%s3573_s30 + $0x18a0] sm:$0xff] }
 0x242   : > { %2968 = vst [vmem:[%s3585_s17 + $0x1878] sm:$0xff] %v1944_v33  ;;  %2969 = vst [vmem:[%s3585_s17 + $0x1880] sm:$0xff] %v1945_v34  ;;  %v1947_v39 = vmax.f32 %v923_v36, 0.11  ;;  %v1948_v40 = vmax.f32 %v924_v37, 0.11 }
 0x243   : > { %2970 = vst [vmem:[%s3585_s17 + $0x1888] sm:$0xff] %v1946_v35  ;;  %v1949_v41 = vmax.f32 %v925_v38, 0.11  ;;  %v926_v42 = vld [vmem:[%s3573_s30 + $0x18a8] sm:$0xff]  ;;  %v927_v43 = vld [vmem:[%s3573_s30 + $0x18b0] sm:$0xff]  ;;  %v928_v44 = vld [vmem:[%s3573_s30 + $0x18b8] sm:$0xff] }
 0x244   : > { %2971 = vst [vmem:[%s3585_s17 + $0x1890] sm:$0xff] %v1947_v39  ;;  %2972 = vst [vmem:[%s3585_s17 + $0x1898] sm:$0xff] %v1948_v40  ;;  %v1950_v45 = vmax.f32 %v926_v42, 0.11  ;;  %v1951_v46 = vmax.f32 %v927_v43, 0.11 }
 0x245   : > { %2973 = vst [vmem:[%s3585_s17 + $0x18a0] sm:$0xff] %v1949_v41  ;;  %v1952_v47 = vmax.f32 %v928_v44, 0.11  ;;  %v929_v48 = vld [vmem:[%s3573_s30 + $0x18c0] sm:$0xff]  ;;  %v930_v49 = vld [vmem:[%s3573_s30 + $0x18c8] sm:$0xff]  ;;  %v931_v50 = vld [vmem:[%s3573_s30 + $0x18d0] sm:$0xff] }
 0x246   : > { %2974 = vst [vmem:[%s3585_s17 + $0x18a8] sm:$0xff] %v1950_v45  ;;  %2975 = vst [vmem:[%s3585_s17 + $0x18b0] sm:$0xff] %v1951_v46  ;;  %v1953_v51 = vmax.f32 %v929_v48, 0.11  ;;  %v1954_v52 = vmax.f32 %v930_v49, 0.11 }
 0x247   : > { %2976 = vst [vmem:[%s3585_s17 + $0x18b8] sm:$0xff] %v1952_v47  ;;  %v1955_v53 = vmax.f32 %v931_v50, 0.11  ;;  %v932_v54 = vld [vmem:[%s3573_s30 + $0x18d8] sm:$0xff]  ;;  %v933_v55 = vld [vmem:[%s3573_s30 + $0x18e0] sm:$0xff]  ;;  %v934_v56 = vld [vmem:[%s3573_s30 + $0x18e8] sm:$0xff] }
 0x248   : > { %2977 = vst [vmem:[%s3585_s17 + $0x18c0] sm:$0xff] %v1953_v51  ;;  %2978 = vst [vmem:[%s3585_s17 + $0x18c8] sm:$0xff] %v1954_v52  ;;  %v1956_v57 = vmax.f32 %v932_v54, 0.11  ;;  %v1957_v58 = vmax.f32 %v933_v55, 0.11 }
 0x249   : > { %2979 = vst [vmem:[%s3585_s17 + $0x18d0] sm:$0xff] %v1955_v53  ;;  %v1958_v59 = vmax.f32 %v934_v56, 0.11  ;;  %v935_v60 = vld [vmem:[%s3573_s30 + $0x18f0] sm:$0xff]  ;;  %v936_v61 = vld [vmem:[%s3573_s30 + $0x18f8] sm:$0xff]  ;;  %v937_v62 = vld [vmem:[%s3573_s30 + $0x1900] sm:$0xff] }
 0x24a   : > { %2980 = vst [vmem:[%s3585_s17 + $0x18d8] sm:$0xff] %v1956_v57  ;;  %2981 = vst [vmem:[%s3585_s17 + $0x18e0] sm:$0xff] %v1957_v58  ;;  %v1959_v63 = vmax.f32 %v935_v60, 0.11  ;;  %v1960_v0 = vmax.f32 %v936_v61, 0.11 }
 0x24b   : > { %2982 = vst [vmem:[%s3585_s17 + $0x18e8] sm:$0xff] %v1958_v59  ;;  %v1961_v1 = vmax.f32 %v937_v62, 0.11  ;;  %v938_v2 = vld [vmem:[%s3573_s30 + $0x1908] sm:$0xff]  ;;  %v939_v3 = vld [vmem:[%s3573_s30 + $0x1910] sm:$0xff]  ;;  %v940_v4 = vld [vmem:[%s3573_s30 + $0x1918] sm:$0xff] }
 0x24c   : > { %2983 = vst [vmem:[%s3585_s17 + $0x18f0] sm:$0xff] %v1959_v63  ;;  %2984 = vst [vmem:[%s3585_s17 + $0x18f8] sm:$0xff] %v1960_v0  ;;  %v1962_v5 = vmax.f32 %v938_v2, 0.11  ;;  %v1963_v6 = vmax.f32 %v939_v3, 0.11 }
 0x24d   : > { %2985 = vst [vmem:[%s3585_s17 + $0x1900] sm:$0xff] %v1961_v1  ;;  %v1964_v7 = vmax.f32 %v940_v4, 0.11  ;;  %v941_v8 = vld [vmem:[%s3573_s30 + $0x1920] sm:$0xff]  ;;  %v942_v9 = vld [vmem:[%s3573_s30 + $0x1928] sm:$0xff]  ;;  %v943_v10 = vld [vmem:[%s3573_s30 + $0x1930] sm:$0xff] }
 0x24e   : > { %2986 = vst [vmem:[%s3585_s17 + $0x1908] sm:$0xff] %v1962_v5  ;;  %2987 = vst [vmem:[%s3585_s17 + $0x1910] sm:$0xff] %v1963_v6  ;;  %v1965_v11 = vmax.f32 %v941_v8, 0.11  ;;  %v1966_v12 = vmax.f32 %v942_v9, 0.11 }
 0x24f   : > { %2988 = vst [vmem:[%s3585_s17 + $0x1918] sm:$0xff] %v1964_v7  ;;  %v1967_v13 = vmax.f32 %v943_v10, 0.11  ;;  %v944_v14 = vld [vmem:[%s3573_s30 + $0x1938] sm:$0xff]  ;;  %v945_v15 = vld [vmem:[%s3573_s30 + $0x1940] sm:$0xff]  ;;  %v946_v16 = vld [vmem:[%s3573_s30 + $0x1948] sm:$0xff] }
 0x250   : > { %2989 = vst [vmem:[%s3585_s17 + $0x1920] sm:$0xff] %v1965_v11  ;;  %2990 = vst [vmem:[%s3585_s17 + $0x1928] sm:$0xff] %v1966_v12  ;;  %v1968_v17 = vmax.f32 %v944_v14, 0.11  ;;  %v1969_v18 = vmax.f32 %v945_v15, 0.11 }
 0x251   : > { %2991 = vst [vmem:[%s3585_s17 + $0x1930] sm:$0xff] %v1967_v13  ;;  %v1970_v19 = vmax.f32 %v946_v16, 0.11  ;;  %v947_v20 = vld [vmem:[%s3573_s30 + $0x1950] sm:$0xff]  ;;  %v948_v21 = vld [vmem:[%s3573_s30 + $0x1958] sm:$0xff]  ;;  %v949_v22 = vld [vmem:[%s3573_s30 + $0x1960] sm:$0xff] }
 0x252   : > { %2992 = vst [vmem:[%s3585_s17 + $0x1938] sm:$0xff] %v1968_v17  ;;  %2993 = vst [vmem:[%s3585_s17 + $0x1940] sm:$0xff] %v1969_v18  ;;  %v1971_v23 = vmax.f32 %v947_v20, 0.11  ;;  %v1972_v24 = vmax.f32 %v948_v21, 0.11 }
 0x253   : > { %2994 = vst [vmem:[%s3585_s17 + $0x1948] sm:$0xff] %v1970_v19  ;;  %v1973_v25 = vmax.f32 %v949_v22, 0.11  ;;  %v950_v26 = vld [vmem:[%s3573_s30 + $0x1968] sm:$0xff]  ;;  %v951_v27 = vld [vmem:[%s3573_s30 + $0x1970] sm:$0xff]  ;;  %v952_v28 = vld [vmem:[%s3573_s30 + $0x1978] sm:$0xff] }
 0x254   : > { %2995 = vst [vmem:[%s3585_s17 + $0x1950] sm:$0xff] %v1971_v23  ;;  %2996 = vst [vmem:[%s3585_s17 + $0x1958] sm:$0xff] %v1972_v24  ;;  %v1974_v29 = vmax.f32 %v950_v26, 0.11  ;;  %v1975_v30 = vmax.f32 %v951_v27, 0.11 }
 0x255   : > { %2997 = vst [vmem:[%s3585_s17 + $0x1960] sm:$0xff] %v1973_v25  ;;  %v1976_v31 = vmax.f32 %v952_v28, 0.11  ;;  %v953_v32 = vld [vmem:[%s3573_s30 + $0x1980] sm:$0xff]  ;;  %v954_v33 = vld [vmem:[%s3573_s30 + $0x1988] sm:$0xff]  ;;  %v955_v34 = vld [vmem:[%s3573_s30 + $0x1990] sm:$0xff] }
 0x256   : > { %2998 = vst [vmem:[%s3585_s17 + $0x1968] sm:$0xff] %v1974_v29  ;;  %2999 = vst [vmem:[%s3585_s17 + $0x1970] sm:$0xff] %v1975_v30  ;;  %v1977_v35 = vmax.f32 %v953_v32, 0.11  ;;  %v1978_v36 = vmax.f32 %v954_v33, 0.11 }
 0x257   : > { %3000 = vst [vmem:[%s3585_s17 + $0x1978] sm:$0xff] %v1976_v31  ;;  %v1979_v37 = vmax.f32 %v955_v34, 0.11  ;;  %v956_v38 = vld [vmem:[%s3573_s30 + $0x1998] sm:$0xff]  ;;  %v957_v39 = vld [vmem:[%s3573_s30 + $0x19a0] sm:$0xff]  ;;  %v958_v40 = vld [vmem:[%s3573_s30 + $0x19a8] sm:$0xff] }
 0x258   : > { %3001 = vst [vmem:[%s3585_s17 + $0x1980] sm:$0xff] %v1977_v35  ;;  %3002 = vst [vmem:[%s3585_s17 + $0x1988] sm:$0xff] %v1978_v36  ;;  %v1980_v41 = vmax.f32 %v956_v38, 0.11  ;;  %v1981_v42 = vmax.f32 %v957_v39, 0.11 }
 0x259   : > { %3003 = vst [vmem:[%s3585_s17 + $0x1990] sm:$0xff] %v1979_v37  ;;  %v1982_v43 = vmax.f32 %v958_v40, 0.11  ;;  %v959_v44 = vld [vmem:[%s3573_s30 + $0x19b0] sm:$0xff]  ;;  %v960_v45 = vld [vmem:[%s3573_s30 + $0x19b8] sm:$0xff]  ;;  %v961_v46 = vld [vmem:[%s3573_s30 + $0x19c0] sm:$0xff] }
 0x25a   : > { %3004 = vst [vmem:[%s3585_s17 + $0x1998] sm:$0xff] %v1980_v41  ;;  %3005 = vst [vmem:[%s3585_s17 + $0x19a0] sm:$0xff] %v1981_v42  ;;  %v1983_v47 = vmax.f32 %v959_v44, 0.11  ;;  %v1984_v48 = vmax.f32 %v960_v45, 0.11 }
 0x25b   : > { %3006 = vst [vmem:[%s3585_s17 + $0x19a8] sm:$0xff] %v1982_v43  ;;  %v1985_v49 = vmax.f32 %v961_v46, 0.11  ;;  %v962_v50 = vld [vmem:[%s3573_s30 + $0x19c8] sm:$0xff]  ;;  %v963_v51 = vld [vmem:[%s3573_s30 + $0x19d0] sm:$0xff]  ;;  %v964_v52 = vld [vmem:[%s3573_s30 + $0x19d8] sm:$0xff] }
 0x25c   : > { %3007 = vst [vmem:[%s3585_s17 + $0x19b0] sm:$0xff] %v1983_v47  ;;  %3008 = vst [vmem:[%s3585_s17 + $0x19b8] sm:$0xff] %v1984_v48  ;;  %v1986_v53 = vmax.f32 %v962_v50, 0.11  ;;  %v1987_v54 = vmax.f32 %v963_v51, 0.11 }
 0x25d   : > { %3009 = vst [vmem:[%s3585_s17 + $0x19c0] sm:$0xff] %v1985_v49  ;;  %v1988_v55 = vmax.f32 %v964_v52, 0.11  ;;  %v965_v56 = vld [vmem:[%s3573_s30 + $0x19e0] sm:$0xff]  ;;  %v966_v57 = vld [vmem:[%s3573_s30 + $0x19e8] sm:$0xff]  ;;  %v967_v58 = vld [vmem:[%s3573_s30 + $0x19f0] sm:$0xff] }
 0x25e   : > { %3010 = vst [vmem:[%s3585_s17 + $0x19c8] sm:$0xff] %v1986_v53  ;;  %3011 = vst [vmem:[%s3585_s17 + $0x19d0] sm:$0xff] %v1987_v54  ;;  %v1989_v59 = vmax.f32 %v965_v56, 0.11  ;;  %v1990_v60 = vmax.f32 %v966_v57, 0.11 }
 0x25f   : > { %3012 = vst [vmem:[%s3585_s17 + $0x19d8] sm:$0xff] %v1988_v55  ;;  %v1991_v61 = vmax.f32 %v967_v58, 0.11  ;;  %v968_v62 = vld [vmem:[%s3573_s30 + $0x19f8] sm:$0xff]  ;;  %v969_v63 = vld [vmem:[%s3573_s30 + $0x1a00] sm:$0xff]  ;;  %v970_v0 = vld [vmem:[%s3573_s30 + $0x1a08] sm:$0xff] }
 0x260   : > { %3013 = vst [vmem:[%s3585_s17 + $0x19e0] sm:$0xff] %v1989_v59  ;;  %3014 = vst [vmem:[%s3585_s17 + $0x19e8] sm:$0xff] %v1990_v60  ;;  %v1992_v1 = vmax.f32 %v968_v62, 0.11  ;;  %v1993_v2 = vmax.f32 %v969_v63, 0.11 }
 0x261   : > { %3015 = vst [vmem:[%s3585_s17 + $0x19f0] sm:$0xff] %v1991_v61  ;;  %v1994_v3 = vmax.f32 %v970_v0, 0.11  ;;  %v971_v4 = vld [vmem:[%s3573_s30 + $0x1a10] sm:$0xff]  ;;  %v972_v5 = vld [vmem:[%s3573_s30 + $0x1a18] sm:$0xff]  ;;  %v973_v6 = vld [vmem:[%s3573_s30 + $0x1a20] sm:$0xff] }
 0x262   : > { %3016 = vst [vmem:[%s3585_s17 + $0x19f8] sm:$0xff] %v1992_v1  ;;  %3017 = vst [vmem:[%s3585_s17 + $0x1a00] sm:$0xff] %v1993_v2  ;;  %v1995_v7 = vmax.f32 %v971_v4, 0.11  ;;  %v1996_v8 = vmax.f32 %v972_v5, 0.11 }
 0x263   : > { %3018 = vst [vmem:[%s3585_s17 + $0x1a08] sm:$0xff] %v1994_v3  ;;  %v1997_v9 = vmax.f32 %v973_v6, 0.11  ;;  %v974_v10 = vld [vmem:[%s3573_s30 + $0x1a28] sm:$0xff]  ;;  %v975_v11 = vld [vmem:[%s3573_s30 + $0x1a30] sm:$0xff]  ;;  %v976_v12 = vld [vmem:[%s3573_s30 + $0x1a38] sm:$0xff] }
 0x264   : > { %3019 = vst [vmem:[%s3585_s17 + $0x1a10] sm:$0xff] %v1995_v7  ;;  %3020 = vst [vmem:[%s3585_s17 + $0x1a18] sm:$0xff] %v1996_v8  ;;  %v1998_v13 = vmax.f32 %v974_v10, 0.11  ;;  %v1999_v14 = vmax.f32 %v975_v11, 0.11 }
 0x265   : > { %3021 = vst [vmem:[%s3585_s17 + $0x1a20] sm:$0xff] %v1997_v9  ;;  %v2000_v15 = vmax.f32 %v976_v12, 0.11  ;;  %v977_v16 = vld [vmem:[%s3573_s30 + $0x1a40] sm:$0xff]  ;;  %v978_v17 = vld [vmem:[%s3573_s30 + $0x1a48] sm:$0xff]  ;;  %v979_v18 = vld [vmem:[%s3573_s30 + $0x1a50] sm:$0xff] }
 0x266   : > { %3022 = vst [vmem:[%s3585_s17 + $0x1a28] sm:$0xff] %v1998_v13  ;;  %3023 = vst [vmem:[%s3585_s17 + $0x1a30] sm:$0xff] %v1999_v14  ;;  %v2001_v19 = vmax.f32 %v977_v16, 0.11  ;;  %v2002_v20 = vmax.f32 %v978_v17, 0.11 }
 0x267   : > { %3024 = vst [vmem:[%s3585_s17 + $0x1a38] sm:$0xff] %v2000_v15  ;;  %v2003_v21 = vmax.f32 %v979_v18, 0.11  ;;  %v980_v22 = vld [vmem:[%s3573_s30 + $0x1a58] sm:$0xff]  ;;  %v981_v23 = vld [vmem:[%s3573_s30 + $0x1a60] sm:$0xff]  ;;  %v982_v24 = vld [vmem:[%s3573_s30 + $0x1a68] sm:$0xff] }
 0x268   : > { %3025 = vst [vmem:[%s3585_s17 + $0x1a40] sm:$0xff] %v2001_v19  ;;  %3026 = vst [vmem:[%s3585_s17 + $0x1a48] sm:$0xff] %v2002_v20  ;;  %v2004_v25 = vmax.f32 %v980_v22, 0.11  ;;  %v2005_v26 = vmax.f32 %v981_v23, 0.11 }
 0x269   : > { %3027 = vst [vmem:[%s3585_s17 + $0x1a50] sm:$0xff] %v2003_v21  ;;  %v2006_v27 = vmax.f32 %v982_v24, 0.11  ;;  %v983_v28 = vld [vmem:[%s3573_s30 + $0x1a70] sm:$0xff]  ;;  %v984_v29 = vld [vmem:[%s3573_s30 + $0x1a78] sm:$0xff]  ;;  %v985_v30 = vld [vmem:[%s3573_s30 + $0x1a80] sm:$0xff] }
 0x26a   : > { %3028 = vst [vmem:[%s3585_s17 + $0x1a58] sm:$0xff] %v2004_v25  ;;  %3029 = vst [vmem:[%s3585_s17 + $0x1a60] sm:$0xff] %v2005_v26  ;;  %v2007_v31 = vmax.f32 %v983_v28, 0.11  ;;  %v2008_v32 = vmax.f32 %v984_v29, 0.11 }
 0x26b   : > { %3030 = vst [vmem:[%s3585_s17 + $0x1a68] sm:$0xff] %v2006_v27  ;;  %v2009_v33 = vmax.f32 %v985_v30, 0.11  ;;  %v986_v34 = vld [vmem:[%s3573_s30 + $0x1a88] sm:$0xff]  ;;  %v987_v35 = vld [vmem:[%s3573_s30 + $0x1a90] sm:$0xff]  ;;  %v988_v36 = vld [vmem:[%s3573_s30 + $0x1a98] sm:$0xff] }
 0x26c   : > { %3031 = vst [vmem:[%s3585_s17 + $0x1a70] sm:$0xff] %v2007_v31  ;;  %3032 = vst [vmem:[%s3585_s17 + $0x1a78] sm:$0xff] %v2008_v32  ;;  %v2010_v37 = vmax.f32 %v986_v34, 0.11  ;;  %v2011_v38 = vmax.f32 %v987_v35, 0.11 }
 0x26d   : > { %3033 = vst [vmem:[%s3585_s17 + $0x1a80] sm:$0xff] %v2009_v33  ;;  %v2012_v39 = vmax.f32 %v988_v36, 0.11  ;;  %v989_v40 = vld [vmem:[%s3573_s30 + $0x1aa0] sm:$0xff]  ;;  %v990_v41 = vld [vmem:[%s3573_s30 + $0x1aa8] sm:$0xff]  ;;  %v991_v42 = vld [vmem:[%s3573_s30 + $0x1ab0] sm:$0xff] }
 0x26e   : > { %3034 = vst [vmem:[%s3585_s17 + $0x1a88] sm:$0xff] %v2010_v37  ;;  %3035 = vst [vmem:[%s3585_s17 + $0x1a90] sm:$0xff] %v2011_v38  ;;  %v2013_v43 = vmax.f32 %v989_v40, 0.11  ;;  %v2014_v44 = vmax.f32 %v990_v41, 0.11 }
 0x26f   : > { %3036 = vst [vmem:[%s3585_s17 + $0x1a98] sm:$0xff] %v2012_v39  ;;  %v2015_v45 = vmax.f32 %v991_v42, 0.11  ;;  %v992_v46 = vld [vmem:[%s3573_s30 + $0x1ab8] sm:$0xff]  ;;  %v993_v47 = vld [vmem:[%s3573_s30 + $0x1ac0] sm:$0xff]  ;;  %v994_v48 = vld [vmem:[%s3573_s30 + $0x1ac8] sm:$0xff] }
 0x270   : > { %3037 = vst [vmem:[%s3585_s17 + $0x1aa0] sm:$0xff] %v2013_v43  ;;  %3038 = vst [vmem:[%s3585_s17 + $0x1aa8] sm:$0xff] %v2014_v44  ;;  %v2016_v49 = vmax.f32 %v992_v46, 0.11  ;;  %v2017_v50 = vmax.f32 %v993_v47, 0.11 }
 0x271   : > { %3039 = vst [vmem:[%s3585_s17 + $0x1ab0] sm:$0xff] %v2015_v45  ;;  %v2018_v51 = vmax.f32 %v994_v48, 0.11  ;;  %v995_v52 = vld [vmem:[%s3573_s30 + $0x1ad0] sm:$0xff]  ;;  %v996_v53 = vld [vmem:[%s3573_s30 + $0x1ad8] sm:$0xff]  ;;  %v997_v54 = vld [vmem:[%s3573_s30 + $0x1ae0] sm:$0xff] }
 0x272   : > { %3040 = vst [vmem:[%s3585_s17 + $0x1ab8] sm:$0xff] %v2016_v49  ;;  %3041 = vst [vmem:[%s3585_s17 + $0x1ac0] sm:$0xff] %v2017_v50  ;;  %v2019_v55 = vmax.f32 %v995_v52, 0.11  ;;  %v2020_v56 = vmax.f32 %v996_v53, 0.11 }
 0x273   : > { %3042 = vst [vmem:[%s3585_s17 + $0x1ac8] sm:$0xff] %v2018_v51  ;;  %v2021_v57 = vmax.f32 %v997_v54, 0.11  ;;  %v998_v58 = vld [vmem:[%s3573_s30 + $0x1ae8] sm:$0xff]  ;;  %v999_v59 = vld [vmem:[%s3573_s30 + $0x1af0] sm:$0xff]  ;;  %v1000_v60 = vld [vmem:[%s3573_s30 + $0x1af8] sm:$0xff] }
 0x274   : > { %3043 = vst [vmem:[%s3585_s17 + $0x1ad0] sm:$0xff] %v2019_v55  ;;  %3044 = vst [vmem:[%s3585_s17 + $0x1ad8] sm:$0xff] %v2020_v56  ;;  %v2022_v61 = vmax.f32 %v998_v58, 0.11  ;;  %v2023_v62 = vmax.f32 %v999_v59, 0.11 }
 0x275   : > { %3045 = vst [vmem:[%s3585_s17 + $0x1ae0] sm:$0xff] %v2021_v57  ;;  %v2024_v63 = vmax.f32 %v1000_v60, 0.11  ;;  %v1001_v0 = vld [vmem:[%s3573_s30 + $0x1b00] sm:$0xff]  ;;  %v1002_v1 = vld [vmem:[%s3573_s30 + $0x1b08] sm:$0xff]  ;;  %v1003_v2 = vld [vmem:[%s3573_s30 + $0x1b10] sm:$0xff] }
 0x276   : > { %3046 = vst [vmem:[%s3585_s17 + $0x1ae8] sm:$0xff] %v2022_v61  ;;  %3047 = vst [vmem:[%s3585_s17 + $0x1af0] sm:$0xff] %v2023_v62  ;;  %v2025_v3 = vmax.f32 %v1001_v0, 0.11  ;;  %v2026_v4 = vmax.f32 %v1002_v1, 0.11 }
 0x277   : > { %3048 = vst [vmem:[%s3585_s17 + $0x1af8] sm:$0xff] %v2024_v63  ;;  %v2027_v5 = vmax.f32 %v1003_v2, 0.11  ;;  %v1004_v6 = vld [vmem:[%s3573_s30 + $0x1b18] sm:$0xff]  ;;  %v1005_v7 = vld [vmem:[%s3573_s30 + $0x1b20] sm:$0xff]  ;;  %v1006_v8 = vld [vmem:[%s3573_s30 + $0x1b28] sm:$0xff] }
 0x278   : > { %3049 = vst [vmem:[%s3585_s17 + $0x1b00] sm:$0xff] %v2025_v3  ;;  %3050 = vst [vmem:[%s3585_s17 + $0x1b08] sm:$0xff] %v2026_v4  ;;  %v2028_v9 = vmax.f32 %v1004_v6, 0.11  ;;  %v2029_v10 = vmax.f32 %v1005_v7, 0.11 }
 0x279   : > { %3051 = vst [vmem:[%s3585_s17 + $0x1b10] sm:$0xff] %v2027_v5  ;;  %v2030_v11 = vmax.f32 %v1006_v8, 0.11  ;;  %v1007_v12 = vld [vmem:[%s3573_s30 + $0x1b30] sm:$0xff]  ;;  %v1008_v13 = vld [vmem:[%s3573_s30 + $0x1b38] sm:$0xff]  ;;  %v1009_v14 = vld [vmem:[%s3573_s30 + $0x1b40] sm:$0xff] }
 0x27a   : > { %3052 = vst [vmem:[%s3585_s17 + $0x1b18] sm:$0xff] %v2028_v9  ;;  %3053 = vst [vmem:[%s3585_s17 + $0x1b20] sm:$0xff] %v2029_v10  ;;  %v2031_v15 = vmax.f32 %v1007_v12, 0.11  ;;  %v2032_v16 = vmax.f32 %v1008_v13, 0.11 }
 0x27b   : > { %3054 = vst [vmem:[%s3585_s17 + $0x1b28] sm:$0xff] %v2030_v11  ;;  %v2033_v17 = vmax.f32 %v1009_v14, 0.11  ;;  %v1010_v18 = vld [vmem:[%s3573_s30 + $0x1b48] sm:$0xff]  ;;  %v1011_v19 = vld [vmem:[%s3573_s30 + $0x1b50] sm:$0xff]  ;;  %v1012_v20 = vld [vmem:[%s3573_s30 + $0x1b58] sm:$0xff] }
 0x27c   : > { %3055 = vst [vmem:[%s3585_s17 + $0x1b30] sm:$0xff] %v2031_v15  ;;  %3056 = vst [vmem:[%s3585_s17 + $0x1b38] sm:$0xff] %v2032_v16  ;;  %v2034_v21 = vmax.f32 %v1010_v18, 0.11  ;;  %v2035_v22 = vmax.f32 %v1011_v19, 0.11 }
 0x27d   : > { %3057 = vst [vmem:[%s3585_s17 + $0x1b40] sm:$0xff] %v2033_v17  ;;  %v2036_v23 = vmax.f32 %v1012_v20, 0.11  ;;  %v1013_v24 = vld [vmem:[%s3573_s30 + $0x1b60] sm:$0xff]  ;;  %v1014_v25 = vld [vmem:[%s3573_s30 + $0x1b68] sm:$0xff]  ;;  %v1015_v26 = vld [vmem:[%s3573_s30 + $0x1b70] sm:$0xff] }
 0x27e   : > { %3058 = vst [vmem:[%s3585_s17 + $0x1b48] sm:$0xff] %v2034_v21  ;;  %3059 = vst [vmem:[%s3585_s17 + $0x1b50] sm:$0xff] %v2035_v22  ;;  %v2037_v27 = vmax.f32 %v1013_v24, 0.11  ;;  %v2038_v28 = vmax.f32 %v1014_v25, 0.11 }
 0x27f   : > { %3060 = vst [vmem:[%s3585_s17 + $0x1b58] sm:$0xff] %v2036_v23  ;;  %v2039_v29 = vmax.f32 %v1015_v26, 0.11  ;;  %v1016_v30 = vld [vmem:[%s3573_s30 + $0x1b78] sm:$0xff]  ;;  %v1017_v31 = vld [vmem:[%s3573_s30 + $0x1b80] sm:$0xff]  ;;  %v1018_v32 = vld [vmem:[%s3573_s30 + $0x1b88] sm:$0xff] }
 0x280   : > { %3061 = vst [vmem:[%s3585_s17 + $0x1b60] sm:$0xff] %v2037_v27  ;;  %3062 = vst [vmem:[%s3585_s17 + $0x1b68] sm:$0xff] %v2038_v28  ;;  %v2040_v33 = vmax.f32 %v1016_v30, 0.11  ;;  %v2041_v34 = vmax.f32 %v1017_v31, 0.11 }
 0x281   : > { %3063 = vst [vmem:[%s3585_s17 + $0x1b70] sm:$0xff] %v2039_v29  ;;  %v2042_v35 = vmax.f32 %v1018_v32, 0.11  ;;  %v1019_v36 = vld [vmem:[%s3573_s30 + $0x1b90] sm:$0xff]  ;;  %v1020_v37 = vld [vmem:[%s3573_s30 + $0x1b98] sm:$0xff]  ;;  %v1021_v38 = vld [vmem:[%s3573_s30 + $0x1ba0] sm:$0xff] }
 0x282   : > { %3064 = vst [vmem:[%s3585_s17 + $0x1b78] sm:$0xff] %v2040_v33  ;;  %3065 = vst [vmem:[%s3585_s17 + $0x1b80] sm:$0xff] %v2041_v34  ;;  %v2043_v39 = vmax.f32 %v1019_v36, 0.11  ;;  %v2044_v40 = vmax.f32 %v1020_v37, 0.11 }
 0x283   : > { %3066 = vst [vmem:[%s3585_s17 + $0x1b88] sm:$0xff] %v2042_v35  ;;  %v2045_v41 = vmax.f32 %v1021_v38, 0.11  ;;  %v1022_v42 = vld [vmem:[%s3573_s30 + $0x1ba8] sm:$0xff]  ;;  %v1023_v43 = vld [vmem:[%s3573_s30 + $0x1bb0] sm:$0xff]  ;;  %v1024_v44 = vld [vmem:[%s3573_s30 + $0x1bb8] sm:$0xff] }
 0x284   : > { %3067 = vst [vmem:[%s3585_s17 + $0x1b90] sm:$0xff] %v2043_v39  ;;  %3068 = vst [vmem:[%s3585_s17 + $0x1b98] sm:$0xff] %v2044_v40  ;;  %v2046_v45 = vmax.f32 %v1022_v42, 0.11  ;;  %v2047_v46 = vmax.f32 %v1023_v43, 0.11 }
 0x285   : > { %3069 = vst [vmem:[%s3585_s17 + $0x1ba0] sm:$0xff] %v2045_v41  ;;  %v2048_v47 = vmax.f32 %v1024_v44, 0.11  ;;  %v1025_v48 = vld [vmem:[%s3573_s30 + $0x1bc0] sm:$0xff]  ;;  %v1026_v49 = vld [vmem:[%s3573_s30 + $0x1bc8] sm:$0xff]  ;;  %v1027_v50 = vld [vmem:[%s3573_s30 + $0x1bd0] sm:$0xff] }
 0x286   : > { %3070 = vst [vmem:[%s3585_s17 + $0x1ba8] sm:$0xff] %v2046_v45  ;;  %3071 = vst [vmem:[%s3585_s17 + $0x1bb0] sm:$0xff] %v2047_v46  ;;  %v2049_v51 = vmax.f32 %v1025_v48, 0.11  ;;  %v2050_v52 = vmax.f32 %v1026_v49, 0.11 }
 0x287   : > { %3072 = vst [vmem:[%s3585_s17 + $0x1bb8] sm:$0xff] %v2048_v47  ;;  %v2051_v53 = vmax.f32 %v1027_v50, 0.11  ;;  %v1028_v54 = vld [vmem:[%s3573_s30 + $0x1bd8] sm:$0xff]  ;;  %v1029_v55 = vld [vmem:[%s3573_s30 + $0x1be0] sm:$0xff]  ;;  %v1030_v56 = vld [vmem:[%s3573_s30 + $0x1be8] sm:$0xff] }
 0x288   : > { %3073 = vst [vmem:[%s3585_s17 + $0x1bc0] sm:$0xff] %v2049_v51  ;;  %3074 = vst [vmem:[%s3585_s17 + $0x1bc8] sm:$0xff] %v2050_v52  ;;  %v2052_v57 = vmax.f32 %v1028_v54, 0.11  ;;  %v2053_v58 = vmax.f32 %v1029_v55, 0.11 }
 0x289   : > { %3075 = vst [vmem:[%s3585_s17 + $0x1bd0] sm:$0xff] %v2051_v53  ;;  %v2054_v59 = vmax.f32 %v1030_v56, 0.11  ;;  %v1031_v60 = vld [vmem:[%s3573_s30 + $0x1bf0] sm:$0xff]  ;;  %v1032_v61 = vld [vmem:[%s3573_s30 + $0x1bf8] sm:$0xff]  ;;  %v1033_v62 = vld [vmem:[%s3573_s30 + $0x1c00] sm:$0xff] }
 0x28a   : > { %3076 = vst [vmem:[%s3585_s17 + $0x1bd8] sm:$0xff] %v2052_v57  ;;  %3077 = vst [vmem:[%s3585_s17 + $0x1be0] sm:$0xff] %v2053_v58  ;;  %v2055_v63 = vmax.f32 %v1031_v60, 0.11  ;;  %v2056_v0 = vmax.f32 %v1032_v61, 0.11 }
 0x28b   : > { %3078 = vst [vmem:[%s3585_s17 + $0x1be8] sm:$0xff] %v2054_v59  ;;  %v2057_v1 = vmax.f32 %v1033_v62, 0.11  ;;  %v1034_v2 = vld [vmem:[%s3573_s30 + $0x1c08] sm:$0xff]  ;;  %v1035_v3 = vld [vmem:[%s3573_s30 + $0x1c10] sm:$0xff]  ;;  %v1036_v4 = vld [vmem:[%s3573_s30 + $0x1c18] sm:$0xff] }
 0x28c   : > { %3079 = vst [vmem:[%s3585_s17 + $0x1bf0] sm:$0xff] %v2055_v63  ;;  %3080 = vst [vmem:[%s3585_s17 + $0x1bf8] sm:$0xff] %v2056_v0  ;;  %v2058_v5 = vmax.f32 %v1034_v2, 0.11  ;;  %v2059_v6 = vmax.f32 %v1035_v3, 0.11 }
 0x28d   : > { %3081 = vst [vmem:[%s3585_s17 + $0x1c00] sm:$0xff] %v2057_v1  ;;  %v2060_v7 = vmax.f32 %v1036_v4, 0.11  ;;  %v1037_v8 = vld [vmem:[%s3573_s30 + $0x1c20] sm:$0xff]  ;;  %v1038_v9 = vld [vmem:[%s3573_s30 + $0x1c28] sm:$0xff]  ;;  %v1039_v10 = vld [vmem:[%s3573_s30 + $0x1c30] sm:$0xff] }
 0x28e   : > { %3082 = vst [vmem:[%s3585_s17 + $0x1c08] sm:$0xff] %v2058_v5  ;;  %3083 = vst [vmem:[%s3585_s17 + $0x1c10] sm:$0xff] %v2059_v6  ;;  %v2061_v11 = vmax.f32 %v1037_v8, 0.11  ;;  %v2062_v12 = vmax.f32 %v1038_v9, 0.11 }
 0x28f   : > { %3084 = vst [vmem:[%s3585_s17 + $0x1c18] sm:$0xff] %v2060_v7  ;;  %v2063_v13 = vmax.f32 %v1039_v10, 0.11  ;;  %v1040_v14 = vld [vmem:[%s3573_s30 + $0x1c38] sm:$0xff]  ;;  %v1041_v15 = vld [vmem:[%s3573_s30 + $0x1c40] sm:$0xff]  ;;  %v1042_v16 = vld [vmem:[%s3573_s30 + $0x1c48] sm:$0xff] }
 0x290   : > { %3085 = vst [vmem:[%s3585_s17 + $0x1c20] sm:$0xff] %v2061_v11  ;;  %3086 = vst [vmem:[%s3585_s17 + $0x1c28] sm:$0xff] %v2062_v12  ;;  %v2064_v17 = vmax.f32 %v1040_v14, 0.11  ;;  %v2065_v18 = vmax.f32 %v1041_v15, 0.11 }
 0x291   : > { %3087 = vst [vmem:[%s3585_s17 + $0x1c30] sm:$0xff] %v2063_v13  ;;  %v2066_v19 = vmax.f32 %v1042_v16, 0.11  ;;  %v1043_v20 = vld [vmem:[%s3573_s30 + $0x1c50] sm:$0xff]  ;;  %v1044_v21 = vld [vmem:[%s3573_s30 + $0x1c58] sm:$0xff]  ;;  %v1045_v22 = vld [vmem:[%s3573_s30 + $0x1c60] sm:$0xff] }
 0x292   : > { %3088 = vst [vmem:[%s3585_s17 + $0x1c38] sm:$0xff] %v2064_v17  ;;  %3089 = vst [vmem:[%s3585_s17 + $0x1c40] sm:$0xff] %v2065_v18  ;;  %v2067_v23 = vmax.f32 %v1043_v20, 0.11  ;;  %v2068_v24 = vmax.f32 %v1044_v21, 0.11 }
 0x293   : > { %3090 = vst [vmem:[%s3585_s17 + $0x1c48] sm:$0xff] %v2066_v19  ;;  %v2069_v25 = vmax.f32 %v1045_v22, 0.11  ;;  %v1046_v26 = vld [vmem:[%s3573_s30 + $0x1c68] sm:$0xff]  ;;  %v1047_v27 = vld [vmem:[%s3573_s30 + $0x1c70] sm:$0xff]  ;;  %v1048_v28 = vld [vmem:[%s3573_s30 + $0x1c78] sm:$0xff] }
 0x294   : > { %3091 = vst [vmem:[%s3585_s17 + $0x1c50] sm:$0xff] %v2067_v23  ;;  %3092 = vst [vmem:[%s3585_s17 + $0x1c58] sm:$0xff] %v2068_v24  ;;  %v2070_v29 = vmax.f32 %v1046_v26, 0.11  ;;  %v2071_v30 = vmax.f32 %v1047_v27, 0.11 }
 0x295   : > { %3093 = vst [vmem:[%s3585_s17 + $0x1c60] sm:$0xff] %v2069_v25  ;;  %v2072_v31 = vmax.f32 %v1048_v28, 0.11  ;;  %v1049_v32 = vld [vmem:[%s3573_s30 + $0x1c80] sm:$0xff]  ;;  %v1050_v33 = vld [vmem:[%s3573_s30 + $0x1c88] sm:$0xff]  ;;  %v1051_v34 = vld [vmem:[%s3573_s30 + $0x1c90] sm:$0xff] }
 0x296   : > { %3094 = vst [vmem:[%s3585_s17 + $0x1c68] sm:$0xff] %v2070_v29  ;;  %3095 = vst [vmem:[%s3585_s17 + $0x1c70] sm:$0xff] %v2071_v30  ;;  %v2073_v35 = vmax.f32 %v1049_v32, 0.11  ;;  %v2074_v36 = vmax.f32 %v1050_v33, 0.11 }
 0x297   : > { %3096 = vst [vmem:[%s3585_s17 + $0x1c78] sm:$0xff] %v2072_v31  ;;  %v2075_v37 = vmax.f32 %v1051_v34, 0.11  ;;  %v1052_v38 = vld [vmem:[%s3573_s30 + $0x1c98] sm:$0xff]  ;;  %v1053_v39 = vld [vmem:[%s3573_s30 + $0x1ca0] sm:$0xff]  ;;  %v1054_v40 = vld [vmem:[%s3573_s30 + $0x1ca8] sm:$0xff] }
 0x298   : > { %3097 = vst [vmem:[%s3585_s17 + $0x1c80] sm:$0xff] %v2073_v35  ;;  %3098 = vst [vmem:[%s3585_s17 + $0x1c88] sm:$0xff] %v2074_v36  ;;  %v2076_v41 = vmax.f32 %v1052_v38, 0.11  ;;  %v2077_v42 = vmax.f32 %v1053_v39, 0.11 }
 0x299   : > { %3099 = vst [vmem:[%s3585_s17 + $0x1c90] sm:$0xff] %v2075_v37  ;;  %v2078_v43 = vmax.f32 %v1054_v40, 0.11  ;;  %v1055_v44 = vld [vmem:[%s3573_s30 + $0x1cb0] sm:$0xff]  ;;  %v1056_v45 = vld [vmem:[%s3573_s30 + $0x1cb8] sm:$0xff]  ;;  %v1057_v46 = vld [vmem:[%s3573_s30 + $0x1cc0] sm:$0xff] }
 0x29a   : > { %3100 = vst [vmem:[%s3585_s17 + $0x1c98] sm:$0xff] %v2076_v41  ;;  %3101 = vst [vmem:[%s3585_s17 + $0x1ca0] sm:$0xff] %v2077_v42  ;;  %v2079_v47 = vmax.f32 %v1055_v44, 0.11  ;;  %v2080_v48 = vmax.f32 %v1056_v45, 0.11 }
 0x29b   : > { %3102 = vst [vmem:[%s3585_s17 + $0x1ca8] sm:$0xff] %v2078_v43  ;;  %v2081_v49 = vmax.f32 %v1057_v46, 0.11  ;;  %v1058_v50 = vld [vmem:[%s3573_s30 + $0x1cc8] sm:$0xff]  ;;  %v1059_v51 = vld [vmem:[%s3573_s30 + $0x1cd0] sm:$0xff]  ;;  %v1060_v52 = vld [vmem:[%s3573_s30 + $0x1cd8] sm:$0xff] }
 0x29c   : > { %3103 = vst [vmem:[%s3585_s17 + $0x1cb0] sm:$0xff] %v2079_v47  ;;  %3104 = vst [vmem:[%s3585_s17 + $0x1cb8] sm:$0xff] %v2080_v48  ;;  %v2082_v53 = vmax.f32 %v1058_v50, 0.11  ;;  %v2083_v54 = vmax.f32 %v1059_v51, 0.11 }
 0x29d   : > { %3105 = vst [vmem:[%s3585_s17 + $0x1cc0] sm:$0xff] %v2081_v49  ;;  %v2084_v55 = vmax.f32 %v1060_v52, 0.11  ;;  %v1061_v56 = vld [vmem:[%s3573_s30 + $0x1ce0] sm:$0xff]  ;;  %v1062_v57 = vld [vmem:[%s3573_s30 + $0x1ce8] sm:$0xff]  ;;  %v1063_v58 = vld [vmem:[%s3573_s30 + $0x1cf0] sm:$0xff] }
 0x29e   : > { %3106 = vst [vmem:[%s3585_s17 + $0x1cc8] sm:$0xff] %v2082_v53  ;;  %3107 = vst [vmem:[%s3585_s17 + $0x1cd0] sm:$0xff] %v2083_v54  ;;  %v2085_v59 = vmax.f32 %v1061_v56, 0.11  ;;  %v2086_v60 = vmax.f32 %v1062_v57, 0.11 }
 0x29f   : > { %3108 = vst [vmem:[%s3585_s17 + $0x1cd8] sm:$0xff] %v2084_v55  ;;  %v2087_v61 = vmax.f32 %v1063_v58, 0.11  ;;  %v1064_v62 = vld [vmem:[%s3573_s30 + $0x1cf8] sm:$0xff]  ;;  %v1065_v63 = vld [vmem:[%s3573_s30 + $0x1d00] sm:$0xff]  ;;  %v1066_v0 = vld [vmem:[%s3573_s30 + $0x1d08] sm:$0xff] }
 0x2a0   : > { %3109 = vst [vmem:[%s3585_s17 + $0x1ce0] sm:$0xff] %v2085_v59  ;;  %3110 = vst [vmem:[%s3585_s17 + $0x1ce8] sm:$0xff] %v2086_v60  ;;  %v2088_v1 = vmax.f32 %v1064_v62, 0.11  ;;  %v2089_v2 = vmax.f32 %v1065_v63, 0.11 }
 0x2a1   : > { %3111 = vst [vmem:[%s3585_s17 + $0x1cf0] sm:$0xff] %v2087_v61  ;;  %v2090_v3 = vmax.f32 %v1066_v0, 0.11  ;;  %v1067_v4 = vld [vmem:[%s3573_s30 + $0x1d10] sm:$0xff]  ;;  %v1068_v5 = vld [vmem:[%s3573_s30 + $0x1d18] sm:$0xff]  ;;  %v1069_v6 = vld [vmem:[%s3573_s30 + $0x1d20] sm:$0xff] }
 0x2a2   : > { %3112 = vst [vmem:[%s3585_s17 + $0x1cf8] sm:$0xff] %v2088_v1  ;;  %3113 = vst [vmem:[%s3585_s17 + $0x1d00] sm:$0xff] %v2089_v2  ;;  %v2091_v7 = vmax.f32 %v1067_v4, 0.11  ;;  %v2092_v8 = vmax.f32 %v1068_v5, 0.11 }
 0x2a3   : > { %3114 = vst [vmem:[%s3585_s17 + $0x1d08] sm:$0xff] %v2090_v3  ;;  %v2093_v9 = vmax.f32 %v1069_v6, 0.11  ;;  %v1070_v10 = vld [vmem:[%s3573_s30 + $0x1d28] sm:$0xff]  ;;  %v1071_v11 = vld [vmem:[%s3573_s30 + $0x1d30] sm:$0xff]  ;;  %v1072_v12 = vld [vmem:[%s3573_s30 + $0x1d38] sm:$0xff] }
 0x2a4   : > { %3115 = vst [vmem:[%s3585_s17 + $0x1d10] sm:$0xff] %v2091_v7  ;;  %3116 = vst [vmem:[%s3585_s17 + $0x1d18] sm:$0xff] %v2092_v8  ;;  %v2094_v13 = vmax.f32 %v1070_v10, 0.11  ;;  %v2095_v14 = vmax.f32 %v1071_v11, 0.11 }
 0x2a5   : > { %3117 = vst [vmem:[%s3585_s17 + $0x1d20] sm:$0xff] %v2093_v9  ;;  %v2096_v15 = vmax.f32 %v1072_v12, 0.11  ;;  %v1073_v16 = vld [vmem:[%s3573_s30 + $0x1d40] sm:$0xff]  ;;  %v1074_v17 = vld [vmem:[%s3573_s30 + $0x1d48] sm:$0xff]  ;;  %v1075_v18 = vld [vmem:[%s3573_s30 + $0x1d50] sm:$0xff] }
 0x2a6   : > { %3118 = vst [vmem:[%s3585_s17 + $0x1d28] sm:$0xff] %v2094_v13  ;;  %3119 = vst [vmem:[%s3585_s17 + $0x1d30] sm:$0xff] %v2095_v14  ;;  %v2097_v19 = vmax.f32 %v1073_v16, 0.11  ;;  %v2098_v20 = vmax.f32 %v1074_v17, 0.11 }
 0x2a7   : > { %3120 = vst [vmem:[%s3585_s17 + $0x1d38] sm:$0xff] %v2096_v15  ;;  %v2099_v21 = vmax.f32 %v1075_v18, 0.11  ;;  %v1076_v22 = vld [vmem:[%s3573_s30 + $0x1d58] sm:$0xff]  ;;  %v1077_v23 = vld [vmem:[%s3573_s30 + $0x1d60] sm:$0xff]  ;;  %v1078_v24 = vld [vmem:[%s3573_s30 + $0x1d68] sm:$0xff] }
 0x2a8   : > { %3121 = vst [vmem:[%s3585_s17 + $0x1d40] sm:$0xff] %v2097_v19  ;;  %3122 = vst [vmem:[%s3585_s17 + $0x1d48] sm:$0xff] %v2098_v20  ;;  %v2100_v25 = vmax.f32 %v1076_v22, 0.11  ;;  %v2101_v26 = vmax.f32 %v1077_v23, 0.11 }
 0x2a9   : > { %3123 = vst [vmem:[%s3585_s17 + $0x1d50] sm:$0xff] %v2099_v21  ;;  %v2102_v27 = vmax.f32 %v1078_v24, 0.11  ;;  %v1079_v28 = vld [vmem:[%s3573_s30 + $0x1d70] sm:$0xff]  ;;  %v1080_v29 = vld [vmem:[%s3573_s30 + $0x1d78] sm:$0xff]  ;;  %v1081_v30 = vld [vmem:[%s3573_s30 + $0x1d80] sm:$0xff] }
 0x2aa   : > { %3124 = vst [vmem:[%s3585_s17 + $0x1d58] sm:$0xff] %v2100_v25  ;;  %3125 = vst [vmem:[%s3585_s17 + $0x1d60] sm:$0xff] %v2101_v26  ;;  %v2103_v31 = vmax.f32 %v1079_v28, 0.11  ;;  %v2104_v32 = vmax.f32 %v1080_v29, 0.11 }
 0x2ab   : > { %3126 = vst [vmem:[%s3585_s17 + $0x1d68] sm:$0xff] %v2102_v27  ;;  %v2105_v33 = vmax.f32 %v1081_v30, 0.11  ;;  %v1082_v34 = vld [vmem:[%s3573_s30 + $0x1d88] sm:$0xff]  ;;  %v1083_v35 = vld [vmem:[%s3573_s30 + $0x1d90] sm:$0xff]  ;;  %v1084_v36 = vld [vmem:[%s3573_s30 + $0x1d98] sm:$0xff] }
 0x2ac   : > { %3127 = vst [vmem:[%s3585_s17 + $0x1d70] sm:$0xff] %v2103_v31  ;;  %3128 = vst [vmem:[%s3585_s17 + $0x1d78] sm:$0xff] %v2104_v32  ;;  %v2106_v37 = vmax.f32 %v1082_v34, 0.11  ;;  %v2107_v38 = vmax.f32 %v1083_v35, 0.11 }
 0x2ad   : > { %3129 = vst [vmem:[%s3585_s17 + $0x1d80] sm:$0xff] %v2105_v33  ;;  %v2108_v39 = vmax.f32 %v1084_v36, 0.11  ;;  %v1085_v40 = vld [vmem:[%s3573_s30 + $0x1da0] sm:$0xff]  ;;  %v1086_v41 = vld [vmem:[%s3573_s30 + $0x1da8] sm:$0xff]  ;;  %v1087_v42 = vld [vmem:[%s3573_s30 + $0x1db0] sm:$0xff] }
 0x2ae   : > { %3130 = vst [vmem:[%s3585_s17 + $0x1d88] sm:$0xff] %v2106_v37  ;;  %3131 = vst [vmem:[%s3585_s17 + $0x1d90] sm:$0xff] %v2107_v38  ;;  %v2109_v43 = vmax.f32 %v1085_v40, 0.11  ;;  %v2110_v44 = vmax.f32 %v1086_v41, 0.11 }
 0x2af   : > { %3132 = vst [vmem:[%s3585_s17 + $0x1d98] sm:$0xff] %v2108_v39  ;;  %v2111_v45 = vmax.f32 %v1087_v42, 0.11  ;;  %v1088_v46 = vld [vmem:[%s3573_s30 + $0x1db8] sm:$0xff]  ;;  %v1089_v47 = vld [vmem:[%s3573_s30 + $0x1dc0] sm:$0xff]  ;;  %v1090_v48 = vld [vmem:[%s3573_s30 + $0x1dc8] sm:$0xff] }
 0x2b0   : > { %3133 = vst [vmem:[%s3585_s17 + $0x1da0] sm:$0xff] %v2109_v43  ;;  %3134 = vst [vmem:[%s3585_s17 + $0x1da8] sm:$0xff] %v2110_v44  ;;  %v2112_v49 = vmax.f32 %v1088_v46, 0.11  ;;  %v2113_v50 = vmax.f32 %v1089_v47, 0.11 }
 0x2b1   : > { %3135 = vst [vmem:[%s3585_s17 + $0x1db0] sm:$0xff] %v2111_v45  ;;  %v2114_v51 = vmax.f32 %v1090_v48, 0.11  ;;  %v1091_v52 = vld [vmem:[%s3573_s30 + $0x1dd0] sm:$0xff]  ;;  %v1092_v53 = vld [vmem:[%s3573_s30 + $0x1dd8] sm:$0xff]  ;;  %v1093_v54 = vld [vmem:[%s3573_s30 + $0x1de0] sm:$0xff] }
 0x2b2   : > { %3136 = vst [vmem:[%s3585_s17 + $0x1db8] sm:$0xff] %v2112_v49  ;;  %3137 = vst [vmem:[%s3585_s17 + $0x1dc0] sm:$0xff] %v2113_v50  ;;  %v2115_v55 = vmax.f32 %v1091_v52, 0.11  ;;  %v2116_v56 = vmax.f32 %v1092_v53, 0.11 }
 0x2b3   : > { %3138 = vst [vmem:[%s3585_s17 + $0x1dc8] sm:$0xff] %v2114_v51  ;;  %v2117_v57 = vmax.f32 %v1093_v54, 0.11  ;;  %v1094_v58 = vld [vmem:[%s3573_s30 + $0x1de8] sm:$0xff]  ;;  %v1095_v59 = vld [vmem:[%s3573_s30 + $0x1df0] sm:$0xff]  ;;  %v1096_v60 = vld [vmem:[%s3573_s30 + $0x1df8] sm:$0xff] }
 0x2b4   : > { %3139 = vst [vmem:[%s3585_s17 + $0x1dd0] sm:$0xff] %v2115_v55  ;;  %3140 = vst [vmem:[%s3585_s17 + $0x1dd8] sm:$0xff] %v2116_v56  ;;  %v2118_v61 = vmax.f32 %v1094_v58, 0.11  ;;  %v2119_v62 = vmax.f32 %v1095_v59, 0.11 }
 0x2b5   : > { %3141 = vst [vmem:[%s3585_s17 + $0x1de0] sm:$0xff] %v2117_v57  ;;  %v2120_v63 = vmax.f32 %v1096_v60, 0.11  ;;  %v1097_v0 = vld [vmem:[%s3573_s30 + $0x1e00] sm:$0xff]  ;;  %v1098_v1 = vld [vmem:[%s3573_s30 + $0x1e08] sm:$0xff]  ;;  %v1099_v2 = vld [vmem:[%s3573_s30 + $0x1e10] sm:$0xff] }
 0x2b6   : > { %3142 = vst [vmem:[%s3585_s17 + $0x1de8] sm:$0xff] %v2118_v61  ;;  %3143 = vst [vmem:[%s3585_s17 + $0x1df0] sm:$0xff] %v2119_v62  ;;  %v2121_v3 = vmax.f32 %v1097_v0, 0.11  ;;  %v2122_v4 = vmax.f32 %v1098_v1, 0.11 }
 0x2b7   : > { %3144 = vst [vmem:[%s3585_s17 + $0x1df8] sm:$0xff] %v2120_v63  ;;  %v2123_v5 = vmax.f32 %v1099_v2, 0.11  ;;  %v1100_v6 = vld [vmem:[%s3573_s30 + $0x1e18] sm:$0xff]  ;;  %v1101_v7 = vld [vmem:[%s3573_s30 + $0x1e20] sm:$0xff]  ;;  %v1102_v8 = vld [vmem:[%s3573_s30 + $0x1e28] sm:$0xff] }
 0x2b8   : > { %3145 = vst [vmem:[%s3585_s17 + $0x1e00] sm:$0xff] %v2121_v3  ;;  %3146 = vst [vmem:[%s3585_s17 + $0x1e08] sm:$0xff] %v2122_v4  ;;  %v2124_v9 = vmax.f32 %v1100_v6, 0.11  ;;  %v2125_v10 = vmax.f32 %v1101_v7, 0.11 }
 0x2b9   : > { %3147 = vst [vmem:[%s3585_s17 + $0x1e10] sm:$0xff] %v2123_v5  ;;  %v2126_v11 = vmax.f32 %v1102_v8, 0.11  ;;  %v1103_v12 = vld [vmem:[%s3573_s30 + $0x1e30] sm:$0xff]  ;;  %v1104_v13 = vld [vmem:[%s3573_s30 + $0x1e38] sm:$0xff]  ;;  %v1105_v14 = vld [vmem:[%s3573_s30 + $0x1e40] sm:$0xff] }
 0x2ba   : > { %3148 = vst [vmem:[%s3585_s17 + $0x1e18] sm:$0xff] %v2124_v9  ;;  %3149 = vst [vmem:[%s3585_s17 + $0x1e20] sm:$0xff] %v2125_v10  ;;  %v2127_v15 = vmax.f32 %v1103_v12, 0.11  ;;  %v2128_v16 = vmax.f32 %v1104_v13, 0.11 }
 0x2bb   : > { %3150 = vst [vmem:[%s3585_s17 + $0x1e28] sm:$0xff] %v2126_v11  ;;  %v2129_v17 = vmax.f32 %v1105_v14, 0.11  ;;  %v1106_v18 = vld [vmem:[%s3573_s30 + $0x1e48] sm:$0xff]  ;;  %v1107_v19 = vld [vmem:[%s3573_s30 + $0x1e50] sm:$0xff]  ;;  %v1108_v20 = vld [vmem:[%s3573_s30 + $0x1e58] sm:$0xff] }
 0x2bc   : > { %3151 = vst [vmem:[%s3585_s17 + $0x1e30] sm:$0xff] %v2127_v15  ;;  %3152 = vst [vmem:[%s3585_s17 + $0x1e38] sm:$0xff] %v2128_v16  ;;  %v2130_v21 = vmax.f32 %v1106_v18, 0.11  ;;  %v2131_v22 = vmax.f32 %v1107_v19, 0.11 }
 0x2bd   : > { %3153 = vst [vmem:[%s3585_s17 + $0x1e40] sm:$0xff] %v2129_v17  ;;  %v2132_v23 = vmax.f32 %v1108_v20, 0.11  ;;  %v1109_v24 = vld [vmem:[%s3573_s30 + $0x1e60] sm:$0xff]  ;;  %v1110_v25 = vld [vmem:[%s3573_s30 + $0x1e68] sm:$0xff]  ;;  %v1111_v26 = vld [vmem:[%s3573_s30 + $0x1e70] sm:$0xff] }
 0x2be   : > { %3154 = vst [vmem:[%s3585_s17 + $0x1e48] sm:$0xff] %v2130_v21  ;;  %3155 = vst [vmem:[%s3585_s17 + $0x1e50] sm:$0xff] %v2131_v22  ;;  %v2133_v27 = vmax.f32 %v1109_v24, 0.11  ;;  %v2134_v28 = vmax.f32 %v1110_v25, 0.11 }
 0x2bf   : > { %3156 = vst [vmem:[%s3585_s17 + $0x1e58] sm:$0xff] %v2132_v23  ;;  %v2135_v29 = vmax.f32 %v1111_v26, 0.11  ;;  %v1112_v30 = vld [vmem:[%s3573_s30 + $0x1e78] sm:$0xff]  ;;  %v1113_v31 = vld [vmem:[%s3573_s30 + $0x1e80] sm:$0xff]  ;;  %v1114_v32 = vld [vmem:[%s3573_s30 + $0x1e88] sm:$0xff] }
 0x2c0   : > { %3157 = vst [vmem:[%s3585_s17 + $0x1e60] sm:$0xff] %v2133_v27  ;;  %3158 = vst [vmem:[%s3585_s17 + $0x1e68] sm:$0xff] %v2134_v28  ;;  %v2136_v33 = vmax.f32 %v1112_v30, 0.11  ;;  %v2137_v34 = vmax.f32 %v1113_v31, 0.11 }
 0x2c1   : > { %3159 = vst [vmem:[%s3585_s17 + $0x1e70] sm:$0xff] %v2135_v29  ;;  %v2138_v35 = vmax.f32 %v1114_v32, 0.11  ;;  %v1115_v36 = vld [vmem:[%s3573_s30 + $0x1e90] sm:$0xff]  ;;  %v1116_v37 = vld [vmem:[%s3573_s30 + $0x1e98] sm:$0xff]  ;;  %v1117_v38 = vld [vmem:[%s3573_s30 + $0x1ea0] sm:$0xff] }
 0x2c2   : > { %3160 = vst [vmem:[%s3585_s17 + $0x1e78] sm:$0xff] %v2136_v33  ;;  %3161 = vst [vmem:[%s3585_s17 + $0x1e80] sm:$0xff] %v2137_v34  ;;  %v2139_v39 = vmax.f32 %v1115_v36, 0.11  ;;  %v2140_v40 = vmax.f32 %v1116_v37, 0.11 }
 0x2c3   : > { %3162 = vst [vmem:[%s3585_s17 + $0x1e88] sm:$0xff] %v2138_v35  ;;  %v2141_v41 = vmax.f32 %v1117_v38, 0.11  ;;  %v1118_v42 = vld [vmem:[%s3573_s30 + $0x1ea8] sm:$0xff]  ;;  %v1119_v43 = vld [vmem:[%s3573_s30 + $0x1eb0] sm:$0xff]  ;;  %v1120_v44 = vld [vmem:[%s3573_s30 + $0x1eb8] sm:$0xff] }
 0x2c4   : > { %3163 = vst [vmem:[%s3585_s17 + $0x1e90] sm:$0xff] %v2139_v39  ;;  %3164 = vst [vmem:[%s3585_s17 + $0x1e98] sm:$0xff] %v2140_v40  ;;  %v2142_v45 = vmax.f32 %v1118_v42, 0.11  ;;  %v2143_v46 = vmax.f32 %v1119_v43, 0.11 }
 0x2c5   : > { %3165 = vst [vmem:[%s3585_s17 + $0x1ea0] sm:$0xff] %v2141_v41  ;;  %v2144_v47 = vmax.f32 %v1120_v44, 0.11  ;;  %v1121_v48 = vld [vmem:[%s3573_s30 + $0x1ec0] sm:$0xff]  ;;  %v1122_v49 = vld [vmem:[%s3573_s30 + $0x1ec8] sm:$0xff]  ;;  %v1123_v50 = vld [vmem:[%s3573_s30 + $0x1ed0] sm:$0xff] }
 0x2c6   : > { %3166 = vst [vmem:[%s3585_s17 + $0x1ea8] sm:$0xff] %v2142_v45  ;;  %3167 = vst [vmem:[%s3585_s17 + $0x1eb0] sm:$0xff] %v2143_v46  ;;  %v2145_v51 = vmax.f32 %v1121_v48, 0.11  ;;  %v2146_v52 = vmax.f32 %v1122_v49, 0.11 }
 0x2c7   : > { %3168 = vst [vmem:[%s3585_s17 + $0x1eb8] sm:$0xff] %v2144_v47  ;;  %v2147_v53 = vmax.f32 %v1123_v50, 0.11  ;;  %v1124_v54 = vld [vmem:[%s3573_s30 + $0x1ed8] sm:$0xff]  ;;  %v1125_v55 = vld [vmem:[%s3573_s30 + $0x1ee0] sm:$0xff]  ;;  %v1126_v56 = vld [vmem:[%s3573_s30 + $0x1ee8] sm:$0xff] }
 0x2c8   : > { %3169 = vst [vmem:[%s3585_s17 + $0x1ec0] sm:$0xff] %v2145_v51  ;;  %3170 = vst [vmem:[%s3585_s17 + $0x1ec8] sm:$0xff] %v2146_v52  ;;  %v2148_v57 = vmax.f32 %v1124_v54, 0.11  ;;  %v2149_v58 = vmax.f32 %v1125_v55, 0.11 }
 0x2c9   : > { %3171 = vst [vmem:[%s3585_s17 + $0x1ed0] sm:$0xff] %v2147_v53  ;;  %v2150_v59 = vmax.f32 %v1126_v56, 0.11  ;;  %v1127_v60 = vld [vmem:[%s3573_s30 + $0x1ef0] sm:$0xff]  ;;  %v1128_v61 = vld [vmem:[%s3573_s30 + $0x1ef8] sm:$0xff]  ;;  %v1129_v62 = vld [vmem:[%s3573_s30 + $0x1f00] sm:$0xff] }
 0x2ca   : > { %3172 = vst [vmem:[%s3585_s17 + $0x1ed8] sm:$0xff] %v2148_v57  ;;  %3173 = vst [vmem:[%s3585_s17 + $0x1ee0] sm:$0xff] %v2149_v58  ;;  %v2151_v63 = vmax.f32 %v1127_v60, 0.11  ;;  %v2152_v0 = vmax.f32 %v1128_v61, 0.11 }
 0x2cb   : > { %3174 = vst [vmem:[%s3585_s17 + $0x1ee8] sm:$0xff] %v2150_v59  ;;  %v2153_v1 = vmax.f32 %v1129_v62, 0.11  ;;  %v1130_v2 = vld [vmem:[%s3573_s30 + $0x1f08] sm:$0xff]  ;;  %v1131_v3 = vld [vmem:[%s3573_s30 + $0x1f10] sm:$0xff]  ;;  %v1132_v4 = vld [vmem:[%s3573_s30 + $0x1f18] sm:$0xff] }
 0x2cc   : > { %3175 = vst [vmem:[%s3585_s17 + $0x1ef0] sm:$0xff] %v2151_v63  ;;  %3176 = vst [vmem:[%s3585_s17 + $0x1ef8] sm:$0xff] %v2152_v0  ;;  %v2154_v5 = vmax.f32 %v1130_v2, 0.11  ;;  %v2155_v6 = vmax.f32 %v1131_v3, 0.11 }
 0x2cd   : > { %3177 = vst [vmem:[%s3585_s17 + $0x1f00] sm:$0xff] %v2153_v1  ;;  %v2156_v7 = vmax.f32 %v1132_v4, 0.11  ;;  %v1133_v8 = vld [vmem:[%s3573_s30 + $0x1f20] sm:$0xff]  ;;  %v1134_v9 = vld [vmem:[%s3573_s30 + $0x1f28] sm:$0xff]  ;;  %v1135_v10 = vld [vmem:[%s3573_s30 + $0x1f30] sm:$0xff] }
 0x2ce   : > { %3178 = vst [vmem:[%s3585_s17 + $0x1f08] sm:$0xff] %v2154_v5  ;;  %3179 = vst [vmem:[%s3585_s17 + $0x1f10] sm:$0xff] %v2155_v6  ;;  %v2157_v11 = vmax.f32 %v1133_v8, 0.11  ;;  %v2158_v12 = vmax.f32 %v1134_v9, 0.11 }
 0x2cf   : > { %3180 = vst [vmem:[%s3585_s17 + $0x1f18] sm:$0xff] %v2156_v7  ;;  %v2159_v13 = vmax.f32 %v1135_v10, 0.11  ;;  %v1136_v14 = vld [vmem:[%s3573_s30 + $0x1f38] sm:$0xff]  ;;  %v1137_v15 = vld [vmem:[%s3573_s30 + $0x1f40] sm:$0xff]  ;;  %v1138_v16 = vld [vmem:[%s3573_s30 + $0x1f48] sm:$0xff] }
 0x2d0   : > { %3181 = vst [vmem:[%s3585_s17 + $0x1f20] sm:$0xff] %v2157_v11  ;;  %3182 = vst [vmem:[%s3585_s17 + $0x1f28] sm:$0xff] %v2158_v12  ;;  %v2160_v17 = vmax.f32 %v1136_v14, 0.11  ;;  %v2161_v18 = vmax.f32 %v1137_v15, 0.11 }
 0x2d1   : > { %3183 = vst [vmem:[%s3585_s17 + $0x1f30] sm:$0xff] %v2159_v13  ;;  %v2162_v19 = vmax.f32 %v1138_v16, 0.11  ;;  %v1139_v20 = vld [vmem:[%s3573_s30 + $0x1f50] sm:$0xff]  ;;  %v1140_v21 = vld [vmem:[%s3573_s30 + $0x1f58] sm:$0xff]  ;;  %v1141_v22 = vld [vmem:[%s3573_s30 + $0x1f60] sm:$0xff] }
 0x2d2   : > { %3184 = vst [vmem:[%s3585_s17 + $0x1f38] sm:$0xff] %v2160_v17  ;;  %3185 = vst [vmem:[%s3585_s17 + $0x1f40] sm:$0xff] %v2161_v18  ;;  %v2163_v23 = vmax.f32 %v1139_v20, 0.11  ;;  %v2164_v24 = vmax.f32 %v1140_v21, 0.11 }
 0x2d3   : > { %3186 = vst [vmem:[%s3585_s17 + $0x1f48] sm:$0xff] %v2162_v19  ;;  %v2165_v25 = vmax.f32 %v1141_v22, 0.11  ;;  %v1142_v26 = vld [vmem:[%s3573_s30 + $0x1f68] sm:$0xff]  ;;  %v1143_v27 = vld [vmem:[%s3573_s30 + $0x1f70] sm:$0xff]  ;;  %v1144_v28 = vld [vmem:[%s3573_s30 + $0x1f78] sm:$0xff] }
 0x2d4   : > { %3187 = vst [vmem:[%s3585_s17 + $0x1f50] sm:$0xff] %v2163_v23  ;;  %3188 = vst [vmem:[%s3585_s17 + $0x1f58] sm:$0xff] %v2164_v24  ;;  %v2166_v29 = vmax.f32 %v1142_v26, 0.11  ;;  %v2167_v30 = vmax.f32 %v1143_v27, 0.11 }
 0x2d5   : > { %3189 = vst [vmem:[%s3585_s17 + $0x1f60] sm:$0xff] %v2165_v25  ;;  %v2168_v31 = vmax.f32 %v1144_v28, 0.11  ;;  %v1145_v32 = vld [vmem:[%s3573_s30 + $0x1f80] sm:$0xff]  ;;  %v1146_v33 = vld [vmem:[%s3573_s30 + $0x1f88] sm:$0xff]  ;;  %v1147_v34 = vld [vmem:[%s3573_s30 + $0x1f90] sm:$0xff] }
 0x2d6   : > { %3190 = vst [vmem:[%s3585_s17 + $0x1f68] sm:$0xff] %v2166_v29  ;;  %3191 = vst [vmem:[%s3585_s17 + $0x1f70] sm:$0xff] %v2167_v30  ;;  %v2169_v35 = vmax.f32 %v1145_v32, 0.11  ;;  %v2170_v36 = vmax.f32 %v1146_v33, 0.11 }
 0x2d7   : > { %3192 = vst [vmem:[%s3585_s17 + $0x1f78] sm:$0xff] %v2168_v31  ;;  %v2171_v37 = vmax.f32 %v1147_v34, 0.11  ;;  %v1148_v38 = vld [vmem:[%s3573_s30 + $0x1f98] sm:$0xff]  ;;  %v1149_v39 = vld [vmem:[%s3573_s30 + $0x1fa0] sm:$0xff]  ;;  %v1150_v40 = vld [vmem:[%s3573_s30 + $0x1fa8] sm:$0xff] }
 0x2d8   : > { %3193 = vst [vmem:[%s3585_s17 + $0x1f80] sm:$0xff] %v2169_v35  ;;  %3194 = vst [vmem:[%s3585_s17 + $0x1f88] sm:$0xff] %v2170_v36  ;;  %v2172_v41 = vmax.f32 %v1148_v38, 0.11  ;;  %v2173_v42 = vmax.f32 %v1149_v39, 0.11 }
 0x2d9   : > { %3195 = vst [vmem:[%s3585_s17 + $0x1f90] sm:$0xff] %v2171_v37  ;;  %v2174_v43 = vmax.f32 %v1150_v40, 0.11  ;;  %v1151_v44 = vld [vmem:[%s3573_s30 + $0x1fb0] sm:$0xff]  ;;  %v1152_v45 = vld [vmem:[%s3573_s30 + $0x1fb8] sm:$0xff]  ;;  %v1153_v46 = vld [vmem:[%s3573_s30 + $0x1fc0] sm:$0xff] }
 0x2da   : > { %3196 = vst [vmem:[%s3585_s17 + $0x1f98] sm:$0xff] %v2172_v41  ;;  %3197 = vst [vmem:[%s3585_s17 + $0x1fa0] sm:$0xff] %v2173_v42  ;;  %v2175_v47 = vmax.f32 %v1151_v44, 0.11  ;;  %v2176_v48 = vmax.f32 %v1152_v45, 0.11 }
 0x2db   : > { %3198 = vst [vmem:[%s3585_s17 + $0x1fa8] sm:$0xff] %v2174_v43  ;;  %v2177_v49 = vmax.f32 %v1153_v46, 0.11  ;;  %v1154_v50 = vld [vmem:[%s3573_s30 + $0x1fc8] sm:$0xff]  ;;  %v1155_v51 = vld [vmem:[%s3573_s30 + $0x1fd0] sm:$0xff]  ;;  %v1156_v52 = vld [vmem:[%s3573_s30 + $0x1fd8] sm:$0xff] }
 0x2dc   : > { %3199 = vst [vmem:[%s3585_s17 + $0x1fb0] sm:$0xff] %v2175_v47  ;;  %3200 = vst [vmem:[%s3585_s17 + $0x1fb8] sm:$0xff] %v2176_v48  ;;  %v2178_v53 = vmax.f32 %v1154_v50, 0.11  ;;  %v2179_v54 = vmax.f32 %v1155_v51, 0.11 }
 0x2dd   : > { %3201 = vst [vmem:[%s3585_s17 + $0x1fc0] sm:$0xff] %v2177_v49  ;;  %v2180_v55 = vmax.f32 %v1156_v52, 0.11  ;;  %v1157_v56 = vld [vmem:[%s3573_s30 + $0x1fe0] sm:$0xff]  ;;  %v1158_v57 = vld [vmem:[%s3573_s30 + $0x1fe8] sm:$0xff]  ;;  %v1159_v58 = vld [vmem:[%s3573_s30 + $0x1ff0] sm:$0xff] }
 0x2de   : > { %3202 = vst [vmem:[%s3585_s17 + $0x1fc8] sm:$0xff] %v2178_v53  ;;  %3203 = vst [vmem:[%s3585_s17 + $0x1fd0] sm:$0xff] %v2179_v54  ;;  %v2181_v59 = vmax.f32 %v1157_v56, 0.11  ;;  %v2182_v60 = vmax.f32 %v1158_v57, 0.11 }
 0x2df   : > { %3204 = vst [vmem:[%s3585_s17 + $0x1fd8] sm:$0xff] %v2180_v55  ;;  %v2183_v61 = vmax.f32 %v1159_v58, 0.11  ;;  %v1160_v62 = vld [vmem:[%s3573_s30 + $0x1ff8] sm:$0xff]  ;;  %p5689_p12 = scmp.ne.s32.totalorder %s5685_s18, 0  ;;  %s3459_s4 = smov [#allocation5]  }
 0x2e0   : > { %3205 = vst [vmem:[%s3585_s17 + $0x1fe0] sm:$0xff] %v2181_v59  ;;  %3206 = vst [vmem:[%s3585_s17 + $0x1fe8] sm:$0xff] %v2182_v60  ;;  %v2184_v63 = vmax.f32 %v1160_v62, 0.11  ;;  %s3394_s5 = sshll.u32 %s3459_s4, 4  ;;  %s3395_s5 = int_to_ptr.vmem [resolvable:$false] %s3394_s5 }
 0x2e1   : > { %3207 = vst [vmem:[%s3585_s17 + $0x1ff0] sm:$0xff] %v2183_v61  ;;  %p3392_p13 = pnand %p3391_p11, %p5689_p12  ;;  %s3396_s11 = scalar_lea.vmem %s3395_s5, 262144 }
 0x2e2   : > { %3208 = vst [vmem:[%s3585_s17 + $0x1ff8] sm:$0xff] %v2184_v63  ;;  %p3397_p5 = scmp.lt.s32.totalorder %s5632_s27, %s3395_s5  ;;  %p3398_p7 = scmp.lt.s32.totalorder %s3396_s11, %s3390_s3 }
 0x2e3   : > { %p3393_p4 = pneg %p3392_p13 }
 0x2e4   : > { %p3399_p8 = por %p3398_p7, %p3397_p5 }
 0x2e6   : > { %p3400_p10 = pnand %p3399_p8, %p3393_p4 }
 0x2e8   : > { %3403 = shalt.err (!%p3400_p10)
}
 0x2e9   : > { %s3404_s13 = scalar_lea.hbm %s5629_s29, 131072  ;;  %s3408_s20 = scalar_lea.hbm %s5680_s1, 262144 }
 0x2ea   : > { %p3405_p0 = scmp.ne.s32.totalorder %s5629_s29, %s3404_s13  ;;  %p3409_p1 = scmp.lt.s32.totalorder %s5629_s29, %s5680_s1 }
 0x2eb   : > { %p3410_p3 = scmp.lt.s32.totalorder %s3408_s20, %s3404_s13 }
 0x2ec   : > { %p3406_p2 = pnand %p3405_p0, %p5689_p12 }
 0x2ed   : > { %p3411_p6 = por %p3410_p3, %p3409_p1 }
 0x2ee   : > { %p3407_p9 = pneg %p3406_p2 }
 0x2f0   : > { %p3412_p11 = pnand %p3411_p6, %p3407_p9 }
 0x2f2   : > { %3415 = shalt.err (!%p3412_p11)
}
 0x2f3   : > { %s3460_s24 = smov 128   ;;  %s3461_s26 = smov 8  }
 0x2f4   : > { %3314 = dma.vmem_to_hbm [thread:$0]  (%p5689_p12), %s5632_s27, 131072, %s5629_s29, %s3210_s2, %s3460_s24, %s3460_s24, %s3461_s26  }
 0x2f5 PF: > { %s3238_s30 = sand.u32 1, %s3442_s6   ;;  %p5690_p13 = scmp.ne.s32.totalorder %s5686_s19, 0 }
 0x2f6   : > { %p5691_p4 = scmp.ge.s32.totalorder %s3454_s9, 2  ;;  %s3239_s17 = scalar_lea.sflag [#allocation4], %s3238_s30 }
 0x2f8   : > { %p3321_p5 = pnand %p5691_p4, %p5690_p13 }
 0x2fa   : > { %p3322_p7 = pneg %p3321_p5 }
 0x2fc   : > { %3437 = dma.done.wait (%p3322_p7), %s3239_s17, 131072  }
 0x2fd   : > { %3439 = vsyncadd (%p3322_p7), %s3239_s17, 4294836224  ;;  %p14_p8 = scmp.ge.s32.totalorder %s3497_s12, 4   ;;  %s5692_s6 = smov %s3446_s7 }
 0x2fe   : > { %s5693_s7 = smov %s3450_s8  ;;  %s5694_s8 = smov %s3509_s15 }
 0x2ff   : > { %s5695_s9 = smov %s3497_s12  ;;  %16 = sbr.rel (!%p14_p8) target bundleno = 5 (0x5), region = 69 }
 0x304   :  { %3244 = vsyncpa [#allocation3], 1 }
 0x305   :  { %3246 = vsyncpa [#allocation3 + $0x1], 1 }
 0x306   :  { %3247 = vsyncpa [#allocation4], 1 }
 0x307   :  { %3249 = vsyncpa [#allocation4 + $0x1], 1 }

</bundles_post_ra>
